<compile_context>
chip_gen: v5e
topology: v5e:2x2
jax: 0.10.0
libtpu: 0.0.40
codegen_flags: <defaults>
</compile_context>

<pallas_src>
import functools

import jax
import jax.numpy as jnp
from jax.experimental import pallas as pl
from jax.experimental.pallas import tpu as pltpu


def _round_up(x, m):
    return (x + m - 1) // m * m


# ------------------------------ Fused kernel -------------------------------- #

def _fused_patch_embed_kernel(xa_ref, xh_ref, w_ref, bgb_ref, o_ref, *,
                              kh, kw, stride, tile_ho, wo_blk, inv_e, eps):
    """One grid step = `tile_ho` output image rows x `wo_blk` output cols of one image.

    xa_ref : (tile_ho, s*s, WG, C)   bf16  phase-split input groups for this tile
    xh_ref : (qi_max,  s*s, WG, C)   bf16  halo groups from the next tile
    w_ref  : (kh*kw, C, Ep)          bf16  per-tap projection weights (E zero-padded)
    bgb_ref: (3, Ep)                 f32   rows = [conv bias, LN gamma, LN beta]
    o_ref  : (tile_ho*wo_blk, Ep)    bf16
    """
    s = stride
    # Append the halo rows once; every tap below is then a static unit-stride slice.
    x = jnp.concatenate([xa_ref[...], xh_ref[...]], axis=0)  # (tile_ho+qi_max, s*s, WG, C)
    tm = tile_ho * wo_blk
    ep = o_ref.shape[-1]

    acc = jnp.zeros((tm, ep), jnp.float32)
    for i in range(kh):                        # static python loops -> fully unrolled
        qi, ri = divmod(i, s)
        for j in range(kw):
            qj, rj = divmod(j, s)
            # Conv tap (i, j): rows ho*s+i -> group ho+qi / phase ri,
            #                  cols wo*s+j -> group wo+qj / phase rj.
            xt = x[qi:qi + tile_ho, ri * s + rj, qj:qj + wo_blk, :]  # (tile_ho, wo_blk, C)
            xt = xt.reshape(tm, xt.shape[-1])
            acc = acc + jnp.dot(xt, w_ref[i * kw + j],
                                preferred_element_type=jnp.float32)

    bgb = bgb_ref[...]
    y = acc + bgb[0:1, :]                      # conv bias; padded lanes stay exactly 0
    # LayerNorm over the TRUE embed_dim (padded lanes contribute 0 to both sums).
    ssum = jnp.sum(y, axis=-1, keepdims=True)
    ssq = jnp.sum(y * y, axis=-1, keepdims=True)
    mu = ssum * inv_e
    var = jnp.maximum(ssq * inv_e - mu * mu, 0.0)   # clamp: cancellation-safe
    yn = (y - mu) * jax.lax.rsqrt(var + eps)
    o_ref[...] = (yn * bgb[1:2, :] + bgb[2:3, :]).astype(o_ref.dtype)


def _fused_conv_ln(x_ph, w_taps, bgb, *, batch, n_t, hg_blocks, tile_ho, qi_max,
                   wo_blk, kh, kw, stride, e_real, eps, vmem_limit):
    n_tap, c_in, ep = w_taps.shape
    _, s2, wg, _ = x_ph.shape
    tm = tile_ho * wo_blk
    halo_blk = tile_ho // qi_max              # halo index-map scale (qi_max | tile_ho)

    kernel = functools.partial(
        _fused_patch_embed_kernel, kh=kh, kw=kw, stride=stride, tile_ho=tile_ho,
        wo_blk=wo_blk, inv_e=1.0 / float(e_real), eps=eps)

    flops = 2 * batch * n_t * tm * n_tap * c_in * ep
    bytes_acc = (x_ph.size * x_ph.dtype.itemsize + w_taps.size * 2 + bgb.size * 4
                 + batch * n_t * tm * ep * 2)

    cp = dict(dimension_semantics=("parallel", "parallel"))
    # NOTE(v7x): use pltpu.CORE_PARALLEL on the row axis to guarantee both TensorCores
    # split the grid; "parallel" is kept here because it lowers on every generation.
    if vmem_limit is not None:
        cp["vmem_limit_bytes"] = int(vmem_limit)

    return pl.pallas_call(
        kernel,
        out_shape=jax.ShapeDtypeStruct((batch, n_t * tm, ep), jnp.bfloat16),
        grid_spec=pltpu.PrefetchScalarGridSpec(
            num_scalar_prefetch=0,
            grid=(batch, n_t),
            in_specs=[
                # main tile: tile_ho H-groups of image b starting at group t*tile_ho
                pl.BlockSpec((tile_ho, s2, wg, c_in),
                             lambda b, t: (b * hg_blocks + t, 0, 0, 0)),
                # halo: the first qi_max H-groups of the next tile
                pl.BlockSpec((qi_max, s2, wg, c_in),
                             lambda b, t: ((b * hg_blocks + t + 1) * halo_blk, 0, 0, 0)),
                # grid-invariant operands (block index never changes -> fetched once)
                pl.BlockSpec((n_tap, c_in, ep), lambda b, t: (0, 0, 0)),
                pl.BlockSpec((3, ep), lambda b, t: (0, 0)),
            ],
            out_specs=pl.BlockSpec((None, tm, ep), lambda b, t: (b, t, 0)),
        ),
        compiler_params=pltpu.CompilerParams(**cp),
        cost_estimate=pl.CostEstimate(flops=flops,
                                      transcendentals=batch * n_t * tm,
                                      bytes_accessed=bytes_acc),
    )(x_ph, x_ph, w_taps, bgb)


# ------------------------------ JAX wrapper --------------------------------- #

def overlap_patch_embed(x, params, *, patch_size=7, stride=4,
                        target_rows=1024, vmem_budget=10 * 1024 * 1024):
    """OverlapPatchEmbed forward: Conv2d(k, s, p=k//2) + flatten + LayerNorm.

    x: (B, C, H, W) float32 (NCHW, like PyTorch).
    Returns (out, H_out, W_out) with out: (B, H_out*W_out, embed_dim) bfloat16.
    """
    w_conv = params["proj_weight"]    # (E, C, kh, kw)
    b_conv = params["proj_bias"]      # (E,)
    gamma = params["norm_weight"]     # (E,)
    beta = params["norm_bias"]        # (E,)

    kh = kw = patch_size
    pad = patch_size // 2
    s = stride
    B, C, H, W = x.shape
    E = w_conv.shape[0]

    Hp, Wp = H + 2 * pad, W + 2 * pad
    Ho = (Hp - kh) // s + 1
    Wo = (Wp - kw) // s + 1
    qi_max = (kh - 1) // s            # extra H-groups a tile may reach into (>= 1)
    qj_max = (kw - 1) // s
    assert qi_max >= 1, "module requires patch_size > stride"

    Ep = _round_up(E, 128)            # lane-dense weight columns / output
    wo_blk = _round_up(Wo, 8)         # sublane-aligned -> clean reshapes & full stores
    WG = max(-(-Wp // s), wo_blk + qj_max)   # W-groups (unit stride inside the kernel)

    # ---- choose tile_ho (output rows per grid step) under a cross-gen VMEM budget --- #
    def vmem_est(th):
        c_pad, wg_pad = _round_up(C, 128), _round_up(WG, 8)      # (8,128) VMEM tiling
        blk = th * s * s * wg_pad * c_pad * 2
        halo = qi_max * s * s * wg_pad * c_pad * 2
        w_b = kh * kw * _round_up(C, 8) * Ep * 2
        out_b = th * wo_blk * Ep * 2
        acc = th * wo_blk * Ep * 4
        # double-buffered pipelined operands + the in-kernel concat copy + accumulator
        return 2 * (blk + halo + out_b) + 2 * w_b + acc + blk + halo

    tile_ho = max(qi_max, min(Ho, max(1, target_rows // wo_blk)))
    tile_ho = _round_up(tile_ho, qi_max)
    while tile_ho > qi_max and vmem_est(tile_ho) > vmem_budget:
        tile_ho = max(qi_max, _round_up(max(1, tile_ho // 2), qi_max))
    vmem_limit = None
    if vmem_est(tile_ho) > vmem_budget:
        vmem_limit = min(vmem_est(tile_ho) + (4 << 20), 48 << 20)

    n_t = -(-Ho // tile_ho)
    g_real = -(-Hp // s)                          # H-groups holding real (conv-padded) rows
    hg_blocks = max(n_t + 1, -(-g_real // tile_ho))   # per-image tile_ho-blocks (incl. halo)
    HGt = hg_blocks * tile_ho

    # ---- single cheap layout pass: NCHW -> conv-padded phase-split NHWC (bf16) ------ #
    xn = jnp.transpose(x, (0, 2, 3, 1)).astype(jnp.bfloat16)
    xn = jnp.pad(xn, ((0, 0),
                      (pad, HGt * s - H - pad),
                      (pad, WG * s - W - pad),
                      (0, 0)))
    # (B, HGt*s, WG*s, C) -> (B*HGt, s*s, WG, C): the (row%s, col%s) phases become a
    # leading dim, so every conv tap is a unit-stride slice + static index in-kernel.
    xph = xn.reshape(B, HGt, s, WG, s, C).transpose(0, 1, 2, 4, 3, 5)
    xph = xph.reshape(B * HGt, s * s, WG, C)

    # Per-tap weights: (E, C, kh, kw) -> (kh*kw, C, Ep) bf16, zero-padded beyond E.
    w_taps = jnp.transpose(w_conv, (2, 3, 1, 0)).reshape(kh * kw, C, E)
    w_taps = jnp.pad(w_taps, ((0, 0), (0, 0), (0, Ep - E))).astype(jnp.bfloat16)
    # Folded bias / gamma / beta operand.
    bgb = jnp.stack([b_conv, gamma, beta]).astype(jnp.float32)
    bgb = jnp.pad(bgb, ((0, 0), (0, Ep - E)))

    out = _fused_conv_ln(
        xph, w_taps, bgb, batch=B, n_t=n_t, hg_blocks=hg_blocks, tile_ho=tile_ho,
        qi_max=qi_max, wo_blk=wo_blk, kh=kh, kw=kw, stride=s, e_real=E, eps=1e-5,
        vmem_limit=vmem_limit)

    out = out.reshape(B, n_t * tile_ho, wo_blk, Ep)[:, :Ho, :Wo, :E]
    return out.reshape(B, Ho * Wo, E), Ho, Wo


# --------------------------- Fallback (safety net) --------------------------- #
# Previously-proven path: XLA im2col + fused matmul/bias/LayerNorm Pallas kernel.
# Only used if the fused kernel above fails to lower on this TPU / jax version.

def _mm_ln_kernel(p_ref, w_ref, bgb_ref, o_ref, *, inv_e, eps):
    y = jnp.dot(p_ref[...], w_ref[...], preferred_element_type=jnp.float32)
    bgb = bgb_ref[...]
    y = y + bgb[0:1, :]
    mu = jnp.sum(y, axis=-1, keepdims=True) * inv_e
    var = jnp.maximum(jnp.sum(y * y, axis=-1, keepdims=True) * inv_e - mu * mu, 0.0)
    yn = (y - mu) * jax.lax.rsqrt(var + eps)
    o_ref[...] = (yn * bgb[1:2, :] + bgb[2:3, :]).astype(o_ref.dtype)


def _fallback_patch_embed(x, params, *, patch_size, stride, tm=512):
    w_conv = params["proj_weight"]
    E = w_conv.shape[0]
    kh = kw = patch_size
    pad = patch_size // 2
    s = stride
    B, C, H, W = x.shape
    xn = jnp.transpose(x, (0, 2, 3, 1)).astype(jnp.bfloat16)
    xn = jnp.pad(xn, ((0, 0), (pad, pad), (pad, pad), (0, 0)))
    Hp, Wp = H + 2 * pad, W + 2 * pad
    Ho, Wo = (Hp - kh) // s + 1, (Wp - kw) // s + 1
    cols = [xn[:, i:i + s * Ho:s, j:j + s * Wo:s, :] for i in range(kh) for j in range(kw)]
    patches = jnp.stack(cols, axis=3).reshape(B * Ho * Wo, kh * kw * C)
    M, K = patches.shape
    Kp, Ep = _round_up(K, 128), _round_up(E, 128)
    tm = min(tm, _round_up(M, 8))
    Mp = _round_up(M, tm)
    patches = jnp.pad(patches, ((0, Mp - M), (0, Kp - K)))
    w_mat = jnp.transpose(w_conv, (2, 3, 1, 0)).reshape(K, E)
    w_mat = jnp.pad(w_mat, ((0, Kp - K), (0, Ep - E))).astype(jnp.bfloat16)
    bgb = jnp.stack([params["proj_bias"], params["norm_weight"], params["norm_bias"]])
    bgb = jnp.pad(bgb.astype(jnp.float32), ((0, 0), (0, Ep - E)))
    out = pl.pallas_call(
        functools.partial(_mm_ln_kernel, inv_e=1.0 / float(E), eps=1e-5),
        out_shape=jax.ShapeDtypeStruct((Mp, Ep), jnp.bfloat16),
        grid_spec=pltpu.PrefetchScalarGridSpec(
            num_scalar_prefetch=0, grid=(Mp // tm,),
            in_specs=[pl.BlockSpec((tm, Kp), lambda i: (i, 0)),
                      pl.BlockSpec((Kp, Ep), lambda i: (0, 0)),
                      pl.BlockSpec((3, Ep), lambda i: (0, 0))],
            out_specs=pl.BlockSpec((tm, Ep), lambda i: (i, 0))),
        compiler_params=pltpu.CompilerParams(dimension_semantics=("parallel",)),
    )(patches, w_mat, bgb)
    return out[:M, :E].reshape(B, Ho * Wo, E), Ho, Wo


# ---------------------------- Reference (JAX) -------------------------------- #

def _reference(x, params, *, patch_size=7, stride=4):
    w = params["proj_weight"]
    b = params["proj_bias"]
    pad = patch_size // 2
    y = jax.lax.conv_general_dilated(
        x, w, window_strides=(stride, stride),
        padding=((pad, pad), (pad, pad)),
        dimension_numbers=("NCHW", "OIHW", "NCHW"),
        precision=jax.lax.Precision.HIGHEST)
    y = y + b[None, :, None, None]
    B, E, H, W = y.shape
    y = y.reshape(B, E, H * W).transpose(0, 2, 1)      # (B, N, E)
    mu = jnp.mean(y, axis=-1, keepdims=True)
    var = jnp.mean((y - mu) ** 2, axis=-1, keepdims=True)
    y = (y - mu) / jnp.sqrt(var + 1e-5)
    return y * params["norm_weight"] + params["norm_bias"], H, W


# ---------------------------------- Main ------------------------------------- #

if __name__ == "__main__":
    # Small synthetic config consistent with the module:
    #   patch_size=7, stride=4, in_chans=4, embed_dim=32, input 2x4x16x16
    patch_size, stride = 7, 4
    in_chans, embed_dim = 4, 32
    B, H, W = 2, 16, 16

    key = jax.random.PRNGKey(0)
    k_x, k_w, k_b, k_g, k_bt = jax.random.split(key, 5)

    x = jax.random.normal(k_x, (B, in_chans, H, W), dtype=jnp.float32)
    params = {
        "proj_weight": 0.05 * jax.random.normal(
            k_w, (embed_dim, in_chans, patch_size, patch_size), dtype=jnp.float32),
        "proj_bias": 0.01 * jax.random.normal(k_b, (embed_dim,), dtype=jnp.float32),
        "norm_weight": 1.0 + 0.1 * jax.random.normal(k_g, (embed_dim,), dtype=jnp.float32),
        "norm_bias": 0.1 * jax.random.normal(k_bt, (embed_dim,), dtype=jnp.float32),
    }

    try:
        out, Ho, Wo = overlap_patch_embed(x, params, patch_size=patch_size, stride=stride)
        out = jax.block_until_ready(out)
    except Exception:
        # Safety net: fall back to the proven im2col + fused matmul/LN kernel.
        out, Ho, Wo = _fallback_patch_embed(x, params, patch_size=patch_size, stride=stride)
        out = jax.block_until_ready(out)

    out_f32 = out.astype(jnp.float32)

    # Reference 1: same bf16 operand quantization as the kernel (tight-ish tolerance;
    # slack covers the bf16 output store).
    params_q = dict(params)
    params_q["proj_weight"] = params["proj_weight"].astype(jnp.bfloat16).astype(jnp.float32)
    x_q = x.astype(jnp.bfloat16).astype(jnp.float32)
    ref_q, Hq, Wq = _reference(x_q, params_q, patch_size=patch_size, stride=stride)

    # Reference 2: full f32 reference (loose tolerance: covers bf16 in/out rounding).
    ref_f, Hr, Wr = _reference(x, params, patch_size=patch_size, stride=stride)

    assert (Ho, Wo) == (Hq, Wq) == (Hr, Wr)
    assert out.shape == (B, Ho * Wo, embed_dim)
    assert jnp.allclose(out_f32, ref_q, atol=2.5e-2, rtol=2.5e-2)
    assert jnp.allclose(out_f32, ref_f, atol=6e-2, rtol=6e-2)

    print("KERNEL_OK")
</pallas_src>

<mosaic_0001>
module attributes {stable_mosaic.version = 11 : i64} {
  func.func @_fused_patch_embed_kernel(%arg0: i32, %arg1: i32, %arg2: memref<4x16x9x4xbf16, #tpu.memory_space<vmem>>, %arg3: memref<1x16x9x4xbf16, #tpu.memory_space<vmem>>, %arg4: memref<49x4x128xbf16, #tpu.memory_space<vmem>>, %arg5: memref<3x128xf32, #tpu.memory_space<vmem>>, %arg6: memref<1x32x128xbf16, #tpu.memory_space<vmem>>) attributes {dimension_semantics = [#tpu.dimension_semantics<parallel>, #tpu.dimension_semantics<parallel>], iteration_bounds = array<i64: 2, 1>, scalar_prefetch = 0 : i64, scratch_operands = 0 : i64, tpu.core_type = #tpu.core_type<tc>, window_params = [{transform_indices = @transform_0, window_bounds = array<i64: 4, 16, 9, 4>}, {transform_indices = @transform_1, window_bounds = array<i64: 1, 16, 9, 4>}, {pipeline_mode = #tpu.pipeline_mode<synchronous>, transform_indices = @transform_2, window_bounds = array<i64: 49, 4, 128>}, {pipeline_mode = #tpu.pipeline_mode<synchronous>, transform_indices = @transform_3, window_bounds = array<i64: 3, 128>}, {transform_indices = @transform_4, window_bounds = array<i64: 1, 32, 128>}]} {
    %c0 = arith.constant 0 : index
    %c0_0 = arith.constant 0 : index
    %c0_1 = arith.constant 0 : index
    %c0_2 = arith.constant 0 : index
    %0 = vector.load %arg2[%c0, %c0_0, %c0_1, %c0_2] : memref<4x16x9x4xbf16, #tpu.memory_space<vmem>>, vector<4x16x9x4xbf16>
    %c0_3 = arith.constant 0 : index
    %c0_4 = arith.constant 0 : index
    %c0_5 = arith.constant 0 : index
    %c0_6 = arith.constant 0 : index
    %1 = vector.load %arg3[%c0_3, %c0_4, %c0_5, %c0_6] : memref<1x16x9x4xbf16, #tpu.memory_space<vmem>>, vector<1x16x9x4xbf16>
    %2 = tpu.concatenate %0, %1 in 0 : vector<4x16x9x4xbf16>, vector<1x16x9x4xbf16> -> vector<5x16x9x4xbf16>
    %cst = arith.constant 0.000000e+00 : f32
    %3 = vector.broadcast %cst : f32 to vector<32x128xf32>
    %4 = vector.extract_strided_slice %2 {offsets = [0, 0, 0, 0], sizes = [4, 1, 8, 4], strides = [1, 1, 1, 1]} : vector<5x16x9x4xbf16> to vector<4x1x8x4xbf16>
    %5 = vector.shape_cast %4 : vector<4x1x8x4xbf16> to vector<4x8x4xbf16>
    %6 = vector.shape_cast %5 : vector<4x8x4xbf16> to vector<32x4xbf16>
    %c0_7 = arith.constant 0 : index
    %c0_8 = arith.constant 0 : index
    %c0_9 = arith.constant 0 : index
    %7 = vector.load %arg4[%c0_7, %c0_8, %c0_9] : memref<49x4x128xbf16, #tpu.memory_space<vmem>>, vector<1x4x128xbf16>
    %8 = vector.shape_cast %7 : vector<1x4x128xbf16> to vector<4x128xbf16>
    %cst_10 = arith.constant dense<0.000000e+00> : vector<32x128xf32>
    %9 = tpu.matmul %6, %8, %cst_10 {dimension_numbers = #tpu.dot_dimension_numbers<[1], [0], [0], [1], [0, 0, 1, 1], [], []>} : vector<32x4xbf16>, vector<4x128xbf16>, vector<32x128xf32> -> vector<32x128xf32>
    %10 = arith.addf %3, %9 : vector<32x128xf32>
    %11 = vector.extract_strided_slice %2 {offsets = [0, 1, 0, 0], sizes = [4, 1, 8, 4], strides = [1, 1, 1, 1]} : vector<5x16x9x4xbf16> to vector<4x1x8x4xbf16>
    %12 = vector.shape_cast %11 : vector<4x1x8x4xbf16> to vector<4x8x4xbf16>
    %13 = vector.shape_cast %12 : vector<4x8x4xbf16> to vector<32x4xbf16>
    %c1 = arith.constant 1 : index
    %c0_11 = arith.constant 0 : index
    %c0_12 = arith.constant 0 : index
    %14 = vector.load %arg4[%c1, %c0_11, %c0_12] : memref<49x4x128xbf16, #tpu.memory_space<vmem>>, vector<1x4x128xbf16>
    %15 = vector.shape_cast %14 : vector<1x4x128xbf16> to vector<4x128xbf16>
    %cst_13 = arith.constant dense<0.000000e+00> : vector<32x128xf32>
    %16 = tpu.matmul %13, %15, %cst_13 {dimension_numbers = #tpu.dot_dimension_numbers<[1], [0], [0], [1], [0, 0, 1, 1], [], []>} : vector<32x4xbf16>, vector<4x128xbf16>, vector<32x128xf32> -> vector<32x128xf32>
    %17 = arith.addf %10, %16 : vector<32x128xf32>
    %18 = vector.extract_strided_slice %2 {offsets = [0, 2, 0, 0], sizes = [4, 1, 8, 4], strides = [1, 1, 1, 1]} : vector<5x16x9x4xbf16> to vector<4x1x8x4xbf16>
    %19 = vector.shape_cast %18 : vector<4x1x8x4xbf16> to vector<4x8x4xbf16>
    %20 = vector.shape_cast %19 : vector<4x8x4xbf16> to vector<32x4xbf16>
    %c2 = arith.constant 2 : index
    %c0_14 = arith.constant 0 : index
    %c0_15 = arith.constant 0 : index
    %21 = vector.load %arg4[%c2, %c0_14, %c0_15] : memref<49x4x128xbf16, #tpu.memory_space<vmem>>, vector<1x4x128xbf16>
    %22 = vector.shape_cast %21 : vector<1x4x128xbf16> to vector<4x128xbf16>
    %cst_16 = arith.constant dense<0.000000e+00> : vector<32x128xf32>
    %23 = tpu.matmul %20, %22, %cst_16 {dimension_numbers = #tpu.dot_dimension_numbers<[1], [0], [0], [1], [0, 0, 1, 1], [], []>} : vector<32x4xbf16>, vector<4x128xbf16>, vector<32x128xf32> -> vector<32x128xf32>
    %24 = arith.addf %17, %23 : vector<32x128xf32>
    %25 = vector.extract_strided_slice %2 {offsets = [0, 3, 0, 0], sizes = [4, 1, 8, 4], strides = [1, 1, 1, 1]} : vector<5x16x9x4xbf16> to vector<4x1x8x4xbf16>
    %26 = vector.shape_cast %25 : vector<4x1x8x4xbf16> to vector<4x8x4xbf16>
    %27 = vector.shape_cast %26 : vector<4x8x4xbf16> to vector<32x4xbf16>
    %c3 = arith.constant 3 : index
    %c0_17 = arith.constant 0 : index
    %c0_18 = arith.constant 0 : index
    %28 = vector.load %arg4[%c3, %c0_17, %c0_18] : memref<49x4x128xbf16, #tpu.memory_space<vmem>>, vector<1x4x128xbf16>
    %29 = vector.shape_cast %28 : vector<1x4x128xbf16> to vector<4x128xbf16>
    %cst_19 = arith.constant dense<0.000000e+00> : vector<32x128xf32>
    %30 = tpu.matmul %27, %29, %cst_19 {dimension_numbers = #tpu.dot_dimension_numbers<[1], [0], [0], [1], [0, 0, 1, 1], [], []>} : vector<32x4xbf16>, vector<4x128xbf16>, vector<32x128xf32> -> vector<32x128xf32>
    %31 = arith.addf %24, %30 : vector<32x128xf32>
    %32 = vector.extract_strided_slice %2 {offsets = [0, 0, 1, 0], sizes = [4, 1, 8, 4], strides = [1, 1, 1, 1]} : vector<5x16x9x4xbf16> to vector<4x1x8x4xbf16>
    %33 = vector.shape_cast %32 : vector<4x1x8x4xbf16> to vector<4x8x4xbf16>
    %34 = vector.shape_cast %33 : vector<4x8x4xbf16> to vector<32x4xbf16>
    %c4 = arith.constant 4 : index
    %c0_20 = arith.constant 0 : index
    %c0_21 = arith.constant 0 : index
    %35 = vector.load %arg4[%c4, %c0_20, %c0_21] : memref<49x4x128xbf16, #tpu.memory_space<vmem>>, vector<1x4x128xbf16>
    %36 = vector.shape_cast %35 : vector<1x4x128xbf16> to vector<4x128xbf16>
    %cst_22 = arith.constant dense<0.000000e+00> : vector<32x128xf32>
    %37 = tpu.matmul %34, %36, %cst_22 {dimension_numbers = #tpu.dot_dimension_numbers<[1], [0], [0], [1], [0, 0, 1, 1], [], []>} : vector<32x4xbf16>, vector<4x128xbf16>, vector<32x128xf32> -> vector<32x128xf32>
    %38 = arith.addf %31, %37 : vector<32x128xf32>
    %39 = vector.extract_strided_slice %2 {offsets = [0, 1, 1, 0], sizes = [4, 1, 8, 4], strides = [1, 1, 1, 1]} : vector<5x16x9x4xbf16> to vector<4x1x8x4xbf16>
    %40 = vector.shape_cast %39 : vector<4x1x8x4xbf16> to vector<4x8x4xbf16>
    %41 = vector.shape_cast %40 : vector<4x8x4xbf16> to vector<32x4xbf16>
    %c5 = arith.constant 5 : index
    %c0_23 = arith.constant 0 : index
    %c0_24 = arith.constant 0 : index
    %42 = vector.load %arg4[%c5, %c0_23, %c0_24] : memref<49x4x128xbf16, #tpu.memory_space<vmem>>, vector<1x4x128xbf16>
    %43 = vector.shape_cast %42 : vector<1x4x128xbf16> to vector<4x128xbf16>
    %cst_25 = arith.constant dense<0.000000e+00> : vector<32x128xf32>
    %44 = tpu.matmul %41, %43, %cst_25 {dimension_numbers = #tpu.dot_dimension_numbers<[1], [0], [0], [1], [0, 0, 1, 1], [], []>} : vector<32x4xbf16>, vector<4x128xbf16>, vector<32x128xf32> -> vector<32x128xf32>
    %45 = arith.addf %38, %44 : vector<32x128xf32>
    %46 = vector.extract_strided_slice %2 {offsets = [0, 2, 1, 0], sizes = [4, 1, 8, 4], strides = [1, 1, 1, 1]} : vector<5x16x9x4xbf16> to vector<4x1x8x4xbf16>
    %47 = vector.shape_cast %46 : vector<4x1x8x4xbf16> to vector<4x8x4xbf16>
    %48 = vector.shape_cast %47 : vector<4x8x4xbf16> to vector<32x4xbf16>
    %c6 = arith.constant 6 : index
    %c0_26 = arith.constant 0 : index
    %c0_27 = arith.constant 0 : index
    %49 = vector.load %arg4[%c6, %c0_26, %c0_27] : memref<49x4x128xbf16, #tpu.memory_space<vmem>>, vector<1x4x128xbf16>
    %50 = vector.shape_cast %49 : vector<1x4x128xbf16> to vector<4x128xbf16>
    %cst_28 = arith.constant dense<0.000000e+00> : vector<32x128xf32>
    %51 = tpu.matmul %48, %50, %cst_28 {dimension_numbers = #tpu.dot_dimension_numbers<[1], [0], [0], [1], [0, 0, 1, 1], [], []>} : vector<32x4xbf16>, vector<4x128xbf16>, vector<32x128xf32> -> vector<32x128xf32>
    %52 = arith.addf %45, %51 : vector<32x128xf32>
    %53 = vector.extract_strided_slice %2 {offsets = [0, 4, 0, 0], sizes = [4, 1, 8, 4], strides = [1, 1, 1, 1]} : vector<5x16x9x4xbf16> to vector<4x1x8x4xbf16>
    %54 = vector.shape_cast %53 : vector<4x1x8x4xbf16> to vector<4x8x4xbf16>
    %55 = vector.shape_cast %54 : vector<4x8x4xbf16> to vector<32x4xbf16>
    %c7 = arith.constant 7 : index
    %c0_29 = arith.constant 0 : index
    %c0_30 = arith.constant 0 : index
    %56 = vector.load %arg4[%c7, %c0_29, %c0_30] : memref<49x4x128xbf16, #tpu.memory_space<vmem>>, vector<1x4x128xbf16>
    %57 = vector.shape_cast %56 : vector<1x4x128xbf16> to vector<4x128xbf16>
    %cst_31 = arith.constant dense<0.000000e+00> : vector<32x128xf32>
    %58 = tpu.matmul %55, %57, %cst_31 {dimension_numbers = #tpu.dot_dimension_numbers<[1], [0], [0], [1], [0, 0, 1, 1], [], []>} : vector<32x4xbf16>, vector<4x128xbf16>, vector<32x128xf32> -> vector<32x128xf32>
    %59 = arith.addf %52, %58 : vector<32x128xf32>
    %60 = vector.extract_strided_slice %2 {offsets = [0, 5, 0, 0], sizes = [4, 1, 8, 4], strides = [1, 1, 1, 1]} : vector<5x16x9x4xbf16> to vector<4x1x8x4xbf16>
    %61 = vector.shape_cast %60 : vector<4x1x8x4xbf16> to vector<4x8x4xbf16>
    %62 = vector.shape_cast %61 : vector<4x8x4xbf16> to vector<32x4xbf16>
    %c8 = arith.constant 8 : index
    %c0_32 = arith.constant 0 : index
    %c0_33 = arith.constant 0 : index
    %63 = vector.load %arg4[%c8, %c0_32, %c0_33] : memref<49x4x128xbf16, #tpu.memory_space<vmem>>, vector<1x4x128xbf16>
    %64 = vector.shape_cast %63 : vector<1x4x128xbf16> to vector<4x128xbf16>
    %cst_34 = arith.constant dense<0.000000e+00> : vector<32x128xf32>
    %65 = tpu.matmul %62, %64, %cst_34 {dimension_numbers = #tpu.dot_dimension_numbers<[1], [0], [0], [1], [0, 0, 1, 1], [], []>} : vector<32x4xbf16>, vector<4x128xbf16>, vector<32x128xf32> -> vector<32x128xf32>
    %66 = arith.addf %59, %65 : vector<32x128xf32>
    %67 = vector.extract_strided_slice %2 {offsets = [0, 6, 0, 0], sizes = [4, 1, 8, 4], strides = [1, 1, 1, 1]} : vector<5x16x9x4xbf16> to vector<4x1x8x4xbf16>
    %68 = vector.shape_cast %67 : vector<4x1x8x4xbf16> to vector<4x8x4xbf16>
    %69 = vector.shape_cast %68 : vector<4x8x4xbf16> to vector<32x4xbf16>
    %c9 = arith.constant 9 : index
    %c0_35 = arith.constant 0 : index
    %c0_36 = arith.constant 0 : index
    %70 = vector.load %arg4[%c9, %c0_35, %c0_36] : memref<49x4x128xbf16, #tpu.memory_space<vmem>>, vector<1x4x128xbf16>
    %71 = vector.shape_cast %70 : vector<1x4x128xbf16> to vector<4x128xbf16>
    %cst_37 = arith.constant dense<0.000000e+00> : vector<32x128xf32>
    %72 = tpu.matmul %69, %71, %cst_37 {dimension_numbers = #tpu.dot_dimension_numbers<[1], [0], [0], [1], [0, 0, 1, 1], [], []>} : vector<32x4xbf16>, vector<4x128xbf16>, vector<32x128xf32> -> vector<32x128xf32>
    %73 = arith.addf %66, %72 : vector<32x128xf32>
    %74 = vector.extract_strided_slice %2 {offsets = [0, 7, 0, 0], sizes = [4, 1, 8, 4], strides = [1, 1, 1, 1]} : vector<5x16x9x4xbf16> to vector<4x1x8x4xbf16>
    %75 = vector.shape_cast %74 : vector<4x1x8x4xbf16> to vector<4x8x4xbf16>
    %76 = vector.shape_cast %75 : vector<4x8x4xbf16> to vector<32x4xbf16>
    %c10 = arith.constant 10 : index
    %c0_38 = arith.constant 0 : index
    %c0_39 = arith.constant 0 : index
    %77 = vector.load %arg4[%c10, %c0_38, %c0_39] : memref<49x4x128xbf16, #tpu.memory_space<vmem>>, vector<1x4x128xbf16>
    %78 = vector.shape_cast %77 : vector<1x4x128xbf16> to vector<4x128xbf16>
    %cst_40 = arith.constant dense<0.000000e+00> : vector<32x128xf32>
    %79 = tpu.matmul %76, %78, %cst_40 {dimension_numbers = #tpu.dot_dimension_numbers<[1], [0], [0], [1], [0, 0, 1, 1], [], []>} : vector<32x4xbf16>, vector<4x128xbf16>, vector<32x128xf32> -> vector<32x128xf32>
    %80 = arith.addf %73, %79 : vector<32x128xf32>
    %81 = vector.extract_strided_slice %2 {offsets = [0, 4, 1, 0], sizes = [4, 1, 8, 4], strides = [1, 1, 1, 1]} : vector<5x16x9x4xbf16> to vector<4x1x8x4xbf16>
    %82 = vector.shape_cast %81 : vector<4x1x8x4xbf16> to vector<4x8x4xbf16>
    %83 = vector.shape_cast %82 : vector<4x8x4xbf16> to vector<32x4xbf16>
    %c11 = arith.constant 11 : index
    %c0_41 = arith.constant 0 : index
    %c0_42 = arith.constant 0 : index
    %84 = vector.load %arg4[%c11, %c0_41, %c0_42] : memref<49x4x128xbf16, #tpu.memory_space<vmem>>, vector<1x4x128xbf16>
    %85 = vector.shape_cast %84 : vector<1x4x128xbf16> to vector<4x128xbf16>
    %cst_43 = arith.constant dense<0.000000e+00> : vector<32x128xf32>
    %86 = tpu.matmul %83, %85, %cst_43 {dimension_numbers = #tpu.dot_dimension_numbers<[1], [0], [0], [1], [0, 0, 1, 1], [], []>} : vector<32x4xbf16>, vector<4x128xbf16>, vector<32x128xf32> -> vector<32x128xf32>
    %87 = arith.addf %80, %86 : vector<32x128xf32>
    %88 = vector.extract_strided_slice %2 {offsets = [0, 5, 1, 0], sizes = [4, 1, 8, 4], strides = [1, 1, 1, 1]} : vector<5x16x9x4xbf16> to vector<4x1x8x4xbf16>
    %89 = vector.shape_cast %88 : vector<4x1x8x4xbf16> to vector<4x8x4xbf16>
    %90 = vector.shape_cast %89 : vector<4x8x4xbf16> to vector<32x4xbf16>
    %c12 = arith.constant 12 : index
    %c0_44 = arith.constant 0 : index
    %c0_45 = arith.constant 0 : index
    %91 = vector.load %arg4[%c12, %c0_44, %c0_45] : memref<49x4x128xbf16, #tpu.memory_space<vmem>>, vector<1x4x128xbf16>
    %92 = vector.shape_cast %91 : vector<1x4x128xbf16> to vector<4x128xbf16>
    %cst_46 = arith.constant dense<0.000000e+00> : vector<32x128xf32>
    %93 = tpu.matmul %90, %92, %cst_46 {dimension_numbers = #tpu.dot_dimension_numbers<[1], [0], [0], [1], [0, 0, 1, 1], [], []>} : vector<32x4xbf16>, vector<4x128xbf16>, vector<32x128xf32> -> vector<32x128xf32>
    %94 = arith.addf %87, %93 : vector<32x128xf32>
    %95 = vector.extract_strided_slice %2 {offsets = [0, 6, 1, 0], sizes = [4, 1, 8, 4], strides = [1, 1, 1, 1]} : vector<5x16x9x4xbf16> to vector<4x1x8x4xbf16>
    %96 = vector.shape_cast %95 : vector<4x1x8x4xbf16> to vector<4x8x4xbf16>
    %97 = vector.shape_cast %96 : vector<4x8x4xbf16> to vector<32x4xbf16>
    %c13 = arith.constant 13 : index
    %c0_47 = arith.constant 0 : index
    %c0_48 = arith.constant 0 : index
    %98 = vector.load %arg4[%c13, %c0_47, %c0_48] : memref<49x4x128xbf16, #tpu.memory_space<vmem>>, vector<1x4x128xbf16>
    %99 = vector.shape_cast %98 : vector<1x4x128xbf16> to vector<4x128xbf16>
    %cst_49 = arith.constant dense<0.000000e+00> : vector<32x128xf32>
    %100 = tpu.matmul %97, %99, %cst_49 {dimension_numbers = #tpu.dot_dimension_numbers<[1], [0], [0], [1], [0, 0, 1, 1], [], []>} : vector<32x4xbf16>, vector<4x128xbf16>, vector<32x128xf32> -> vector<32x128xf32>
    %101 = arith.addf %94, %100 : vector<32x128xf32>
    %102 = vector.extract_strided_slice %2 {offsets = [0, 8, 0, 0], sizes = [4, 1, 8, 4], strides = [1, 1, 1, 1]} : vector<5x16x9x4xbf16> to vector<4x1x8x4xbf16>
    %103 = vector.shape_cast %102 : vector<4x1x8x4xbf16> to vector<4x8x4xbf16>
    %104 = vector.shape_cast %103 : vector<4x8x4xbf16> to vector<32x4xbf16>
    %c14 = arith.constant 14 : index
    %c0_50 = arith.constant 0 : index
    %c0_51 = arith.constant 0 : index
    %105 = vector.load %arg4[%c14, %c0_50, %c0_51] : memref<49x4x128xbf16, #tpu.memory_space<vmem>>, vector<1x4x128xbf16>
    %106 = vector.shape_cast %105 : vector<1x4x128xbf16> to vector<4x128xbf16>
    %cst_52 = arith.constant dense<0.000000e+00> : vector<32x128xf32>
    %107 = tpu.matmul %104, %106, %cst_52 {dimension_numbers = #tpu.dot_dimension_numbers<[1], [0], [0], [1], [0, 0, 1, 1], [], []>} : vector<32x4xbf16>, vector<4x128xbf16>, vector<32x128xf32> -> vector<32x128xf32>
    %108 = arith.addf %101, %107 : vector<32x128xf32>
    %109 = vector.extract_strided_slice %2 {offsets = [0, 9, 0, 0], sizes = [4, 1, 8, 4], strides = [1, 1, 1, 1]} : vector<5x16x9x4xbf16> to vector<4x1x8x4xbf16>
    %110 = vector.shape_cast %109 : vector<4x1x8x4xbf16> to vector<4x8x4xbf16>
    %111 = vector.shape_cast %110 : vector<4x8x4xbf16> to vector<32x4xbf16>
    %c15 = arith.constant 15 : index
    %c0_53 = arith.constant 0 : index
    %c0_54 = arith.constant 0 : index
    %112 = vector.load %arg4[%c15, %c0_53, %c0_54] : memref<49x4x128xbf16, #tpu.memory_space<vmem>>, vector<1x4x128xbf16>
    %113 = vector.shape_cast %112 : vector<1x4x128xbf16> to vector<4x128xbf16>
    %cst_55 = arith.constant dense<0.000000e+00> : vector<32x128xf32>
    %114 = tpu.matmul %111, %113, %cst_55 {dimension_numbers = #tpu.dot_dimension_numbers<[1], [0], [0], [1], [0, 0, 1, 1], [], []>} : vector<32x4xbf16>, vector<4x128xbf16>, vector<32x128xf32> -> vector<32x128xf32>
    %115 = arith.addf %108, %114 : vector<32x128xf32>
    %116 = vector.extract_strided_slice %2 {offsets = [0, 10, 0, 0], sizes = [4, 1, 8, 4], strides = [1, 1, 1, 1]} : vector<5x16x9x4xbf16> to vector<4x1x8x4xbf16>
    %117 = vector.shape_cast %116 : vector<4x1x8x4xbf16> to vector<4x8x4xbf16>
    %118 = vector.shape_cast %117 : vector<4x8x4xbf16> to vector<32x4xbf16>
    %c16 = arith.constant 16 : index
    %c0_56 = arith.constant 0 : index
    %c0_57 = arith.constant 0 : index
    %119 = vector.load %arg4[%c16, %c0_56, %c0_57] : memref<49x4x128xbf16, #tpu.memory_space<vmem>>, vector<1x4x128xbf16>
    %120 = vector.shape_cast %119 : vector<1x4x128xbf16> to vector<4x128xbf16>
    %cst_58 = arith.constant dense<0.000000e+00> : vector<32x128xf32>
    %121 = tpu.matmul %118, %120, %cst_58 {dimension_numbers = #tpu.dot_dimension_numbers<[1], [0], [0], [1], [0, 0, 1, 1], [], []>} : vector<32x4xbf16>, vector<4x128xbf16>, vector<32x128xf32> -> vector<32x128xf32>
    %122 = arith.addf %115, %121 : vector<32x128xf32>
    %123 = vector.extract_strided_slice %2 {offsets = [0, 11, 0, 0], sizes = [4, 1, 8, 4], strides = [1, 1, 1, 1]} : vector<5x16x9x4xbf16> to vector<4x1x8x4xbf16>
    %124 = vector.shape_cast %123 : vector<4x1x8x4xbf16> to vector<4x8x4xbf16>
    %125 = vector.shape_cast %124 : vector<4x8x4xbf16> to vector<32x4xbf16>
    %c17 = arith.constant 17 : index
    %c0_59 = arith.constant 0 : index
    %c0_60 = arith.constant 0 : index
    %126 = vector.load %arg4[%c17, %c0_59, %c0_60] : memref<49x4x128xbf16, #tpu.memory_space<vmem>>, vector<1x4x128xbf16>
    %127 = vector.shape_cast %126 : vector<1x4x128xbf16> to vector<4x128xbf16>
    %cst_61 = arith.constant dense<0.000000e+00> : vector<32x128xf32>
    %128 = tpu.matmul %125, %127, %cst_61 {dimension_numbers = #tpu.dot_dimension_numbers<[1], [0], [0], [1], [0, 0, 1, 1], [], []>} : vector<32x4xbf16>, vector<4x128xbf16>, vector<32x128xf32> -> vector<32x128xf32>
    %129 = arith.addf %122, %128 : vector<32x128xf32>
    %130 = vector.extract_strided_slice %2 {offsets = [0, 8, 1, 0], sizes = [4, 1, 8, 4], strides = [1, 1, 1, 1]} : vector<5x16x9x4xbf16> to vector<4x1x8x4xbf16>
    %131 = vector.shape_cast %130 : vector<4x1x8x4xbf16> to vector<4x8x4xbf16>
    %132 = vector.shape_cast %131 : vector<4x8x4xbf16> to vector<32x4xbf16>
    %c18 = arith.constant 18 : index
    %c0_62 = arith.constant 0 : index
    %c0_63 = arith.constant 0 : index
    %133 = vector.load %arg4[%c18, %c0_62, %c0_63] : memref<49x4x128xbf16, #tpu.memory_space<vmem>>, vector<1x4x128xbf16>
    %134 = vector.shape_cast %133 : vector<1x4x128xbf16> to vector<4x128xbf16>
    %cst_64 = arith.constant dense<0.000000e+00> : vector<32x128xf32>
    %135 = tpu.matmul %132, %134, %cst_64 {dimension_numbers = #tpu.dot_dimension_numbers<[1], [0], [0], [1], [0, 0, 1, 1], [], []>} : vector<32x4xbf16>, vector<4x128xbf16>, vector<32x128xf32> -> vector<32x128xf32>
    %136 = arith.addf %129, %135 : vector<32x128xf32>
    %137 = vector.extract_strided_slice %2 {offsets = [0, 9, 1, 0], sizes = [4, 1, 8, 4], strides = [1, 1, 1, 1]} : vector<5x16x9x4xbf16> to vector<4x1x8x4xbf16>
    %138 = vector.shape_cast %137 : vector<4x1x8x4xbf16> to vector<4x8x4xbf16>
    %139 = vector.shape_cast %138 : vector<4x8x4xbf16> to vector<32x4xbf16>
    %c19 = arith.constant 19 : index
    %c0_65 = arith.constant 0 : index
    %c0_66 = arith.constant 0 : index
    %140 = vector.load %arg4[%c19, %c0_65, %c0_66] : memref<49x4x128xbf16, #tpu.memory_space<vmem>>, vector<1x4x128xbf16>
    %141 = vector.shape_cast %140 : vector<1x4x128xbf16> to vector<4x128xbf16>
    %cst_67 = arith.constant dense<0.000000e+00> : vector<32x128xf32>
    %142 = tpu.matmul %139, %141, %cst_67 {dimension_numbers = #tpu.dot_dimension_numbers<[1], [0], [0], [1], [0, 0, 1, 1], [], []>} : vector<32x4xbf16>, vector<4x128xbf16>, vector<32x128xf32> -> vector<32x128xf32>
    %143 = arith.addf %136, %142 : vector<32x128xf32>
    %144 = vector.extract_strided_slice %2 {offsets = [0, 10, 1, 0], sizes = [4, 1, 8, 4], strides = [1, 1, 1, 1]} : vector<5x16x9x4xbf16> to vector<4x1x8x4xbf16>
    %145 = vector.shape_cast %144 : vector<4x1x8x4xbf16> to vector<4x8x4xbf16>
    %146 = vector.shape_cast %145 : vector<4x8x4xbf16> to vector<32x4xbf16>
    %c20 = arith.constant 20 : index
    %c0_68 = arith.constant 0 : index
    %c0_69 = arith.constant 0 : index
    %147 = vector.load %arg4[%c20, %c0_68, %c0_69] : memref<49x4x128xbf16, #tpu.memory_space<vmem>>, vector<1x4x128xbf16>
    %148 = vector.shape_cast %147 : vector<1x4x128xbf16> to vector<4x128xbf16>
    %cst_70 = arith.constant dense<0.000000e+00> : vector<32x128xf32>
    %149 = tpu.matmul %146, %148, %cst_70 {dimension_numbers = #tpu.dot_dimension_numbers<[1], [0], [0], [1], [0, 0, 1, 1], [], []>} : vector<32x4xbf16>, vector<4x128xbf16>, vector<32x128xf32> -> vector<32x128xf32>
    %150 = arith.addf %143, %149 : vector<32x128xf32>
    %151 = vector.extract_strided_slice %2 {offsets = [0, 12, 0, 0], sizes = [4, 1, 8, 4], strides = [1, 1, 1, 1]} : vector<5x16x9x4xbf16> to vector<4x1x8x4xbf16>
    %152 = vector.shape_cast %151 : vector<4x1x8x4xbf16> to vector<4x8x4xbf16>
    %153 = vector.shape_cast %152 : vector<4x8x4xbf16> to vector<32x4xbf16>
    %c21 = arith.constant 21 : index
    %c0_71 = arith.constant 0 : index
    %c0_72 = arith.constant 0 : index
    %154 = vector.load %arg4[%c21, %c0_71, %c0_72] : memref<49x4x128xbf16, #tpu.memory_space<vmem>>, vector<1x4x128xbf16>
    %155 = vector.shape_cast %154 : vector<1x4x128xbf16> to vector<4x128xbf16>
    %cst_73 = arith.constant dense<0.000000e+00> : vector<32x128xf32>
    %156 = tpu.matmul %153, %155, %cst_73 {dimension_numbers = #tpu.dot_dimension_numbers<[1], [0], [0], [1], [0, 0, 1, 1], [], []>} : vector<32x4xbf16>, vector<4x128xbf16>, vector<32x128xf32> -> vector<32x128xf32>
    %157 = arith.addf %150, %156 : vector<32x128xf32>
    %158 = vector.extract_strided_slice %2 {offsets = [0, 13, 0, 0], sizes = [4, 1, 8, 4], strides = [1, 1, 1, 1]} : vector<5x16x9x4xbf16> to vector<4x1x8x4xbf16>
    %159 = vector.shape_cast %158 : vector<4x1x8x4xbf16> to vector<4x8x4xbf16>
    %160 = vector.shape_cast %159 : vector<4x8x4xbf16> to vector<32x4xbf16>
    %c22 = arith.constant 22 : index
    %c0_74 = arith.constant 0 : index
    %c0_75 = arith.constant 0 : index
    %161 = vector.load %arg4[%c22, %c0_74, %c0_75] : memref<49x4x128xbf16, #tpu.memory_space<vmem>>, vector<1x4x128xbf16>
    %162 = vector.shape_cast %161 : vector<1x4x128xbf16> to vector<4x128xbf16>
    %cst_76 = arith.constant dense<0.000000e+00> : vector<32x128xf32>
    %163 = tpu.matmul %160, %162, %cst_76 {dimension_numbers = #tpu.dot_dimension_numbers<[1], [0], [0], [1], [0, 0, 1, 1], [], []>} : vector<32x4xbf16>, vector<4x128xbf16>, vector<32x128xf32> -> vector<32x128xf32>
    %164 = arith.addf %157, %163 : vector<32x128xf32>
    %165 = vector.extract_strided_slice %2 {offsets = [0, 14, 0, 0], sizes = [4, 1, 8, 4], strides = [1, 1, 1, 1]} : vector<5x16x9x4xbf16> to vector<4x1x8x4xbf16>
    %166 = vector.shape_cast %165 : vector<4x1x8x4xbf16> to vector<4x8x4xbf16>
    %167 = vector.shape_cast %166 : vector<4x8x4xbf16> to vector<32x4xbf16>
    %c23 = arith.constant 23 : index
    %c0_77 = arith.constant 0 : index
    %c0_78 = arith.constant 0 : index
    %168 = vector.load %arg4[%c23, %c0_77, %c0_78] : memref<49x4x128xbf16, #tpu.memory_space<vmem>>, vector<1x4x128xbf16>
    %169 = vector.shape_cast %168 : vector<1x4x128xbf16> to vector<4x128xbf16>
    %cst_79 = arith.constant dense<0.000000e+00> : vector<32x128xf32>
    %170 = tpu.matmul %167, %169, %cst_79 {dimension_numbers = #tpu.dot_dimension_numbers<[1], [0], [0], [1], [0, 0, 1, 1], [], []>} : vector<32x4xbf16>, vector<4x128xbf16>, vector<32x128xf32> -> vector<32x128xf32>
    %171 = arith.addf %164, %170 : vector<32x128xf32>
    %172 = vector.extract_strided_slice %2 {offsets = [0, 15, 0, 0], sizes = [4, 1, 8, 4], strides = [1, 1, 1, 1]} : vector<5x16x9x4xbf16> to vector<4x1x8x4xbf16>
    %173 = vector.shape_cast %172 : vector<4x1x8x4xbf16> to vector<4x8x4xbf16>
    %174 = vector.shape_cast %173 : vector<4x8x4xbf16> to vector<32x4xbf16>
    %c24 = arith.constant 24 : index
    %c0_80 = arith.constant 0 : index
    %c0_81 = arith.constant 0 : index
    %175 = vector.load %arg4[%c24, %c0_80, %c0_81] : memref<49x4x128xbf16, #tpu.memory_space<vmem>>, vector<1x4x128xbf16>
    %176 = vector.shape_cast %175 : vector<1x4x128xbf16> to vector<4x128xbf16>
    %cst_82 = arith.constant dense<0.000000e+00> : vector<32x128xf32>
    %177 = tpu.matmul %174, %176, %cst_82 {dimension_numbers = #tpu.dot_dimension_numbers<[1], [0], [0], [1], [0, 0, 1, 1], [], []>} : vector<32x4xbf16>, vector<4x128xbf16>, vector<32x128xf32> -> vector<32x128xf32>
    %178 = arith.addf %171, %177 : vector<32x128xf32>
    %179 = vector.extract_strided_slice %2 {offsets = [0, 12, 1, 0], sizes = [4, 1, 8, 4], strides = [1, 1, 1, 1]} : vector<5x16x9x4xbf16> to vector<4x1x8x4xbf16>
    %180 = vector.shape_cast %179 : vector<4x1x8x4xbf16> to vector<4x8x4xbf16>
    %181 = vector.shape_cast %180 : vector<4x8x4xbf16> to vector<32x4xbf16>
    %c25 = arith.constant 25 : index
    %c0_83 = arith.constant 0 : index
    %c0_84 = arith.constant 0 : index
    %182 = vector.load %arg4[%c25, %c0_83, %c0_84] : memref<49x4x128xbf16, #tpu.memory_space<vmem>>, vector<1x4x128xbf16>
    %183 = vector.shape_cast %182 : vector<1x4x128xbf16> to vector<4x128xbf16>
    %cst_85 = arith.constant dense<0.000000e+00> : vector<32x128xf32>
    %184 = tpu.matmul %181, %183, %cst_85 {dimension_numbers = #tpu.dot_dimension_numbers<[1], [0], [0], [1], [0, 0, 1, 1], [], []>} : vector<32x4xbf16>, vector<4x128xbf16>, vector<32x128xf32> -> vector<32x128xf32>
    %185 = arith.addf %178, %184 : vector<32x128xf32>
    %186 = vector.extract_strided_slice %2 {offsets = [0, 13, 1, 0], sizes = [4, 1, 8, 4], strides = [1, 1, 1, 1]} : vector<5x16x9x4xbf16> to vector<4x1x8x4xbf16>
    %187 = vector.shape_cast %186 : vector<4x1x8x4xbf16> to vector<4x8x4xbf16>
    %188 = vector.shape_cast %187 : vector<4x8x4xbf16> to vector<32x4xbf16>
    %c26 = arith.constant 26 : index
    %c0_86 = arith.constant 0 : index
    %c0_87 = arith.constant 0 : index
    %189 = vector.load %arg4[%c26, %c0_86, %c0_87] : memref<49x4x128xbf16, #tpu.memory_space<vmem>>, vector<1x4x128xbf16>
    %190 = vector.shape_cast %189 : vector<1x4x128xbf16> to vector<4x128xbf16>
    %cst_88 = arith.constant dense<0.000000e+00> : vector<32x128xf32>
    %191 = tpu.matmul %188, %190, %cst_88 {dimension_numbers = #tpu.dot_dimension_numbers<[1], [0], [0], [1], [0, 0, 1, 1], [], []>} : vector<32x4xbf16>, vector<4x128xbf16>, vector<32x128xf32> -> vector<32x128xf32>
    %192 = arith.addf %185, %191 : vector<32x128xf32>
    %193 = vector.extract_strided_slice %2 {offsets = [0, 14, 1, 0], sizes = [4, 1, 8, 4], strides = [1, 1, 1, 1]} : vector<5x16x9x4xbf16> to vector<4x1x8x4xbf16>
    %194 = vector.shape_cast %193 : vector<4x1x8x4xbf16> to vector<4x8x4xbf16>
    %195 = vector.shape_cast %194 : vector<4x8x4xbf16> to vector<32x4xbf16>
    %c27 = arith.constant 27 : index
    %c0_89 = arith.constant 0 : index
    %c0_90 = arith.constant 0 : index
    %196 = vector.load %arg4[%c27, %c0_89, %c0_90] : memref<49x4x128xbf16, #tpu.memory_space<vmem>>, vector<1x4x128xbf16>
    %197 = vector.shape_cast %196 : vector<1x4x128xbf16> to vector<4x128xbf16>
    %cst_91 = arith.constant dense<0.000000e+00> : vector<32x128xf32>
    %198 = tpu.matmul %195, %197, %cst_91 {dimension_numbers = #tpu.dot_dimension_numbers<[1], [0], [0], [1], [0, 0, 1, 1], [], []>} : vector<32x4xbf16>, vector<4x128xbf16>, vector<32x128xf32> -> vector<32x128xf32>
    %199 = arith.addf %192, %198 : vector<32x128xf32>
    %200 = vector.extract_strided_slice %2 {offsets = [1, 0, 0, 0], sizes = [4, 1, 8, 4], strides = [1, 1, 1, 1]} : vector<5x16x9x4xbf16> to vector<4x1x8x4xbf16>
    %201 = vector.shape_cast %200 : vector<4x1x8x4xbf16> to vector<4x8x4xbf16>
    %202 = vector.shape_cast %201 : vector<4x8x4xbf16> to vector<32x4xbf16>
    %c28 = arith.constant 28 : index
    %c0_92 = arith.constant 0 : index
    %c0_93 = arith.constant 0 : index
    %203 = vector.load %arg4[%c28, %c0_92, %c0_93] : memref<49x4x128xbf16, #tpu.memory_space<vmem>>, vector<1x4x128xbf16>
    %204 = vector.shape_cast %203 : vector<1x4x128xbf16> to vector<4x128xbf16>
    %cst_94 = arith.constant dense<0.000000e+00> : vector<32x128xf32>
    %205 = tpu.matmul %202, %204, %cst_94 {dimension_numbers = #tpu.dot_dimension_numbers<[1], [0], [0], [1], [0, 0, 1, 1], [], []>} : vector<32x4xbf16>, vector<4x128xbf16>, vector<32x128xf32> -> vector<32x128xf32>
    %206 = arith.addf %199, %205 : vector<32x128xf32>
    %207 = vector.extract_strided_slice %2 {offsets = [1, 1, 0, 0], sizes = [4, 1, 8, 4], strides = [1, 1, 1, 1]} : vector<5x16x9x4xbf16> to vector<4x1x8x4xbf16>
    %208 = vector.shape_cast %207 : vector<4x1x8x4xbf16> to vector<4x8x4xbf16>
    %209 = vector.shape_cast %208 : vector<4x8x4xbf16> to vector<32x4xbf16>
    %c29 = arith.constant 29 : index
    %c0_95 = arith.constant 0 : index
    %c0_96 = arith.constant 0 : index
    %210 = vector.load %arg4[%c29, %c0_95, %c0_96] : memref<49x4x128xbf16, #tpu.memory_space<vmem>>, vector<1x4x128xbf16>
    %211 = vector.shape_cast %210 : vector<1x4x128xbf16> to vector<4x128xbf16>
    %cst_97 = arith.constant dense<0.000000e+00> : vector<32x128xf32>
    %212 = tpu.matmul %209, %211, %cst_97 {dimension_numbers = #tpu.dot_dimension_numbers<[1], [0], [0], [1], [0, 0, 1, 1], [], []>} : vector<32x4xbf16>, vector<4x128xbf16>, vector<32x128xf32> -> vector<32x128xf32>
    %213 = arith.addf %206, %212 : vector<32x128xf32>
    %214 = vector.extract_strided_slice %2 {offsets = [1, 2, 0, 0], sizes = [4, 1, 8, 4], strides = [1, 1, 1, 1]} : vector<5x16x9x4xbf16> to vector<4x1x8x4xbf16>
    %215 = vector.shape_cast %214 : vector<4x1x8x4xbf16> to vector<4x8x4xbf16>
    %216 = vector.shape_cast %215 : vector<4x8x4xbf16> to vector<32x4xbf16>
    %c30 = arith.constant 30 : index
    %c0_98 = arith.constant 0 : index
    %c0_99 = arith.constant 0 : index
    %217 = vector.load %arg4[%c30, %c0_98, %c0_99] : memref<49x4x128xbf16, #tpu.memory_space<vmem>>, vector<1x4x128xbf16>
    %218 = vector.shape_cast %217 : vector<1x4x128xbf16> to vector<4x128xbf16>
    %cst_100 = arith.constant dense<0.000000e+00> : vector<32x128xf32>
    %219 = tpu.matmul %216, %218, %cst_100 {dimension_numbers = #tpu.dot_dimension_numbers<[1], [0], [0], [1], [0, 0, 1, 1], [], []>} : vector<32x4xbf16>, vector<4x128xbf16>, vector<32x128xf32> -> vector<32x128xf32>
    %220 = arith.addf %213, %219 : vector<32x128xf32>
    %221 = vector.extract_strided_slice %2 {offsets = [1, 3, 0, 0], sizes = [4, 1, 8, 4], strides = [1, 1, 1, 1]} : vector<5x16x9x4xbf16> to vector<4x1x8x4xbf16>
    %222 = vector.shape_cast %221 : vector<4x1x8x4xbf16> to vector<4x8x4xbf16>
    %223 = vector.shape_cast %222 : vector<4x8x4xbf16> to vector<32x4xbf16>
    %c31 = arith.constant 31 : index
    %c0_101 = arith.constant 0 : index
    %c0_102 = arith.constant 0 : index
    %224 = vector.load %arg4[%c31, %c0_101, %c0_102] : memref<49x4x128xbf16, #tpu.memory_space<vmem>>, vector<1x4x128xbf16>
    %225 = vector.shape_cast %224 : vector<1x4x128xbf16> to vector<4x128xbf16>
    %cst_103 = arith.constant dense<0.000000e+00> : vector<32x128xf32>
    %226 = tpu.matmul %223, %225, %cst_103 {dimension_numbers = #tpu.dot_dimension_numbers<[1], [0], [0], [1], [0, 0, 1, 1], [], []>} : vector<32x4xbf16>, vector<4x128xbf16>, vector<32x128xf32> -> vector<32x128xf32>
    %227 = arith.addf %220, %226 : vector<32x128xf32>
    %228 = vector.extract_strided_slice %2 {offsets = [1, 0, 1, 0], sizes = [4, 1, 8, 4], strides = [1, 1, 1, 1]} : vector<5x16x9x4xbf16> to vector<4x1x8x4xbf16>
    %229 = vector.shape_cast %228 : vector<4x1x8x4xbf16> to vector<4x8x4xbf16>
    %230 = vector.shape_cast %229 : vector<4x8x4xbf16> to vector<32x4xbf16>
    %c32 = arith.constant 32 : index
    %c0_104 = arith.constant 0 : index
    %c0_105 = arith.constant 0 : index
    %231 = vector.load %arg4[%c32, %c0_104, %c0_105] : memref<49x4x128xbf16, #tpu.memory_space<vmem>>, vector<1x4x128xbf16>
    %232 = vector.shape_cast %231 : vector<1x4x128xbf16> to vector<4x128xbf16>
    %cst_106 = arith.constant dense<0.000000e+00> : vector<32x128xf32>
    %233 = tpu.matmul %230, %232, %cst_106 {dimension_numbers = #tpu.dot_dimension_numbers<[1], [0], [0], [1], [0, 0, 1, 1], [], []>} : vector<32x4xbf16>, vector<4x128xbf16>, vector<32x128xf32> -> vector<32x128xf32>
    %234 = arith.addf %227, %233 : vector<32x128xf32>
    %235 = vector.extract_strided_slice %2 {offsets = [1, 1, 1, 0], sizes = [4, 1, 8, 4], strides = [1, 1, 1, 1]} : vector<5x16x9x4xbf16> to vector<4x1x8x4xbf16>
    %236 = vector.shape_cast %235 : vector<4x1x8x4xbf16> to vector<4x8x4xbf16>
    %237 = vector.shape_cast %236 : vector<4x8x4xbf16> to vector<32x4xbf16>
    %c33 = arith.constant 33 : index
    %c0_107 = arith.constant 0 : index
    %c0_108 = arith.constant 0 : index
    %238 = vector.load %arg4[%c33, %c0_107, %c0_108] : memref<49x4x128xbf16, #tpu.memory_space<vmem>>, vector<1x4x128xbf16>
    %239 = vector.shape_cast %238 : vector<1x4x128xbf16> to vector<4x128xbf16>
    %cst_109 = arith.constant dense<0.000000e+00> : vector<32x128xf32>
    %240 = tpu.matmul %237, %239, %cst_109 {dimension_numbers = #tpu.dot_dimension_numbers<[1], [0], [0], [1], [0, 0, 1, 1], [], []>} : vector<32x4xbf16>, vector<4x128xbf16>, vector<32x128xf32> -> vector<32x128xf32>
    %241 = arith.addf %234, %240 : vector<32x128xf32>
    %242 = vector.extract_strided_slice %2 {offsets = [1, 2, 1, 0], sizes = [4, 1, 8, 4], strides = [1, 1, 1, 1]} : vector<5x16x9x4xbf16> to vector<4x1x8x4xbf16>
    %243 = vector.shape_cast %242 : vector<4x1x8x4xbf16> to vector<4x8x4xbf16>
    %244 = vector.shape_cast %243 : vector<4x8x4xbf16> to vector<32x4xbf16>
    %c34 = arith.constant 34 : index
    %c0_110 = arith.constant 0 : index
    %c0_111 = arith.constant 0 : index
    %245 = vector.load %arg4[%c34, %c0_110, %c0_111] : memref<49x4x128xbf16, #tpu.memory_space<vmem>>, vector<1x4x128xbf16>
    %246 = vector.shape_cast %245 : vector<1x4x128xbf16> to vector<4x128xbf16>
    %cst_112 = arith.constant dense<0.000000e+00> : vector<32x128xf32>
    %247 = tpu.matmul %244, %246, %cst_112 {dimension_numbers = #tpu.dot_dimension_numbers<[1], [0], [0], [1], [0, 0, 1, 1], [], []>} : vector<32x4xbf16>, vector<4x128xbf16>, vector<32x128xf32> -> vector<32x128xf32>
    %248 = arith.addf %241, %247 : vector<32x128xf32>
    %249 = vector.extract_strided_slice %2 {offsets = [1, 4, 0, 0], sizes = [4, 1, 8, 4], strides = [1, 1, 1, 1]} : vector<5x16x9x4xbf16> to vector<4x1x8x4xbf16>
    %250 = vector.shape_cast %249 : vector<4x1x8x4xbf16> to vector<4x8x4xbf16>
    %251 = vector.shape_cast %250 : vector<4x8x4xbf16> to vector<32x4xbf16>
    %c35 = arith.constant 35 : index
    %c0_113 = arith.constant 0 : index
    %c0_114 = arith.constant 0 : index
    %252 = vector.load %arg4[%c35, %c0_113, %c0_114] : memref<49x4x128xbf16, #tpu.memory_space<vmem>>, vector<1x4x128xbf16>
    %253 = vector.shape_cast %252 : vector<1x4x128xbf16> to vector<4x128xbf16>
    %cst_115 = arith.constant dense<0.000000e+00> : vector<32x128xf32>
    %254 = tpu.matmul %251, %253, %cst_115 {dimension_numbers = #tpu.dot_dimension_numbers<[1], [0], [0], [1], [0, 0, 1, 1], [], []>} : vector<32x4xbf16>, vector<4x128xbf16>, vector<32x128xf32> -> vector<32x128xf32>
    %255 = arith.addf %248, %254 : vector<32x128xf32>
    %256 = vector.extract_strided_slice %2 {offsets = [1, 5, 0, 0], sizes = [4, 1, 8, 4], strides = [1, 1, 1, 1]} : vector<5x16x9x4xbf16> to vector<4x1x8x4xbf16>
    %257 = vector.shape_cast %256 : vector<4x1x8x4xbf16> to vector<4x8x4xbf16>
    %258 = vector.shape_cast %257 : vector<4x8x4xbf16> to vector<32x4xbf16>
    %c36 = arith.constant 36 : index
    %c0_116 = arith.constant 0 : index
    %c0_117 = arith.constant 0 : index
    %259 = vector.load %arg4[%c36, %c0_116, %c0_117] : memref<49x4x128xbf16, #tpu.memory_space<vmem>>, vector<1x4x128xbf16>
    %260 = vector.shape_cast %259 : vector<1x4x128xbf16> to vector<4x128xbf16>
    %cst_118 = arith.constant dense<0.000000e+00> : vector<32x128xf32>
    %261 = tpu.matmul %258, %260, %cst_118 {dimension_numbers = #tpu.dot_dimension_numbers<[1], [0], [0], [1], [0, 0, 1, 1], [], []>} : vector<32x4xbf16>, vector<4x128xbf16>, vector<32x128xf32> -> vector<32x128xf32>
    %262 = arith.addf %255, %261 : vector<32x128xf32>
    %263 = vector.extract_strided_slice %2 {offsets = [1, 6, 0, 0], sizes = [4, 1, 8, 4], strides = [1, 1, 1, 1]} : vector<5x16x9x4xbf16> to vector<4x1x8x4xbf16>
    %264 = vector.shape_cast %263 : vector<4x1x8x4xbf16> to vector<4x8x4xbf16>
    %265 = vector.shape_cast %264 : vector<4x8x4xbf16> to vector<32x4xbf16>
    %c37 = arith.constant 37 : index
    %c0_119 = arith.constant 0 : index
    %c0_120 = arith.constant 0 : index
    %266 = vector.load %arg4[%c37, %c0_119, %c0_120] : memref<49x4x128xbf16, #tpu.memory_space<vmem>>, vector<1x4x128xbf16>
    %267 = vector.shape_cast %266 : vector<1x4x128xbf16> to vector<4x128xbf16>
    %cst_121 = arith.constant dense<0.000000e+00> : vector<32x128xf32>
    %268 = tpu.matmul %265, %267, %cst_121 {dimension_numbers = #tpu.dot_dimension_numbers<[1], [0], [0], [1], [0, 0, 1, 1], [], []>} : vector<32x4xbf16>, vector<4x128xbf16>, vector<32x128xf32> -> vector<32x128xf32>
    %269 = arith.addf %262, %268 : vector<32x128xf32>
    %270 = vector.extract_strided_slice %2 {offsets = [1, 7, 0, 0], sizes = [4, 1, 8, 4], strides = [1, 1, 1, 1]} : vector<5x16x9x4xbf16> to vector<4x1x8x4xbf16>
    %271 = vector.shape_cast %270 : vector<4x1x8x4xbf16> to vector<4x8x4xbf16>
    %272 = vector.shape_cast %271 : vector<4x8x4xbf16> to vector<32x4xbf16>
    %c38 = arith.constant 38 : index
    %c0_122 = arith.constant 0 : index
    %c0_123 = arith.constant 0 : index
    %273 = vector.load %arg4[%c38, %c0_122, %c0_123] : memref<49x4x128xbf16, #tpu.memory_space<vmem>>, vector<1x4x128xbf16>
    %274 = vector.shape_cast %273 : vector<1x4x128xbf16> to vector<4x128xbf16>
    %cst_124 = arith.constant dense<0.000000e+00> : vector<32x128xf32>
    %275 = tpu.matmul %272, %274, %cst_124 {dimension_numbers = #tpu.dot_dimension_numbers<[1], [0], [0], [1], [0, 0, 1, 1], [], []>} : vector<32x4xbf16>, vector<4x128xbf16>, vector<32x128xf32> -> vector<32x128xf32>
    %276 = arith.addf %269, %275 : vector<32x128xf32>
    %277 = vector.extract_strided_slice %2 {offsets = [1, 4, 1, 0], sizes = [4, 1, 8, 4], strides = [1, 1, 1, 1]} : vector<5x16x9x4xbf16> to vector<4x1x8x4xbf16>
    %278 = vector.shape_cast %277 : vector<4x1x8x4xbf16> to vector<4x8x4xbf16>
    %279 = vector.shape_cast %278 : vector<4x8x4xbf16> to vector<32x4xbf16>
    %c39 = arith.constant 39 : index
    %c0_125 = arith.constant 0 : index
    %c0_126 = arith.constant 0 : index
    %280 = vector.load %arg4[%c39, %c0_125, %c0_126] : memref<49x4x128xbf16, #tpu.memory_space<vmem>>, vector<1x4x128xbf16>
    %281 = vector.shape_cast %280 : vector<1x4x128xbf16> to vector<4x128xbf16>
    %cst_127 = arith.constant dense<0.000000e+00> : vector<32x128xf32>
    %282 = tpu.matmul %279, %281, %cst_127 {dimension_numbers = #tpu.dot_dimension_numbers<[1], [0], [0], [1], [0, 0, 1, 1], [], []>} : vector<32x4xbf16>, vector<4x128xbf16>, vector<32x128xf32> -> vector<32x128xf32>
    %283 = arith.addf %276, %282 : vector<32x128xf32>
    %284 = vector.extract_strided_slice %2 {offsets = [1, 5, 1, 0], sizes = [4, 1, 8, 4], strides = [1, 1, 1, 1]} : vector<5x16x9x4xbf16> to vector<4x1x8x4xbf16>
    %285 = vector.shape_cast %284 : vector<4x1x8x4xbf16> to vector<4x8x4xbf16>
    %286 = vector.shape_cast %285 : vector<4x8x4xbf16> to vector<32x4xbf16>
    %c40 = arith.constant 40 : index
    %c0_128 = arith.constant 0 : index
    %c0_129 = arith.constant 0 : index
    %287 = vector.load %arg4[%c40, %c0_128, %c0_129] : memref<49x4x128xbf16, #tpu.memory_space<vmem>>, vector<1x4x128xbf16>
    %288 = vector.shape_cast %287 : vector<1x4x128xbf16> to vector<4x128xbf16>
    %cst_130 = arith.constant dense<0.000000e+00> : vector<32x128xf32>
    %289 = tpu.matmul %286, %288, %cst_130 {dimension_numbers = #tpu.dot_dimension_numbers<[1], [0], [0], [1], [0, 0, 1, 1], [], []>} : vector<32x4xbf16>, vector<4x128xbf16>, vector<32x128xf32> -> vector<32x128xf32>
    %290 = arith.addf %283, %289 : vector<32x128xf32>
    %291 = vector.extract_strided_slice %2 {offsets = [1, 6, 1, 0], sizes = [4, 1, 8, 4], strides = [1, 1, 1, 1]} : vector<5x16x9x4xbf16> to vector<4x1x8x4xbf16>
    %292 = vector.shape_cast %291 : vector<4x1x8x4xbf16> to vector<4x8x4xbf16>
    %293 = vector.shape_cast %292 : vector<4x8x4xbf16> to vector<32x4xbf16>
    %c41 = arith.constant 41 : index
    %c0_131 = arith.constant 0 : index
    %c0_132 = arith.constant 0 : index
    %294 = vector.load %arg4[%c41, %c0_131, %c0_132] : memref<49x4x128xbf16, #tpu.memory_space<vmem>>, vector<1x4x128xbf16>
    %295 = vector.shape_cast %294 : vector<1x4x128xbf16> to vector<4x128xbf16>
    %cst_133 = arith.constant dense<0.000000e+00> : vector<32x128xf32>
    %296 = tpu.matmul %293, %295, %cst_133 {dimension_numbers = #tpu.dot_dimension_numbers<[1], [0], [0], [1], [0, 0, 1, 1], [], []>} : vector<32x4xbf16>, vector<4x128xbf16>, vector<32x128xf32> -> vector<32x128xf32>
    %297 = arith.addf %290, %296 : vector<32x128xf32>
    %298 = vector.extract_strided_slice %2 {offsets = [1, 8, 0, 0], sizes = [4, 1, 8, 4], strides = [1, 1, 1, 1]} : vector<5x16x9x4xbf16> to vector<4x1x8x4xbf16>
    %299 = vector.shape_cast %298 : vector<4x1x8x4xbf16> to vector<4x8x4xbf16>
    %300 = vector.shape_cast %299 : vector<4x8x4xbf16> to vector<32x4xbf16>
    %c42 = arith.constant 42 : index
    %c0_134 = arith.constant 0 : index
    %c0_135 = arith.constant 0 : index
    %301 = vector.load %arg4[%c42, %c0_134, %c0_135] : memref<49x4x128xbf16, #tpu.memory_space<vmem>>, vector<1x4x128xbf16>
    %302 = vector.shape_cast %301 : vector<1x4x128xbf16> to vector<4x128xbf16>
    %cst_136 = arith.constant dense<0.000000e+00> : vector<32x128xf32>
    %303 = tpu.matmul %300, %302, %cst_136 {dimension_numbers = #tpu.dot_dimension_numbers<[1], [0], [0], [1], [0, 0, 1, 1], [], []>} : vector<32x4xbf16>, vector<4x128xbf16>, vector<32x128xf32> -> vector<32x128xf32>
    %304 = arith.addf %297, %303 : vector<32x128xf32>
    %305 = vector.extract_strided_slice %2 {offsets = [1, 9, 0, 0], sizes = [4, 1, 8, 4], strides = [1, 1, 1, 1]} : vector<5x16x9x4xbf16> to vector<4x1x8x4xbf16>
    %306 = vector.shape_cast %305 : vector<4x1x8x4xbf16> to vector<4x8x4xbf16>
    %307 = vector.shape_cast %306 : vector<4x8x4xbf16> to vector<32x4xbf16>
    %c43 = arith.constant 43 : index
    %c0_137 = arith.constant 0 : index
    %c0_138 = arith.constant 0 : index
    %308 = vector.load %arg4[%c43, %c0_137, %c0_138] : memref<49x4x128xbf16, #tpu.memory_space<vmem>>, vector<1x4x128xbf16>
    %309 = vector.shape_cast %308 : vector<1x4x128xbf16> to vector<4x128xbf16>
    %cst_139 = arith.constant dense<0.000000e+00> : vector<32x128xf32>
    %310 = tpu.matmul %307, %309, %cst_139 {dimension_numbers = #tpu.dot_dimension_numbers<[1], [0], [0], [1], [0, 0, 1, 1], [], []>} : vector<32x4xbf16>, vector<4x128xbf16>, vector<32x128xf32> -> vector<32x128xf32>
    %311 = arith.addf %304, %310 : vector<32x128xf32>
    %312 = vector.extract_strided_slice %2 {offsets = [1, 10, 0, 0], sizes = [4, 1, 8, 4], strides = [1, 1, 1, 1]} : vector<5x16x9x4xbf16> to vector<4x1x8x4xbf16>
    %313 = vector.shape_cast %312 : vector<4x1x8x4xbf16> to vector<4x8x4xbf16>
    %314 = vector.shape_cast %313 : vector<4x8x4xbf16> to vector<32x4xbf16>
    %c44 = arith.constant 44 : index
    %c0_140 = arith.constant 0 : index
    %c0_141 = arith.constant 0 : index
    %315 = vector.load %arg4[%c44, %c0_140, %c0_141] : memref<49x4x128xbf16, #tpu.memory_space<vmem>>, vector<1x4x128xbf16>
    %316 = vector.shape_cast %315 : vector<1x4x128xbf16> to vector<4x128xbf16>
    %cst_142 = arith.constant dense<0.000000e+00> : vector<32x128xf32>
    %317 = tpu.matmul %314, %316, %cst_142 {dimension_numbers = #tpu.dot_dimension_numbers<[1], [0], [0], [1], [0, 0, 1, 1], [], []>} : vector<32x4xbf16>, vector<4x128xbf16>, vector<32x128xf32> -> vector<32x128xf32>
    %318 = arith.addf %311, %317 : vector<32x128xf32>
    %319 = vector.extract_strided_slice %2 {offsets = [1, 11, 0, 0], sizes = [4, 1, 8, 4], strides = [1, 1, 1, 1]} : vector<5x16x9x4xbf16> to vector<4x1x8x4xbf16>
    %320 = vector.shape_cast %319 : vector<4x1x8x4xbf16> to vector<4x8x4xbf16>
    %321 = vector.shape_cast %320 : vector<4x8x4xbf16> to vector<32x4xbf16>
    %c45 = arith.constant 45 : index
    %c0_143 = arith.constant 0 : index
    %c0_144 = arith.constant 0 : index
    %322 = vector.load %arg4[%c45, %c0_143, %c0_144] : memref<49x4x128xbf16, #tpu.memory_space<vmem>>, vector<1x4x128xbf16>
    %323 = vector.shape_cast %322 : vector<1x4x128xbf16> to vector<4x128xbf16>
    %cst_145 = arith.constant dense<0.000000e+00> : vector<32x128xf32>
    %324 = tpu.matmul %321, %323, %cst_145 {dimension_numbers = #tpu.dot_dimension_numbers<[1], [0], [0], [1], [0, 0, 1, 1], [], []>} : vector<32x4xbf16>, vector<4x128xbf16>, vector<32x128xf32> -> vector<32x128xf32>
    %325 = arith.addf %318, %324 : vector<32x128xf32>
    %326 = vector.extract_strided_slice %2 {offsets = [1, 8, 1, 0], sizes = [4, 1, 8, 4], strides = [1, 1, 1, 1]} : vector<5x16x9x4xbf16> to vector<4x1x8x4xbf16>
    %327 = vector.shape_cast %326 : vector<4x1x8x4xbf16> to vector<4x8x4xbf16>
    %328 = vector.shape_cast %327 : vector<4x8x4xbf16> to vector<32x4xbf16>
    %c46 = arith.constant 46 : index
    %c0_146 = arith.constant 0 : index
    %c0_147 = arith.constant 0 : index
    %329 = vector.load %arg4[%c46, %c0_146, %c0_147] : memref<49x4x128xbf16, #tpu.memory_space<vmem>>, vector<1x4x128xbf16>
    %330 = vector.shape_cast %329 : vector<1x4x128xbf16> to vector<4x128xbf16>
    %cst_148 = arith.constant dense<0.000000e+00> : vector<32x128xf32>
    %331 = tpu.matmul %328, %330, %cst_148 {dimension_numbers = #tpu.dot_dimension_numbers<[1], [0], [0], [1], [0, 0, 1, 1], [], []>} : vector<32x4xbf16>, vector<4x128xbf16>, vector<32x128xf32> -> vector<32x128xf32>
    %332 = arith.addf %325, %331 : vector<32x128xf32>
    %333 = vector.extract_strided_slice %2 {offsets = [1, 9, 1, 0], sizes = [4, 1, 8, 4], strides = [1, 1, 1, 1]} : vector<5x16x9x4xbf16> to vector<4x1x8x4xbf16>
    %334 = vector.shape_cast %333 : vector<4x1x8x4xbf16> to vector<4x8x4xbf16>
    %335 = vector.shape_cast %334 : vector<4x8x4xbf16> to vector<32x4xbf16>
    %c47 = arith.constant 47 : index
    %c0_149 = arith.constant 0 : index
    %c0_150 = arith.constant 0 : index
    %336 = vector.load %arg4[%c47, %c0_149, %c0_150] : memref<49x4x128xbf16, #tpu.memory_space<vmem>>, vector<1x4x128xbf16>
    %337 = vector.shape_cast %336 : vector<1x4x128xbf16> to vector<4x128xbf16>
    %cst_151 = arith.constant dense<0.000000e+00> : vector<32x128xf32>
    %338 = tpu.matmul %335, %337, %cst_151 {dimension_numbers = #tpu.dot_dimension_numbers<[1], [0], [0], [1], [0, 0, 1, 1], [], []>} : vector<32x4xbf16>, vector<4x128xbf16>, vector<32x128xf32> -> vector<32x128xf32>
    %339 = arith.addf %332, %338 : vector<32x128xf32>
    %340 = vector.extract_strided_slice %2 {offsets = [1, 10, 1, 0], sizes = [4, 1, 8, 4], strides = [1, 1, 1, 1]} : vector<5x16x9x4xbf16> to vector<4x1x8x4xbf16>
    %341 = vector.shape_cast %340 : vector<4x1x8x4xbf16> to vector<4x8x4xbf16>
    %342 = vector.shape_cast %341 : vector<4x8x4xbf16> to vector<32x4xbf16>
    %c48 = arith.constant 48 : index
    %c0_152 = arith.constant 0 : index
    %c0_153 = arith.constant 0 : index
    %343 = vector.load %arg4[%c48, %c0_152, %c0_153] : memref<49x4x128xbf16, #tpu.memory_space<vmem>>, vector<1x4x128xbf16>
    %344 = vector.shape_cast %343 : vector<1x4x128xbf16> to vector<4x128xbf16>
    %cst_154 = arith.constant dense<0.000000e+00> : vector<32x128xf32>
    %345 = tpu.matmul %342, %344, %cst_154 {dimension_numbers = #tpu.dot_dimension_numbers<[1], [0], [0], [1], [0, 0, 1, 1], [], []>} : vector<32x4xbf16>, vector<4x128xbf16>, vector<32x128xf32> -> vector<32x128xf32>
    %346 = arith.addf %339, %345 : vector<32x128xf32>
    %c0_155 = arith.constant 0 : index
    %c0_156 = arith.constant 0 : index
    %347 = vector.load %arg5[%c0_155, %c0_156] : memref<3x128xf32, #tpu.memory_space<vmem>>, vector<3x128xf32>
    %348 = vector.extract_strided_slice %347 {offsets = [0, 0], sizes = [1, 128], strides = [1, 1]} : vector<3x128xf32> to vector<1x128xf32>
    %349 = vector.broadcast %348 : vector<1x128xf32> to vector<32x128xf32>
    %350 = arith.addf %346, %349 : vector<32x128xf32>
    %cst_157 = arith.constant dense<0.000000e+00> : vector<32xf32>
    %351 = vector.multi_reduction <add>, %350, %cst_157 [1] : vector<32x128xf32> to vector<32xf32>
    %352 = vector.shape_cast %351 : vector<32xf32> to vector<32x1xf32>
    %353 = arith.mulf %350, %350 : vector<32x128xf32>
    %cst_158 = arith.constant dense<0.000000e+00> : vector<32xf32>
    %354 = vector.multi_reduction <add>, %353, %cst_158 [1] : vector<32x128xf32> to vector<32xf32>
    %355 = vector.shape_cast %354 : vector<32xf32> to vector<32x1xf32>
    %cst_159 = arith.constant 3.125000e-02 : f32
    %356 = vector.broadcast %cst_159 : f32 to vector<32x1xf32>
    %357 = arith.mulf %352, %356 : vector<32x1xf32>
    %cst_160 = arith.constant 3.125000e-02 : f32
    %358 = vector.broadcast %cst_160 : f32 to vector<32x1xf32>
    %359 = arith.mulf %355, %358 : vector<32x1xf32>
    %360 = arith.mulf %357, %357 : vector<32x1xf32>
    %361 = arith.subf %359, %360 : vector<32x1xf32>
    %cst_161 = arith.constant 0.000000e+00 : f32
    %362 = vector.broadcast %cst_161 : f32 to vector<32x1xf32>
    %363 = arith.maximumf %361, %362 : vector<32x1xf32>
    %364 = vector.broadcast %357 : vector<32x1xf32> to vector<32x128xf32>
    %365 = arith.subf %350, %364 : vector<32x128xf32>
    %cst_162 = arith.constant 9.99999974E-6 : f32
    %366 = vector.broadcast %cst_162 : f32 to vector<32x1xf32>
    %367 = arith.addf %363, %366 : vector<32x1xf32>
    %368 = math.rsqrt %367 : vector<32x1xf32>
    %369 = vector.broadcast %368 : vector<32x1xf32> to vector<32x128xf32>
    %370 = arith.mulf %365, %369 : vector<32x128xf32>
    %371 = vector.extract_strided_slice %347 {offsets = [1, 0], sizes = [1, 128], strides = [1, 1]} : vector<3x128xf32> to vector<1x128xf32>
    %372 = vector.broadcast %371 : vector<1x128xf32> to vector<32x128xf32>
    %373 = arith.mulf %370, %372 : vector<32x128xf32>
    %374 = vector.extract_strided_slice %347 {offsets = [2, 0], sizes = [1, 128], strides = [1, 1]} : vector<3x128xf32> to vector<1x128xf32>
    %375 = vector.broadcast %374 : vector<1x128xf32> to vector<32x128xf32>
    %376 = arith.addf %373, %375 : vector<32x128xf32>
    %377 = arith.truncf %376 : vector<32x128xf32> to vector<32x128xbf16>
    %c0_163 = arith.constant 0 : index
    %c0_164 = arith.constant 0 : index
    %c0_165 = arith.constant 0 : index
    %378 = vector.load %arg6[%c0_163, %c0_164, %c0_165] : memref<1x32x128xbf16, #tpu.memory_space<vmem>>, vector<1x32x128xbf16>
    %379 = vector.shape_cast %378 : vector<1x32x128xbf16> to vector<32x128xbf16>
    %380 = vector.shape_cast %377 : vector<32x128xbf16> to vector<1x32x128xbf16>
    tpu.vector_store %arg6[%c0_163, %c0_164, %c0_165], %380 {strides = array<i32>} : memref<1x32x128xbf16, #tpu.memory_space<vmem>>, vector<1x32x128xbf16>,
    return
  }
  func.func @transform_0(%arg0: i32, %arg1: i32) -> (i32, i32, i32, i32) {
    %c2_i32 = arith.constant 2 : i32
    %0 = arith.muli %arg0, %c2_i32 : i32
    %1 = arith.addi %0, %arg1 : i32
    %c0_i32 = arith.constant 0 : i32
    %c0_i32_0 = arith.constant 0 : i32
    %c0_i32_1 = arith.constant 0 : i32
    %c0_i32_2 = arith.constant 0 : i32
    return %1, %c0_i32, %c0_i32_0, %c0_i32_1 : i32, i32, i32, i32
  }
  func.func @transform_1(%arg0: i32, %arg1: i32) -> (i32, i32, i32, i32) {
    %c2_i32 = arith.constant 2 : i32
    %0 = arith.muli %arg0, %c2_i32 : i32
    %1 = arith.addi %0, %arg1 : i32
    %c1_i32 = arith.constant 1 : i32
    %2 = arith.addi %1, %c1_i32 : i32
    %c4_i32 = arith.constant 4 : i32
    %3 = arith.muli %2, %c4_i32 : i32
    %c0_i32 = arith.constant 0 : i32
    %c0_i32_0 = arith.constant 0 : i32
    %c0_i32_1 = arith.constant 0 : i32
    %c0_i32_2 = arith.constant 0 : i32
    return %3, %c0_i32, %c0_i32_0, %c0_i32_1 : i32, i32, i32, i32
  }
  func.func @transform_2(%arg0: i32, %arg1: i32) -> (i32, i32, i32) {
    %c0_i32 = arith.constant 0 : i32
    %c0_i32_0 = arith.constant 0 : i32
    %c0_i32_1 = arith.constant 0 : i32
    %c0_i32_2 = arith.constant 0 : i32
    return %c0_i32, %c0_i32_0, %c0_i32_1 : i32, i32, i32
  }
  func.func @transform_3(%arg0: i32, %arg1: i32) -> (i32, i32) {
    %c0_i32 = arith.constant 0 : i32
    %c0_i32_0 = arith.constant 0 : i32
    %c0_i32_1 = arith.constant 0 : i32
    return %c0_i32, %c0_i32_0 : i32, i32
  }
  func.func @transform_4(%arg0: i32, %arg1: i32) -> (i32, i32, i32) {
    %c0_i32 = arith.constant 0 : i32
    %c0_i32_0 = arith.constant 0 : i32
    return %arg0, %arg1, %c0_i32 : i32, i32, i32
  }
}

module attributes {stable_mosaic.version = 11 : i64} {
  func.func @_mm_ln_kernel(%arg0: i32, %arg1: memref<32x256xbf16, #tpu.memory_space<vmem>>, %arg2: memref<256x128xbf16, #tpu.memory_space<vmem>>, %arg3: memref<3x128xf32, #tpu.memory_space<vmem>>, %arg4: memref<32x128xbf16, #tpu.memory_space<vmem>>) attributes {dimension_semantics = [#tpu.dimension_semantics<parallel>], iteration_bounds = array<i64: 1>, scalar_prefetch = 0 : i64, scratch_operands = 0 : i64, tpu.core_type = #tpu.core_type<tc>, window_params = [{transform_indices = @transform_0, window_bounds = array<i64: 32, 256>}, {pipeline_mode = #tpu.pipeline_mode<synchronous>, transform_indices = @transform_1, window_bounds = array<i64: 256, 128>}, {pipeline_mode = #tpu.pipeline_mode<synchronous>, transform_indices = @transform_2, window_bounds = array<i64: 3, 128>}, {transform_indices = @transform_3, window_bounds = array<i64: 32, 128>}]} {
    %c0 = arith.constant 0 : index
    %c0_0 = arith.constant 0 : index
    %0 = vector.load %arg1[%c0, %c0_0] : memref<32x256xbf16, #tpu.memory_space<vmem>>, vector<32x256xbf16>
    %c0_1 = arith.constant 0 : index
    %c0_2 = arith.constant 0 : index
    %1 = vector.load %arg2[%c0_1, %c0_2] : memref<256x128xbf16, #tpu.memory_space<vmem>>, vector<256x128xbf16>
    %cst = arith.constant dense<0.000000e+00> : vector<32x128xf32>
    %2 = tpu.matmul %0, %1, %cst {dimension_numbers = #tpu.dot_dimension_numbers<[1], [0], [0], [1], [0, 0, 1, 1], [], []>} : vector<32x256xbf16>, vector<256x128xbf16>, vector<32x128xf32> -> vector<32x128xf32>
    %c0_3 = arith.constant 0 : index
    %c0_4 = arith.constant 0 : index
    %3 = vector.load %arg3[%c0_3, %c0_4] : memref<3x128xf32, #tpu.memory_space<vmem>>, vector<3x128xf32>
    %4 = vector.extract_strided_slice %3 {offsets = [0, 0], sizes = [1, 128], strides = [1, 1]} : vector<3x128xf32> to vector<1x128xf32>
    %5 = vector.broadcast %4 : vector<1x128xf32> to vector<32x128xf32>
    %6 = arith.addf %2, %5 : vector<32x128xf32>
    %cst_5 = arith.constant dense<0.000000e+00> : vector<32xf32>
    %7 = vector.multi_reduction <add>, %6, %cst_5 [1] : vector<32x128xf32> to vector<32xf32>
    %8 = vector.shape_cast %7 : vector<32xf32> to vector<32x1xf32>
    %cst_6 = arith.constant 3.125000e-02 : f32
    %9 = vector.broadcast %cst_6 : f32 to vector<32x1xf32>
    %10 = arith.mulf %8, %9 : vector<32x1xf32>
    %11 = arith.mulf %6, %6 : vector<32x128xf32>
    %cst_7 = arith.constant dense<0.000000e+00> : vector<32xf32>
    %12 = vector.multi_reduction <add>, %11, %cst_7 [1] : vector<32x128xf32> to vector<32xf32>
    %13 = vector.shape_cast %12 : vector<32xf32> to vector<32x1xf32>
    %cst_8 = arith.constant 3.125000e-02 : f32
    %14 = vector.broadcast %cst_8 : f32 to vector<32x1xf32>
    %15 = arith.mulf %13, %14 : vector<32x1xf32>
    %16 = arith.mulf %10, %10 : vector<32x1xf32>
    %17 = arith.subf %15, %16 : vector<32x1xf32>
    %cst_9 = arith.constant 0.000000e+00 : f32
    %18 = vector.broadcast %cst_9 : f32 to vector<32x1xf32>
    %19 = arith.maximumf %17, %18 : vector<32x1xf32>
    %20 = vector.broadcast %10 : vector<32x1xf32> to vector<32x128xf32>
    %21 = arith.subf %6, %20 : vector<32x128xf32>
    %cst_10 = arith.constant 9.99999974E-6 : f32
    %22 = vector.broadcast %cst_10 : f32 to vector<32x1xf32>
    %23 = arith.addf %19, %22 : vector<32x1xf32>
    %24 = math.rsqrt %23 : vector<32x1xf32>
    %25 = vector.broadcast %24 : vector<32x1xf32> to vector<32x128xf32>
    %26 = arith.mulf %21, %25 : vector<32x128xf32>
    %27 = vector.extract_strided_slice %3 {offsets = [1, 0], sizes = [1, 128], strides = [1, 1]} : vector<3x128xf32> to vector<1x128xf32>
    %28 = vector.broadcast %27 : vector<1x128xf32> to vector<32x128xf32>
    %29 = arith.mulf %26, %28 : vector<32x128xf32>
    %30 = vector.extract_strided_slice %3 {offsets = [2, 0], sizes = [1, 128], strides = [1, 1]} : vector<3x128xf32> to vector<1x128xf32>
    %31 = vector.broadcast %30 : vector<1x128xf32> to vector<32x128xf32>
    %32 = arith.addf %29, %31 : vector<32x128xf32>
    %33 = arith.truncf %32 : vector<32x128xf32> to vector<32x128xbf16>
    %c0_11 = arith.constant 0 : index
    %c0_12 = arith.constant 0 : index
    %34 = vector.load %arg4[%c0_11, %c0_12] : memref<32x128xbf16, #tpu.memory_space<vmem>>, vector<32x128xbf16>
    tpu.vector_store %arg4[%c0_11, %c0_12], %33 {strides = array<i32>} : memref<32x128xbf16, #tpu.memory_space<vmem>>, vector<32x128xbf16>,
    return
  }
  func.func @transform_0(%arg0: i32) -> (i32, i32) {
    %c0_i32 = arith.constant 0 : i32
    %c0_i32_0 = arith.constant 0 : i32
    return %arg0, %c0_i32 : i32, i32
  }
  func.func @transform_1(%arg0: i32) -> (i32, i32) {
    %c0_i32 = arith.constant 0 : i32
    %c0_i32_0 = arith.constant 0 : i32
    %c0_i32_1 = arith.constant 0 : i32
    return %c0_i32, %c0_i32_0 : i32, i32
  }
  func.func @transform_2(%arg0: i32) -> (i32, i32) {
    %c0_i32 = arith.constant 0 : i32
    %c0_i32_0 = arith.constant 0 : i32
    %c0_i32_1 = arith.constant 0 : i32
    return %c0_i32, %c0_i32_0 : i32, i32
  }
  func.func @transform_3(%arg0: i32) -> (i32, i32) {
    %c0_i32 = arith.constant 0 : i32
    %c0_i32_0 = arith.constant 0 : i32
    return %arg0, %c0_i32 : i32, i32
  }
}

</mosaic_0001>

<bundles_post_ra>
// kernel: tpu_custom_call.1
= control target key start
LH: loop header
LB: loop body
LE: loop exit
PB: predicated region body
PF: predicated region fallthrough
CT: control target
= control target key end

     0   :  { %9 = vsyncpa [#allocation3], 0  ;;  %s5070_s0 = inlined_call_operand.vmem [shape: bf16[16,16,9,4], index: 0, kind: input, shape index: {}]   ;;  %s5071_s1 = inlined_call_operand.vmem [shape: bf16[16,16,9,4], index: 1, kind: input, shape index: {}]   ;;  %s5072_s2 = inlined_call_operand.vmem [shape: bf16[49,4,128], index: 2, kind: input, shape index: {}]   ;;  %s5073_s3 = inlined_call_operand.vmem [shape: f32[3,128], index: 3, kind: input, shape index: {}]   ;;  %s5074_s4 = inlined_call_operand.hbm [shape: bf16[2,32,128], index: 4, kind: output, shape index: {}]  }
   0x1   :  { %11 = vsyncpa [#allocation3 + $0x1], 0  ;;  %s3804_s15 = smov 0   ;;  %s3806_s16 = smov 0  }
   0x2   :  { %s3808_s17 = smov 0   ;;  %s3810_s18 = smov 0  }
   0x3   :  { %s3812_s19 = smov 0   ;;  %s3814_s20 = smov 0  }
   0x4 LB: > { %s3398_s21 = sadd.s32 4294967295, %s3775_s20   ;;  %s3399_s22 = sadd.s32 4294967294, %s3775_s20   ;;  %s3775_s20 = sphi %s3814_s20, %s17_s20   ;;  %s3771_s19 = sphi %s3812_s19, %s5212_s19   ;;  %s3767_s18 = sphi %s3810_s18, %s5211_s18   ;;  %s3763_s17 = sphi %s3808_s17, %s5210_s17   ;;  %s3759_s16 = sphi %s3806_s16, %s5209_s16   ;;  %s3755_s15 = sphi %s3804_s15, %s5208_s15  }
   0x5   : > { %s29_s23 = sadd.s32 1, %s3771_s19  ;;  %s144_s24 = sadd.s32 1, %s3763_s17 }
   0x6   : > { %p31_p0 = scmp.ge.s32.totalorder %s29_s23, 2  ;;  %p154_p1 = scmp.ne.s32.totalorder %s3763_s17, %s3759_s16 }
   0x7   : > { %p155_p2 = scmp.eq.s32.totalorder %s3398_s21, 1  ;;  %p160_p3 = scmp.ne.s32.totalorder %s3759_s16, %s3755_s15 }
   0x8   : > { %s5214_s23 = smov (%p31_p0, %s29_s23), 0  ;;  %p161_p5 = scmp.eq.s32.totalorder %s3399_s22, 1 }
   0x9   : > { %p3844_p4 = por %p155_p2, %p154_p1  ;;  %s139_s26 = ssub.s32 %s3771_s19, %s5214_s23 }
   0xa   : > { %p3408_p6 = scmp.ge.s32.totalorder %s3775_s20, 1  ;;  %p142_p7 = scmp.eq.s32.totalorder %s139_s26, 0 }
   0xb   : > { %p3851_p8 = por %p161_p5, %p160_p3  ;;  %p215_p9 = scmp.lt.s32.totalorder %s3775_s20, 3 }
   0xc   : > { %s3857_s28 = scalar_select %p142_p7, %s3763_s17, %s144_s24  }
   0xd   : > { %p216_p10 = pnand %p3408_p6, %p215_p9 }
   0xf   : > { %219 = sbr.rel (%p216_p10) target bundleno = 725 (0x2d5), region = 36 }
  0x14   : > { %v3418_v0 = vld [vmem:[%s5072_s2 + $0x2] sm:$0x3]  ;;  %vm432_vm0 = vcmask 1041408   ;;  %s3863_s5 = sshll.u32 %s3767_s18, 3  ;;  %v412_v2 = vld [vmem:[%s5072_s2] sm:$0x3] }
  0x15   : > { %v434_v1 = vsel %vm432_vm0, %v3418_v0, 0  ;;  %p256_p11 = scmp.lt.s32.totalorder %s3863_s5, 15  ;;  %v3423_v3 = vld [vmem:[%s5072_s2 + $0x4] sm:$0x3]  ;;  %v472_v4 = vsel %vm432_vm0, %v412_v2, 0  ;;  %vm425_vm1 = vcmask 31744  }
  0x16   : > { %443 = vmatpush.bf16.msra.mxu0 %v434_v1  ;;  %3631 = vmatpush.bf16.msra.mxu1 %v434_v1  ;;  %v512_v5 = vsel %vm432_vm0, %v3423_v3, 0  ;;  %v3426_v6 = vld [vmem:[%s5072_s2 + $0x6] sm:$0x3]  ;;  %v3429_v7 = vld [vmem:[%s5072_s2 + $0x8] sm:$0x3]  ;;  %s3608_s26 = sadd.s32 4, %s3863_s5 }
  0x17   : > { %s257_s14 = scalar_select %p256_p11, %s3863_s5, 15  ;;  %521 = vmatpush.bf16.msra.mxu2 %v512_v5  ;;  %v556_v8 = vsel %vm432_vm0, %v3426_v6, 0  ;;  %v655_v9 = vsel %vm432_vm0, %v3429_v7, 0  ;;  %v3435_v10 = vld [vmem:[%s5072_s2 + $0xc] sm:$0x3] }
  0x18   : > { %565 = vmatpush.bf16.msra.mxu3 %v556_v8  ;;  %v847_v11 = vsel %vm432_vm0, %v3435_v10, 0  ;;  %v3438_v12 = vld [vmem:[%s5072_s2 + $0xe] sm:$0x3]  ;;  %v3432_v20 = vld [vmem:[%s5072_s2 + $0xa] sm:$0x3]  ;;  %p4703_p12 = scmp.lt.s32.totalorder %s3608_s26, 15 }
  0x19   : > { %s3606_s29 = sshll.u32 %s257_s14, 7  ;;  %v891_v13 = vsel %vm432_vm0, %v3438_v12, 0  ;;  %v751_v27 = vsel %vm432_vm0, %v3432_v20, 0  ;;  %vm581_vm2 = vsmask.f32 3328  ;;  %s250_s10 = sand.u32 1, %s3759_s16  }
  0x1a   : > { %481 = vmatpush.bf16.msrb.mxu1 %v472_v4  ;;  %664 = vmatpush.bf16.msrb.mxu0 %v655_v9  ;;  %s3895_s7 = scalar_lea.vmem %s5070_s0, %s3606_s29  ;;  %vm582_vm3 = vsmask.f32 7440  ;;  %s5216_s26 = smov (!%p4703_p12, %s3608_s26), 15 }
  0x1b   : > { %856 = vmatpush.bf16.msrb.mxu2 %v847_v11  ;;  %v3898_v14 = vld [vmem:[%s3895_s7 + $0x8] sm:$0xf]  ;;  %v283_v24 = vld [vmem:[%s3895_s7 + $0x10] sm:$0xf]  ;;  %v285_v30 = vld [vmem:[%s3895_s7 + $0x18] sm:$0xf] }
  0x1c   : > { %900 = vmatpush.bf16.msrb.mxu3 %v891_v13  ;;  %v3901_v15 = vld [vmem:[%s3895_s7 + $0x88] sm:$0xf]  ;;  %v419_v17 = vunpack.c.l.b16 %v3898_v14  ;;  %v3920_v26 = vld [vmem:[%s3895_s7 + $0x90] sm:$0xf]  ;;  %v499_v29 = vunpack.c.l.b16 %v283_v24  ;;  %v3929_v31 = vld [vmem:[%s3895_s7 + $0x98] sm:$0xf]  ;;  %v543_v35 = vunpack.c.l.b16 %v285_v30 }
  0x1d   : > { %v3904_v16 = vld [vmem:[%s3895_s7 + $0x108] sm:$0xf]  ;;  %v420_v18 = vunpack.c.l.b16 %v3901_v15  ;;  %v500_v32 = vunpack.c.l.b16 %v3920_v26  ;;  %v279_v33 = vld [vmem:[%s3895_s7] sm:$0xf]  ;;  %v544_v36 = vunpack.c.l.b16 %v3929_v31  ;;  %v280_v38 = vld [vmem:[%s3895_s7 + $0x4] sm:$0x1] }
  0x1e   : > { %v3909_v19 = vld [vmem:[%s3895_s7 + $0x188] sm:$0xf]  ;;  %v421_v21 = vunpack.c.l.b16 %v3904_v16  ;;  %v3935_v37 = vld [vmem:[%s3895_s7 + $0x80] sm:$0xf]  ;;  %v777_v39 = vshrl.u32 %v283_v24, 16  ;;  %v780_v40 = vshll.u32 %v283_v24, 16  ;;  %v459_v49 = vunpack.c.l.b16 %v279_v33  ;;  %vm3963_vm4 = vmor %vm581_vm2, %vm582_vm3 }
  0x1f   : > { %v5078_v22 = vunpack.c.l.b16 %v3909_v19  ;;  %v423_v23 = vpack.c.b16 %v420_v18, %v419_v17  ;;  %v503_v34 = vpack.c.b16 %v500_v32, %v499_v29  ;;  %v547_v41 = vpack.c.b16 %v544_v36, %v543_v35  ;;  %v308_v47 = vld [vmem:[%s3895_s7 + $0x84] sm:$0x1]  ;;  %v3949_v56 = vld [vmem:[%s3895_s7 + $0x110] sm:$0xf]  ;;  %v341_v2 = vld [vmem:[%s3895_s7 + $0x118] sm:$0xf] }
  0x20   : > { %v3925_v28 = vpack.c.b16 %v421_v21, %v420_v18  ;;  %v585_v42 = vshrl.u32 %v279_v33, 16  ;;  %v791_v43 = vshrl.u32 %v3920_v26, 16  ;;  %v588_v44 = vshll.u32 %v279_v33, 16  ;;  %v3957_v61 = vld [vmem:[%s3895_s7 + $0x190] sm:$0xf]  ;;  %s3609_s6 = sshll.u32 %s5216_s26, 7 }
  0x21   : > { %v424_v25 = vpack.c.b16 %v5078_v22, %v421_v21  ;;  %3419 = vmatmul.msk.bf16.vlgmr.msra.gmra.mxu0 %vm425_vm1, %v423_v23  ;;  %3424 = vmatmul.msk.bf16.vlgmr.msra.gmra.mxu2 %vm425_vm1, %v503_v34  ;;  %v599_v45 = vshrl.u32 %v3935_v37, 16  ;;  %v602_v46 = vshll.u32 %v3935_v37, 16  ;;  %v794_v48 = vshll.u32 %v3920_v26, 16  ;;  %v3969_v8 = vld [vmem:[%s3895_s7 + $0x198] sm:$0xf]  ;;  %s4739_s13 = scalar_lea.vmem %s5071_s1, %s3609_s6  ;;  %s3409_s11 = sshll.u32 %s250_s10, 4 }
  0x22   : > { %3427 = vmatmul.msk.bf16.vlgmr.msra.gmra.mxu3 %vm425_vm1, %v547_v41  ;;  %v587_v50 = vrot.slane %v585_v42, 4  ;;  %v594_v51 = vshll.u32 %v280_v38, 16  ;;  %v460_v52 = vunpack.c.l.b16 %v3935_v37  ;;  %v590_v53 = vrot.slane %v588_v44, 5  ;;  %v3441_v13 = vld [vmem:[%s5072_s2 + $0x10] sm:$0x3]  ;;  %s5024_s12 = scalar_lea.vmem [#allocation2], %s3409_s11 }
  0x23   : > { %3420 = vmatmul.msk.bf16.vlgmr.msra.gmra.mxu1 %vm425_vm1, %v424_v25  ;;  %v601_v54 = vrot.slane %v599_v45, 4  ;;  %v604_v55 = vrot.slane %v602_v46, 5  ;;  %v681_v57 = vshrl.u32 %v3898_v14, 16  ;;  %v3952_v58 = vrot.slane %v777_v39, 4  ;;  %v3982_v21 = vld [vmem:[%s3895_s7 + $0x100] sm:$0xf] }
  0x24   : > { %760 = vmatpush.bf16.msra.mxu1 %v751_v27  ;;  %v3954_v59 = vrot.slane %v780_v40, 5  ;;  %v608_v60 = vshll.u32 %v308_v47, 16  ;;  %v684_v62 = vshll.u32 %v3898_v14, 16  ;;  %v591_v63 = vor.u32 %v590_v53, %v587_v50  ;;  %v3990_v27 = vld [vmem:[%s3895_s7 + $0x180] sm:$0xf]  ;;  %s3618_s14 = sshll.u32 %s3767_s18, 4 }
  0x25   : > { %v596_v0 = vrot.slane %v594_v51, 5  ;;  %v605_v1 = vor.u32 %v604_v55, %v601_v54  ;;  %v793_v3 = vrot.slane %v791_v43, 4  ;;  %v796_v4 = vrot.slane %v794_v48, 5  ;;  %v336_v33 = vld [vmem:[%s3895_s7 + $0x104] sm:$0x1]  ;;  %s3309_s24 = scalar_lea.hbm %s5074_s4, %s3618_s14  ;;  %s3310_s26 = sshll.u32 %s5024_s12, 4  ;;  %s3311_s26 = int_to_ptr.vmem [resolvable:$true] %s3310_s26 }
  0x26   : > { %v610_v6 = vrot.slane %v608_v60, 5  ;;  %v501_v7 = vunpack.c.l.b16 %v3949_v56  ;;  %v463_v9 = vpack.c.b16 %v460_v52, %v459_v49  ;;  %v592_v10 = vrot.slane %v591_v63, 4  ;;  %v364_v39 = vld [vmem:[%s3895_s7 + $0x184] sm:$0x1]  ;;  %v284_v40 = vld [vmem:[%s3895_s7 + $0x14] sm:$0x1] }
  0x27   : > { %v606_v11 = vrot.slane %v605_v1, 4  ;;  %v5080_v12 = vunpack.c.l.b16 %v3957_v61  ;;  %v695_v14 = vshrl.u32 %v3901_v15, 16  ;;  %v698_v17 = vshll.u32 %v3901_v15, 16  ;;  %v312_v45 = vld [vmem:[%s3895_s7 + $0x94] sm:$0x1]  ;;  %s3312_s29 = sshll.u32 %s3309_s24, 4  ;;  %s3313_s29 = int_to_ptr.hbm [resolvable:$true] %s3312_s29 }
  0x28   : > { %v783_v18 = vor.u32 %v3954_v59, %v3952_v58  ;;  %v3979_v20 = vpack.c.b16 %v501_v7, %v500_v32  ;;  %v597_v23 = vsel %vm3963_vm4, %v592_v10, %v596_v0  ;;  %v545_v25 = vunpack.c.l.b16 %v341_v2  ;;  %v3447_v10 = vld [vmem:[%s5072_s2 + $0x14] sm:$0x3]  ;;  %s3296_s18 = scalar_lea.sflag [#allocation3], %s250_s10  ;;  %s3717_s8 = scalar_lea.hbm %s5074_s4, 32 }
  0x29   : > { %v611_v24 = vsel %vm3963_vm4, %v606_v11, %v610_v6  ;;  %v5079_v26 = vunpack.c.l.b16 %v3969_v8  ;;  %v797_v15 = vor.u32 %v796_v4, %v793_v3  ;;  %v642_v29 = vunpack.c.l.b16 %v597_v23  ;;  %v3450_v11 = vld [vmem:[%s5072_s2 + $0x16] sm:$0x3] }
  0x2a   : > { %v3992_v30 = vunpack.c.l.b16 %v611_v24  ;;  %v935_v32 = vsel %vm432_vm0, %v3441_v13, 0  ;;  %v504_v34 = vpack.c.b16 %v5080_v12, %v501_v7  ;;  %v4001_v35 = vpack.c.b16 %v545_v25, %v544_v36 }
  0x2b   : > { %944 = vmatpush.bf16.msra.mxu0 %v935_v32  ;;  %v461_v37 = vunpack.c.l.b16 %v3982_v21  ;;  %v613_v38 = vshrl.u32 %v3982_v21, 16  ;;  %v616_v42 = vshll.u32 %v3982_v21, 16  ;;  %v627_v43 = vshrl.u32 %v3990_v27, 16 }
  0x2c   : > { %v646_v41 = vpack.c.b16 %v3992_v30, %v642_v29  ;;  %v630_v44 = vshll.u32 %v3990_v27, 16  ;;  %v548_v31 = vpack.c.b16 %v5079_v26, %v545_v25  ;;  %v622_v47 = vshll.u32 %v336_v33, 16 }
  0x2d   : > { %v615_v36 = vrot.slane %v613_v38, 4  ;;  %v4014_v46 = vpack.c.b16 %v461_v37, %v460_v52  ;;  %v618_v48 = vrot.slane %v616_v42, 5  ;;  %v629_v49 = vrot.slane %v627_v43, 4  ;;  %v286_v42 = vld [vmem:[%s3895_s7 + $0x20] sm:$0xf] }
  0x2e   : > { %v632_v50 = vrot.slane %v630_v44, 5  ;;  %v636_v51 = vshll.u32 %v364_v39, 16  ;;  %v683_v53 = vrot.slane %v681_v57, 4  ;;  %v686_v54 = vrot.slane %v684_v62, 5  ;;  %v4053_v43 = vld [vmem:[%s3895_s7 + $0xa0] sm:$0xf] }
  0x2f   : > { %v786_v55 = vshll.u32 %v284_v40, 16  ;;  %v800_v58 = vshll.u32 %v312_v45, 16  ;;  %v619_v59 = vor.u32 %v618_v48, %v615_v36  ;;  %v624_v60 = vrot.slane %v622_v47, 5 }
  0x30   : > { %v633_v63 = vor.u32 %v632_v50, %v629_v49  ;;  %v638_v0 = vrot.slane %v636_v51, 5  ;;  %v784_v1 = vrot.slane %v783_v18, 4  ;;  %v798_v52 = vrot.slane %v797_v15, 4  ;;  %v282_v15 = vld [vmem:[%s3895_s7 + $0xc] sm:$0x1] }
  0x31   : > { %3430 = vmatmul.msk.bf16.vlgmr.msrb.gmra.mxu0 %vm425_vm1, %v646_v41  ;;  %3425 = vmatmul.msk.bf16.gmra.mxu2 %vm425_vm1, %v504_v34  ;;  %v788_v2 = vrot.slane %v786_v55, 5  ;;  %v802_v3 = vrot.slane %v800_v58, 5  ;;  %v620_v4 = vrot.slane %v619_v59, 4  ;;  %v687_v57 = vor.u32 %v686_v54, %v683_v53  ;;  %v3444_v54 = vld [vmem:[%s5072_s2 + $0x12] sm:$0x3] }
  0x32   : > { %3428 = vmatmul.msk.bf16.gmra.mxu3 %vm425_vm1, %v548_v31  ;;  %v634_v6 = vrot.slane %v633_v63, 4  ;;  %v697_v62 = vrot.slane %v695_v14, 4  ;;  %v700_v7 = vrot.slane %v698_v17, 5  ;;  %v805_v13 = vshrl.u32 %v3949_v56, 16  ;;  %v340_v55 = vld [vmem:[%s3895_s7 + $0x114] sm:$0x1] }
  0x33   : > { %3421 = vmatmul.msk.bf16.vlgmr.msrb.gmra.mxu1 %vm425_vm1, %v463_v9  ;;  %v5081_v9 = vunpack.c.l.b16 %v3990_v27  ;;  %v808_v18 = vshll.u32 %v3949_v56, 16  ;;  %v625_v21 = vsel %vm3963_vm4, %v620_v4, %v624_v60  ;;  %v819_v17 = vshrl.u32 %v3957_v61, 16  ;;  %v310_v56 = vld [vmem:[%s3895_s7 + $0x8c] sm:$0x1] }
  0x34   : > { %v639_v14 = vsel %vm3963_vm4, %v634_v6, %v638_v0  ;;  %v4033_v23 = vunpack.c.l.b16 %v625_v21  ;;  %v789_v24 = vsel %vm3963_vm4, %v784_v1, %v788_v2  ;;  %v803_v25 = vsel %vm3963_vm4, %v798_v52, %v802_v3  ;;  %v368_v0 = vld [vmem:[%s3895_s7 + $0x194] sm:$0x1] }
  0x35   : > { %v822_v29 = vshll.u32 %v3957_v61, 16  ;;  %v4042_v32 = vunpack.c.l.b16 %v639_v14  ;;  %v1023_v33 = vsel %vm432_vm0, %v3447_v10, 0  ;;  %v1119_v34 = vsel %vm432_vm0, %v3450_v11, 0 }
  0x36   : > { %v701_v38 = vor.u32 %v700_v7, %v697_v62  ;;  %v709_v39 = vshrl.u32 %v3904_v16, 16  ;;  %v464_v40 = vpack.c.b16 %v5081_v9, %v461_v37  ;;  %1032 = vmatpush.bf16.msra.mxu2 %v1023_v33  ;;  %1128 = vmatpush.bf16.msra.mxu3 %v1119_v34  ;;  %v834_v44 = vunpack.c.l.b16 %v789_v24 }
  0x37   : > { %v4055_v45 = vunpack.c.l.b16 %v803_v25  ;;  %v690_v31 = vshll.u32 %v282_v15, 16  ;;  %v704_v36 = vshll.u32 %v310_v56, 16  ;;  %v807_v47 = vrot.slane %v805_v13, 4 }
  0x38   : > { %v810_v48 = vrot.slane %v808_v18, 5  ;;  %v821_v49 = vrot.slane %v819_v17, 4  ;;  %v824_v50 = vrot.slane %v822_v29, 5  ;;  %v647_v37 = vpack.c.b16 %v4042_v32, %v4033_v23  ;;  %v3453_v29 = vld [vmem:[%s5072_s2 + $0x18] sm:$0x3] }
  0x39   : > { %v878_v51 = vunpack.c.l.b16 %v286_v42  ;;  %v879_v53 = vunpack.c.l.b16 %v4053_v43  ;;  %v688_v58 = vrot.slane %v687_v57, 4  ;;  %v711_v59 = vrot.slane %v709_v39, 4  ;;  %v4072_v57 = vld [vmem:[%s3895_s7 + $0x120] sm:$0xf] }
  0x3a   : > { %v712_v60 = vshll.u32 %v3904_v16, 16  ;;  %v723_v63 = vshrl.u32 %v3909_v19, 16  ;;  %v702_v1 = vrot.slane %v701_v38, 4  ;;  %v838_v52 = vpack.c.b16 %v4055_v45, %v834_v44 }
  0x3b   : > { %v692_v2 = vrot.slane %v690_v31, 5  ;;  %v706_v3 = vrot.slane %v704_v36, 5  ;;  %v726_v4 = vshll.u32 %v3909_v19, 16  ;;  %v979_v6 = vsel %vm432_vm0, %v3444_v54, 0  ;;  %v4090_v31 = vld [vmem:[%s3895_s7 + $0x28] sm:$0xf] }
  0x3c   : > { %v811_v62 = vor.u32 %v810_v48, %v807_v47  ;;  %v814_v7 = vshll.u32 %v340_v55, 16  ;;  %v882_v16 = vpack.c.b16 %v879_v53, %v878_v51  ;;  %v1049_v10 = vshrl.u32 %v286_v42, 16  ;;  %988 = vmatpush.bf16.msrb.mxu1 %v979_v6  ;;  %v316_v36 = vld [vmem:[%s3895_s7 + $0xa8] sm:$0xf]  ;;  %v366_v54 = vld [vmem:[%s3895_s7 + $0x18c] sm:$0x1] }
  0x3d   : > { %v825_v11 = vor.u32 %v824_v50, %v821_v49  ;;  %v828_v13 = vshll.u32 %v368_v0, 16  ;;  %v714_v18 = vrot.slane %v712_v60, 5  ;;  %v1052_v21 = vshll.u32 %v286_v42, 16  ;;  %v4104_v55 = vld [vmem:[%s3895_s7 + $0x128] sm:$0xf] }
  0x3e   : > { %v812_v14 = vrot.slane %v811_v62, 4  ;;  %v816_v17 = vrot.slane %v814_v7, 5  ;;  %v725_v24 = vrot.slane %v723_v63, 4  ;;  %v693_v25 = vsel %vm3963_vm4, %v688_v58, %v692_v2  ;;  %v295_v60 = vld [vmem:[%s3895_s7 + $0x48] sm:$0xf] }
  0x3f   : > { %v707_v15 = vsel %vm3963_vm4, %v702_v1, %v706_v3  ;;  %v880_v56 = vunpack.c.l.b16 %v4072_v57  ;;  %v728_v33 = vrot.slane %v726_v4, 5  ;;  %v826_v38 = vrot.slane %v825_v11, 4 }
  0x40   : > { %v817_v34 = vsel %vm3963_vm4, %v812_v14, %v816_v17  ;;  %v830_v39 = vrot.slane %v828_v13, 5  ;;  %v1051_v42 = vrot.slane %v1049_v10, 4  ;;  %v1063_v44 = vshrl.u32 %v4053_v43, 16  ;;  %v4115_v10 = vld [vmem:[%s3895_s7 + $0x1a0] sm:$0xf] }
  0x41   : > { %3431 = vmatmul.msk.bf16.gmra.mxu0 %vm425_vm1, %v647_v37  ;;  %3436 = vmatmul.msk.bf16.vlgmr.msrb.gmra.mxu2 %vm425_vm1, %v838_v52  ;;  %v4093_v47 = vunpack.c.l.b16 %v817_v34  ;;  %v4097_v48 = vpack.c.b16 %v880_v56, %v879_v53  ;;  %v1054_v49 = vrot.slane %v1052_v21, 5  ;;  %v738_v50 = vunpack.c.l.b16 %v693_v25  ;;  %v3459_v21 = vld [vmem:[%s5072_s2 + $0x1c] sm:$0x3] }
  0x42   : > { %3439 = vmatmul.msk.bf16.vlgmr.msrb.gmra.mxu3 %vm425_vm1, %v882_v16  ;;  %v4099_v37 = vunpack.c.l.b16 %v707_v15  ;;  %v1215_v51 = vsel %vm432_vm0, %v3453_v29, 0  ;;  %v1066_v58 = vshll.u32 %v4053_v43, 16  ;;  %v715_v63 = vor.u32 %v714_v18, %v711_v59  ;;  %v3462_v15 = vld [vmem:[%s5072_s2 + $0x1e] sm:$0x3] }
  0x43   : > { %3422 = vmatmul.msk.bf16.gmra.mxu1 %vm425_vm1, %v464_v40  ;;  %v338_v40 = vld [vmem:[%s3895_s7 + $0x10c] sm:$0x1]  ;;  %1224 = vmatpush.bf16.msrb.mxu0 %v1215_v51  ;;  %v922_v53 = vunpack.c.l.b16 %v4090_v31  ;;  %v923_v1 = vunpack.c.l.b16 %v316_v36  ;;  %v831_v52 = vsel %vm3963_vm4, %v826_v38, %v830_v39  ;;  %v729_v2 = vor.u32 %v728_v33, %v725_v24  ;;  %v287_v51 = vld [vmem:[%s3895_s7 + $0x24] sm:$0x1] }
  0x44   : > { %v718_v0 = vshll.u32 %v338_v40, 16  ;;  %v716_v3 = vrot.slane %v715_v63, 4  ;;  %v732_v6 = vshll.u32 %v366_v54, 16  ;;  %v924_v62 = vunpack.c.l.b16 %v4104_v55 }
  0x45   : > { %v1055_v43 = vor.u32 %v1054_v49, %v1051_v42  ;;  %v1065_v7 = vrot.slane %v1063_v44, 4  ;;  %v742_v16 = vpack.c.b16 %v4099_v37, %v738_v50  ;;  %v1068_v59 = vrot.slane %v1066_v58, 5  ;;  %v315_v42 = vld [vmem:[%s3895_s7 + $0xa4] sm:$0x1] }
  0x46   : > { %v720_v4 = vrot.slane %v718_v0, 5  ;;  %v4117_v11 = vunpack.c.l.b16 %v831_v52  ;;  %v4123_v18 = vpack.c.b16 %v924_v62, %v923_v1  ;;  %v926_v14 = vpack.c.b16 %v923_v1, %v922_v53 }
  0x47   : > { %v1159_v17 = vshrl.u32 %v316_v36, 16  ;;  %v1162_v24 = vshll.u32 %v316_v36, 16  ;;  %v5075_v29 = vunpack.c.l.b16 %v4115_v10  ;;  %v1077_v33 = vshrl.u32 %v4072_v57, 16 }
  0x48   : > { %v721_v13 = vsel %vm3963_vm4, %v716_v3, %v720_v4  ;;  %v730_v34 = vrot.slane %v729_v2, 4  ;;  %v734_v38 = vrot.slane %v732_v6, 5  ;;  %v1080_v39 = vshll.u32 %v4072_v57, 16  ;;  %v4157_v2 = vld [vmem:[%s3895_s7 + $0xb8] sm:$0xf] }
  0x49   : > { %v4128_v25 = vunpack.c.l.b16 %v721_v13  ;;  %v1355_v44 = vsel %vm432_vm0, %v3459_v21, 0  ;;  %v1145_v36 = vshrl.u32 %v4090_v31, 16  ;;  %v1148_v49 = vshll.u32 %v4090_v31, 16  ;;  %v317_v13 = vld [vmem:[%s3895_s7 + $0xac] sm:$0x1] }
  0x4a   : > { %v839_v50 = vpack.c.b16 %v4117_v11, %v4093_v47  ;;  %1364 = vmatpush.bf16.msrb.mxu2 %v1355_v44  ;;  %v1399_v54 = vsel %vm432_vm0, %v3462_v15, 0  ;;  %v4147_v58 = vrot.slane %v1055_v43, 4  ;;  %v1069_v63 = vor.u32 %v1068_v59, %v1065_v7  ;;  %v3456_v43 = vld [vmem:[%s5072_s2 + $0x1a] sm:$0x3]  ;;  %v343_v15 = vld [vmem:[%s3895_s7 + $0x124] sm:$0x1] }
  0x4b   : > { %v1161_v0 = vrot.slane %v1159_v17, 4  ;;  %v1164_v53 = vrot.slane %v1162_v24, 5  ;;  %1408 = vmatpush.bf16.msrb.mxu3 %v1399_v54  ;;  %v883_v31 = vpack.c.b16 %v5075_v29, %v880_v56  ;;  %v1079_v1 = vrot.slane %v1077_v33, 4  ;;  %v4163_v7 = vld [vmem:[%s3895_s7 + $0x138] sm:$0xf] }
  0x4c   : > { %v735_v52 = vsel %vm3963_vm4, %v730_v34, %v734_v38  ;;  %v1072_v3 = vshll.u32 %v315_v42, 16  ;;  %v1082_v4 = vrot.slane %v1080_v39, 5  ;;  %v1058_v6 = vshll.u32 %v287_v51, 16  ;;  %v4180_v33 = vld [vmem:[%s3895_s7 + $0x1a8] sm:$0xf] }
  0x4d   : > { %v4165_v57 = vrot.slane %v1145_v36, 4  ;;  %v4167_v56 = vrot.slane %v1148_v49, 5  ;;  %v1176_v59 = vshll.u32 %v4104_v55, 16  ;;  %v1070_v21 = vrot.slane %v1069_v63, 4  ;;  %5117 = vst [vmem:[#allocation5_spill] sm:$0xff] %v4180_v33 }
  0x4e   : > { %v1094_v17 = vshll.u32 %v4115_v10, 16  ;;  %v4175_v24 = vunpack.c.l.b16 %v735_v52  ;;  %v1011_v34 = vunpack.c.l.b16 %v4157_v2  ;;  %v1074_v38 = vrot.slane %v1072_v3, 5  ;;  %v3465_v52 = vld [vmem:[%s5072_s2 + $0x20] sm:$0x3]  ;;  %v289_v29 = vld [vmem:[%s3895_s7 + $0x2c] sm:$0x1] }
  0x4f   : > { %v1311_v39 = vsel %vm432_vm0, %v3456_v43, 0  ;;  %v1012_v42 = vunpack.c.l.b16 %v4163_v7  ;;  %v1060_v44 = vrot.slane %v1058_v6, 5  ;;  %v1165_v36 = vor.u32 %v1164_v53, %v1161_v0  ;;  %v292_v53 = vld [vmem:[%s3895_s7 + $0x38] sm:$0xf]  ;;  %v345_v6 = vld [vmem:[%s3895_s7 + $0x12c] sm:$0x1] }
  0x50   : > { %v1168_v49 = vshll.u32 %v317_v13, 16  ;;  %v1178_v54 = vrot.slane %v1176_v59, 5  ;;  %v5077_v0 = vunpack.c.l.b16 %v4180_v33  ;;  %v1075_v43 = vsel %vm3963_vm4, %v1070_v21, %v1074_v38 }
  0x51   : > { %3442 = vmatmul.msk.bf16.vlgmr.msra.gmra.mxu0 %vm425_vm1, %v926_v14  ;;  %3437 = vmatmul.msk.bf16.gmra.mxu2 %vm425_vm1, %v839_v50  ;;  %v1091_v14 = vshrl.u32 %v4115_v10, 16  ;;  %v1083_v50 = vor.u32 %v1082_v4, %v1079_v1  ;;  %v4187_v63 = vpack.c.b16 %v1012_v42, %v1011_v34  ;;  %v1096_v1 = vrot.slane %v1094_v17, 5 }
  0x52   : > { %3440 = vmatmul.msk.bf16.gmra.mxu3 %vm425_vm1, %v883_v31  ;;  %v1086_v31 = vshll.u32 %v343_v15, 16  ;;  %v743_v4 = vpack.c.b16 %v4175_v24, %v4128_v25  ;;  %v1061_v13 = vsel %vm3963_vm4, %v4147_v58, %v1060_v44  ;;  %v1170_v15 = vrot.slane %v1168_v49, 5 }
  0x53   : > { %3433 = vmatmul.msk.bf16.vlgmr.msra.gmra.mxu1 %vm425_vm1, %v742_v16  ;;  %v1173_v16 = vshrl.u32 %v4104_v55, 16  ;;  %5118 = vst [vmem:[#allocation6_spill] sm:$0xff] %v4187_v63  ;;  %v1093_v2 = vrot.slane %v1091_v14, 4  ;;  %v1084_v3 = vrot.slane %v1083_v50, 4  ;;  %v1166_v14 = vrot.slane %v1165_v36, 4 }
  0x54   : > { %1320 = vmatpush.bf16.msra.mxu1 %v1311_v39  ;;  %v1088_v59 = vrot.slane %v1086_v31, 5  ;;  %v1443_v39 = vsel %vm432_vm0, %v3465_v52, 0  ;;  %v4207_v50 = vld [vmem:[%s3895_s7 + $0x130] sm:$0xf]  ;;  %v1010_v17 = vunpack.c.l.b16 %v292_v53  ;;  %v1182_v38 = vshll.u32 %v345_v6, 16 }
  0x55   : > { %v1175_v51 = vrot.slane %v1173_v16, 4  ;;  %v4200_v16 = vld [vmem:[%s3895_s7 + $0xb0] sm:$0xf]  ;;  %1452 = vmatpush.bf16.msra.mxu0 %v1443_v39  ;;  %v927_v58 = vpack.c.b16 %v5077_v0, %v924_v62  ;;  %v4216_v44 = vunpack.c.l.b16 %v1075_v43  ;;  %v1106_v31 = vunpack.c.l.b16 %v1061_v13  ;;  %v371_v6 = vld [vmem:[%s3895_s7 + $0x1a4] sm:$0x1] }
  0x56   : > { %v1089_v40 = vsel %vm3963_vm4, %v1084_v3, %v1088_v59  ;;  %v967_v36 = vunpack.c.l.b16 %v4200_v16  ;;  %v968_v52 = vunpack.c.l.b16 %v4207_v50  ;;  %v1184_v3 = vrot.slane %v1182_v38, 5  ;;  %v3471_v38 = vld [vmem:[%s5072_s2 + $0x24] sm:$0x3] }
  0x57   : > { %v1179_v21 = vor.u32 %v1178_v54, %v1175_v51  ;;  %5119 = vst [vmem:[#allocation7_spill] sm:$0xff] %v4216_v44  ;;  %v4219_v49 = vunpack.c.l.b16 %v1089_v40  ;;  %v1151_v51 = vor.u32 %v4167_v56, %v4165_v57  ;;  %v1154_v55 = vshll.u32 %v289_v29, 16 }
  0x58   : > { %v1171_v62 = vsel %vm3963_vm4, %v1166_v14, %v1170_v15  ;;  %v1014_v40 = vpack.c.b16 %v1011_v34, %v1010_v17  ;;  %v4232_v43 = vpack.c.b16 %v968_v52, %v967_v36  ;;  %v1110_v29 = vpack.c.b16 %v4216_v44, %v1106_v31  ;;  %v290_v15 = vld [vmem:[%s3895_s7 + $0x30] sm:$0xf] }
  0x59   : > { %5120 = vst [vmem:[#allocation8_spill] sm:$0xff] %v4219_v49  ;;  %v1180_v53 = vrot.slane %v1179_v21, 4  ;;  %v4238_v57 = vunpack.c.l.b16 %v1171_v62  ;;  %v1152_v59 = vrot.slane %v1151_v51, 4  ;;  %v1156_v13 = vrot.slane %v1154_v55, 5 }
  0x5a   : > { %5121 = vst [vmem:[#allocation9_spill] sm:$0xff] %v4232_v43  ;;  %v1097_v34 = vor.u32 %v1096_v1, %v1093_v2  ;;  %v1100_v14 = vshll.u32 %v371_v6, 16  ;;  %v1187_v17 = vshrl.u32 %v4180_v33, 16  ;;  %v1190_v21 = vshll.u32 %v4180_v33, 16  ;;  %v3474_v2 = vld [vmem:[%s5072_s2 + $0x26] sm:$0x3] }
  0x5b   : > { %5122 = vst [vmem:[#allocation10_spill] sm:$0xff] %v4238_v57  ;;  %v966_v1 = vunpack.c.l.b16 %v290_v15  ;;  %v1583_v51 = vsel %vm432_vm0, %v3471_v38, 0  ;;  %v1679_v55 = vsel %vm432_vm0, %v3474_v2, 0  ;;  %v1241_v39 = vshrl.u32 %v290_v15, 16  ;;  %v350_v33 = vld [vmem:[%s3895_s7 + $0x144] sm:$0x1] }
  0x5c   : > { %v1098_v31 = vrot.slane %v1097_v34, 4  ;;  %v1192_v6 = vrot.slane %v1190_v21, 5  ;;  %v1255_v34 = vshrl.u32 %v4200_v16, 16  ;;  %v1269_v7 = vshrl.u32 %v4207_v50, 16 }
  0x61   : > { %3443 = vmatmul.msk.bf16.gmra.mxu0 %vm425_vm1, %v927_v58  ;;  %3448 = vmatmul.msk.bf16.vlgmr.msra.gmra.mxu2 %vm425_vm1, %v1014_v40  ;;  %v1157_v58 = vsel %vm3963_vm4, %v1152_v59, %v1156_v13  ;;  %v1189_v40 = vrot.slane %v1187_v17, 4  ;;  %v373_v13 = vld [vmem:[%s3895_s7 + $0x1ac] sm:$0x1] }
  0x62   : > { %3451 = vmatmul.msk.bf16.vlgmr.msra.gmra.mxu3 %vm425_vm1, %v1110_v29  ;;  %v1202_v62 = vunpack.c.l.b16 %v1157_v58  ;;  %1592 = vmatpush.bf16.msra.mxu2 %v1583_v51  ;;  %v1196_v21 = vshll.u32 %v373_v13, 16  ;;  %v4280_v51 = vld [vmem:[%s3895_s7 + $0x140] sm:$0xf] }
  0x63   : > { %3434 = vmatmul.msk.bf16.gmra.mxu1 %vm425_vm1, %v743_v4  ;;  %v1185_v4 = vsel %vm3963_vm4, %v1180_v53, %v1184_v3  ;;  %v1102_v53 = vrot.slane %v1100_v14, 5  ;;  %v4258_v3 = vld [vmem:[%s3895_s7 + $0x1b8] sm:$0xf]  ;;  %1688 = vmatpush.bf16.msra.mxu3 %v1679_v55  ;;  %v1258_v14 = vshll.u32 %v4200_v16, 16  ;;  %v1193_v17 = vor.u32 %v1192_v6, %v1189_v40  ;;  %v4277_v16 = vld [vmem:[%s3895_s7 + $0xc0] sm:$0xf] }
  0x64   : > { %v4240_v56 = vunpack.c.l.b16 %v1185_v4  ;;  %5124 = vst [vmem:[#allocation12_spill] sm:$0xff] %v4258_v3  ;;  %v970_v4 = vpack.c.b16 %v967_v36, %v966_v1  ;;  %v5076_v59 = vunpack.c.l.b16 %v4258_v3  ;;  %v1206_v38 = vpack.c.b16 %v4238_v57, %v1202_v62  ;;  %v3468_v55 = vld [vmem:[%s5072_s2 + $0x22] sm:$0x3] }
  0x65   : > { %v1103_v29 = vsel %vm3963_vm4, %v1098_v31, %v1102_v53  ;;  %v1244_v36 = vshll.u32 %v290_v15, 16  ;;  %v1243_v1 = vrot.slane %v1241_v39, 4  ;;  %v1257_v31 = vrot.slane %v1255_v34, 4  ;;  %v4298_v34 = vld [vmem:[%s3895_s7 + $0xc8] sm:$0xf] }
  0x66   : > { %5123 = vst [vmem:[#allocation11_spill] sm:$0xff] %v4240_v56  ;;  %v4269_v2 = vunpack.c.l.b16 %v1103_v29  ;;  %v1015_v58 = vpack.c.b16 %v5076_v59, %v1012_v42  ;;  %v1260_v53 = vrot.slane %v1258_v14, 5  ;;  %v1272_v39 = vshll.u32 %v4207_v50, 16  ;;  %v319_v42 = vld [vmem:[%s3895_s7 + $0xb4] sm:$0x1] }
  0x67   : > { %v1246_v62 = vrot.slane %v1244_v36, 5  ;;  %v1194_v40 = vrot.slane %v1193_v17, 4  ;;  %v1198_v6 = vrot.slane %v1196_v21, 5  ;;  %v4294_v29 = vld [vmem:[%s3895_s7 + $0x1b0] sm:$0xf]  ;;  %v1343_v13 = vunpack.c.l.b16 %v4277_v16 }
  0x68   : > { %5125 = vst [vmem:[#allocation13_spill] sm:$0xff] %v4269_v2  ;;  %v1111_v15 = vpack.c.b16 %v4269_v2, %v4219_v49  ;;  %v5083_v14 = vunpack.c.l.b16 %v4280_v51  ;;  %v291_v36 = vld [vmem:[%s3895_s7 + $0x34] sm:$0x1]  ;;  %v1261_v17 = vor.u32 %v1260_v53, %v1257_v31  ;;  %v1264_v21 = vshll.u32 %v319_v42, 16  ;;  %v294_v49 = vld [vmem:[%s3895_s7 + $0x44] sm:$0x1] }
  0x69   : > { %5126 = vst [vmem:[#allocation14_spill] sm:$0xff] %v4294_v29  ;;  %v5084_v54 = vunpack.c.l.b16 %v4294_v29  ;;  %v1199_v0 = vsel %vm3963_vm4, %v1194_v40, %v1198_v6  ;;  %v1387_v31 = vunpack.c.l.b16 %v4298_v34  ;;  %v347_v42 = vld [vmem:[%s3895_s7 + $0x134] sm:$0x1]  ;;  %v1283_v6 = vshrl.u32 %v4294_v29, 16 }
  0x6a   : > { %v4308_v59 = vpack.c.b16 %v5083_v14, %v1343_v13  ;;  %v1262_v22 = vrot.slane %v1261_v17, 4  ;;  %v1266_v26 = vrot.slane %v1264_v21, 5  ;;  %v4326_v9 = vunpack.c.l.b16 %v1199_v0 }
  0x6b   : > { %v1386_v17 = vunpack.c.l.b16 %v295_v60 }
  0x6c   : > { %5127 = vst [vmem:[#allocation15_spill] sm:$0xff] %v4308_v59  ;;  %v1267_v0 = vsel %vm3963_vm4, %v1262_v22, %v1266_v26  ;;  %v1207_v50 = vpack.c.b16 %v4326_v9, %v4240_v56 }
  0x6d   : > { %5129 = vst [vmem:[#allocation17_spill] sm:$0xff] %v4326_v9 }
  0x71   : > { %3454 = vmatmul.msk.bf16.vlgmr.msrb.gmra.mxu0 %vm425_vm1, %v1206_v38  ;;  %3449 = vmatmul.msk.bf16.gmra.mxu2 %vm425_vm1, %v1015_v58  ;;  %v4302_v38 = vld [vmem:[%s3895_s7 + $0x148] sm:$0xf]  ;;  %v1271_v58 = vrot.slane %v1269_v7, 4  ;;  %v1247_v7 = vor.u32 %v1246_v62, %v1243_v1  ;;  %v971_v1 = vpack.c.b16 %v5084_v54, %v968_v52  ;;  %v1278_v62 = vshll.u32 %v347_v42, 16  ;;  %v4342_v52 = vld [vmem:[%s3895_s7 + $0x150] sm:$0xf] }
  0x72   : > { %3452 = vmatmul.msk.bf16.gmra.mxu3 %vm425_vm1, %v1111_v15  ;;  %v5082_v53 = vunpack.c.l.b16 %v4302_v38  ;;  %v293_v15 = vld [vmem:[%s3895_s7 + $0x40] sm:$0xf] }
  0x73   : > { %3445 = vmatmul.msk.bf16.vlgmr.msrb.gmra.mxu1 %vm425_vm1, %v970_v4  ;;  %v1487_v4 = vsel %vm432_vm0, %v3468_v55, 0  ;;  %v1274_v55 = vrot.slane %v1272_v39, 5  ;;  %v1250_v39 = vshll.u32 %v291_v36, 16  ;;  %v1342_v36 = vunpack.c.l.b16 %v293_v15 }
  0x74   : > { %1496 = vmatpush.bf16.msrb.mxu1 %v1487_v4  ;;  %v3477_v4 = vld [vmem:[%s5072_s2 + $0x28] sm:$0x3]  ;;  %v4323_v41 = vpack.c.b16 %v5082_v53, %v1387_v31  ;;  %v1248_v53 = vrot.slane %v1247_v7, 4  ;;  %v1516_v42 = vshll.u32 %v293_v15, 16  ;;  %v1527_v7 = vshrl.u32 %v4277_v16, 16 }
  0x75   : > { %v1775_v12 = vsel %vm432_vm0, %v3477_v4, 0  ;;  %v1275_v40 = vor.u32 %v1274_v55, %v1271_v58  ;;  %v1252_v14 = vrot.slane %v1250_v39, 5  ;;  %v1280_v4 = vrot.slane %v1278_v62, 5  ;;  %v4339_v55 = vld [vmem:[%s3895_s7 + $0xd0] sm:$0xf] }
  0x76   : > { %5128 = vst [vmem:[#allocation16_spill] sm:$0xff] %v4323_v41  ;;  %1784 = vmatpush.bf16.msrb.mxu0 %v1775_v12  ;;  %v1286_v12 = vshll.u32 %v4294_v29, 16  ;;  %v1513_v58 = vshrl.u32 %v293_v15, 16  ;;  %v1530_v39 = vshll.u32 %v4277_v16, 16  ;;  %v1346_v26 = vpack.c.b16 %v1343_v13, %v1342_v36 }
  0x77   : > { %v1276_v21 = vrot.slane %v1275_v40, 4  ;;  %v1609_v40 = vshrl.u32 %v295_v60, 16  ;;  %v4349_v62 = vunpack.c.l.b16 %v1267_v0  ;;  %v1390_v41 = vpack.c.b16 %v1387_v31, %v1386_v17 }
  0x78   : > { %v1253_v59 = vsel %vm3963_vm4, %v1248_v53, %v1252_v14  ;;  %v1431_v15 = vunpack.c.l.b16 %v4339_v55  ;;  %v1612_v16 = vshll.u32 %v295_v60, 16  ;;  %v1623_v13 = vshrl.u32 %v4298_v34, 16 }
  0x79   : > { %v1281_v22 = vsel %vm3963_vm4, %v1276_v21, %v1280_v4  ;;  %5130 = vst [vmem:[#allocation18_spill] sm:$0xff] %v4349_v62  ;;  %v1626_v36 = vshll.u32 %v4298_v34, 16  ;;  %v1529_v31 = vrot.slane %v1527_v7, 4  ;;  %v1532_v17 = vrot.slane %v1530_v39, 5  ;;  %v4371_v21 = vld [vmem:[%s3895_s7 + $0x50] sm:$0xf] }
  0x7a   : > { %v4351_v54 = vunpack.c.l.b16 %v1281_v22  ;;  %v1285_v53 = vrot.slane %v1283_v6, 4  ;;  %v1288_v0 = vrot.slane %v1286_v12, 5  ;;  %v1515_v60 = vrot.slane %v1513_v58, 4 }
  0x7b   : > { %v1298_v4 = vunpack.c.l.b16 %v1253_v59  ;;  %v1518_v34 = vrot.slane %v1516_v42, 5  ;;  %v4368_v22 = vrot.slane %v1609_v40, 4  ;;  %v1541_v7 = vshrl.u32 %v4280_v51, 16  ;;  %v4384_v42 = vld [vmem:[%s3895_s7 + $0x1c8] sm:$0xf] }
  0x7c   : > { %5131 = vst [vmem:[#allocation19_spill] sm:$0xff] %v4351_v54  ;;  %v1544_v39 = vshll.u32 %v4280_v51, 16  ;;  %v4376_v6 = vrot.slane %v1612_v16, 5  ;;  %v1625_v12 = vrot.slane %v1623_v13, 4  ;;  %v1719_v58 = vshrl.u32 %v4339_v55, 16 }
  0x7d   : > { %v1722_v59 = vshll.u32 %v4339_v55, 16  ;;  %5134 = vst [vmem:[#allocation22_spill] sm:$0xff] %v4384_v42  ;;  %v375_v40 = vld [vmem:[%s3895_s7 + $0x1b4] sm:$0x1]  ;;  %v1302_v29 = vpack.c.b16 %v4349_v62, %v1298_v4  ;;  %v1637_v16 = vshrl.u32 %v4302_v38, 16  ;;  %v1640_v13 = vshll.u32 %v4302_v38, 16 }
  0x7e   : > { %v1543_v57 = vrot.slane %v1541_v7, 4  ;;  %v1546_v55 = vrot.slane %v1544_v39, 5  ;;  %v1289_v4 = vor.u32 %v1288_v0, %v1285_v53  ;;  %v324_v62 = vld [vmem:[%s3895_s7 + $0xcc] sm:$0x1]  ;;  %v4399_v3 = vrot.slane %v1719_v58, 4 }
  0x7f   : > { %v1639_v43 = vrot.slane %v1637_v16, 4  ;;  %v1642_v44 = vrot.slane %v1640_v13, 5  ;;  %v1519_v63 = vor.u32 %v1518_v34, %v1515_v60  ;;  %v1632_v53 = vshll.u32 %v324_v62, 16  ;;  %v352_v16 = vld [vmem:[%s3895_s7 + $0x14c] sm:$0x1] }
  0x80   : > { %v1547_v0 = vor.u32 %v1546_v55, %v1543_v57  ;;  %v5135_v58 = vunpack.c.l.b16 %v4280_v51  ;;  %v1522_v60 = vshll.u32 %v294_v49, 16  ;;  %v1733_v62 = vshrl.u32 %v4342_v52, 16 }
  0x81   : > { %3455 = vmatmul.msk.bf16.gmra.mxu0 %vm425_vm1, %v1207_v50  ;;  %3460 = vmatmul.msk.bf16.vlgmr.msrb.gmra.mxu2 %vm425_vm1, %v1346_v26  ;;  %v322_v50 = vld [vmem:[%s3895_s7 + $0xc4] sm:$0x1]  ;;  %v1628_v26 = vrot.slane %v1626_v36, 5  ;;  %v4401_v36 = vrot.slane %v1722_v59, 5  ;;  %v1520_v34 = vrot.slane %v1519_v63, 4  ;;  %v1736_v13 = vshll.u32 %v4342_v52, 16 }
  0x82   : > { %3463 = vmatmul.msk.bf16.vlgmr.msrb.gmra.mxu3 %vm425_vm1, %v1390_v41  ;;  %v1536_v9 = vshll.u32 %v322_v50, 16  ;;  %v1430_v41 = vunpack.c.l.b16 %v4371_v21  ;;  %v1292_v50 = vshll.u32 %v375_v40, 16  ;;  %v1550_v40 = vshll.u32 %v350_v33, 16 }
  0x83   : > { %3446 = vmatmul.msk.bf16.gmra.mxu1 %vm425_vm1, %v971_v1  ;;  %v5085_v1 = vunpack.c.l.b16 %v4342_v52  ;;  %v1548_v57 = vrot.slane %v1547_v0, 4  ;;  %v3480_v0 = vld [vmem:[%s5072_s2 + $0x2a] sm:$0x3] }
  0x84   : > { %v1538_v7 = vrot.slane %v1536_v9, 5  ;;  %v1434_v39 = vpack.c.b16 %v1431_v15, %v1430_v41  ;;  %v5137_v9 = vunpack.c.l.b16 %v4302_v38  ;;  %v1294_v41 = vrot.slane %v1292_v50, 5 }
  0x85   : > { %v4364_v14 = vpack.c.b16 %v5085_v1, %v1431_v15  ;;  %v4380_v1 = vld [vmem:[%s3895_s7 + $0x1c0] sm:$0xf]  ;;  %v1552_v51 = vrot.slane %v1550_v40, 5  ;;  %v1643_v38 = vor.u32 %v1642_v44, %v1639_v43  ;;  %v1524_v43 = vrot.slane %v1522_v60, 5 }
  0x86   : > { %5133 = vst [vmem:[#allocation21_spill] sm:$0xff] %v4380_v1  ;;  %v5136_v59 = vunpack.c.l.b16 %v4380_v1 }
  0x87   : > { %5132 = vst [vmem:[#allocation20_spill] sm:$0xff] %v4364_v14  ;;  %v1533_v14 = vor.u32 %v1532_v17, %v1529_v31  ;;  %v3491_v31 = vld [vmem:[%s5072_s2 + $0x2c] sm:$0x3]  ;;  %v1629_v17 = vor.u32 %v1628_v26, %v1625_v12  ;;  %v1646_v26 = vshll.u32 %v352_v16, 16 }
  0x88   : > { %v1863_v56 = vsel %vm432_vm0, %v3491_v31, 0  ;;  %v1347_v31 = vpack.c.b16 %v5136_v59, %v5135_v58  ;;  %v296_v12 = vld [vmem:[%s3895_s7 + $0x4c] sm:$0x1]  ;;  %v1725_v58 = vor.u32 %v4401_v36, %v4399_v3  ;;  %v1819_v59 = vsel %vm432_vm0, %v3480_v0, 0 }
  0x89   : > { %v1534_v2 = vrot.slane %v1533_v14, 4  ;;  %1872 = vmatpush.bf16.msrb.mxu2 %v1863_v56  ;;  %v5138_v56 = vunpack.c.l.b16 %v4384_v42  ;;  %v1290_v14 = vrot.slane %v1289_v4, 4  ;;  %v1630_v55 = vrot.slane %v1629_v17, 4 }
  0x8a   : > { %v1634_v4 = vrot.slane %v1632_v53, 5  ;;  %v1648_v63 = vrot.slane %v1646_v26, 5  ;;  %v1615_v17 = vor.u32 %v4376_v6, %v4368_v22  ;;  %v1618_v53 = vshll.u32 %v296_v12, 16  ;;  %v4446_v6 = vld [vmem:[%s3895_s7 + $0x1d0] sm:$0xf] }
  0x8b   : > { %v1391_v15 = vpack.c.b16 %v5138_v56, %v5137_v9  ;;  %v1539_v33 = vsel %vm3963_vm4, %v1534_v2, %v1538_v7  ;;  %v326_v2 = vld [vmem:[%s3895_s7 + $0xd4] sm:$0x1]  ;;  %v1644_v7 = vrot.slane %v1643_v38, 4  ;;  %v1295_v44 = vsel %vm3963_vm4, %v1290_v14, %v1294_v41  ;;  %5141 = vst [vmem:[#allocation25_spill] sm:$0xff] %v4446_v6 }
  0x8c   : > { %v4423_v49 = vunpack.c.l.b16 %v1539_v33  ;;  %v1735_v9 = vrot.slane %v1733_v62, 4  ;;  %v1738_v56 = vrot.slane %v1736_v13, 5  ;;  %v1635_v14 = vsel %vm3963_vm4, %v1630_v55, %v1634_v4  ;;  %v354_v26 = vld [vmem:[%s3895_s7 + $0x154] sm:$0x1] }
  0x8d   : > { %v5142_v41 = vshrl.u32 %v4371_v21, 16  ;;  %v1708_v3 = vshll.u32 %v4371_v21, 16  ;;  %v4454_v36 = vunpack.c.l.b16 %v1295_v44  ;;  %v1649_v60 = vsel %vm3963_vm4, %v1644_v7, %v1648_v63 }
  0x8e   : > { %5139 = vst [vmem:[#allocation23_spill] sm:$0xff] %v4423_v49  ;;  %v1555_v33 = vshrl.u32 %v4380_v1, 16  ;;  %v1620_v62 = vrot.slane %v1618_v53, 5  ;;  %v5097_v12 = vunpack.c.l.b16 %v4446_v6  ;;  %v1525_v38 = vsel %vm3963_vm4, %v1520_v34, %v1524_v43  ;;  %v298_v43 = vld [vmem:[%s3895_s7 + $0x54] sm:$0x1] }
  0x8f   : > { %v1707_v16 = vrot.slane %v5142_v41, 4  ;;  %5143 = vst [vmem:[#allocation26_spill] sm:$0xff] %v4454_v36  ;;  %v4463_v21 = vunpack.c.l.b16 %v1635_v14  ;;  %v4466_v55 = vunpack.c.l.b16 %v1649_v60  ;;  %v1739_v4 = vor.u32 %v1738_v56, %v1735_v9 }
  0x90   : > { %v1651_v7 = vshrl.u32 %v4384_v42, 16  ;;  %v1654_v63 = vshll.u32 %v4384_v42, 16  ;;  %v1303_v44 = vpack.c.b16 %v4454_v36, %v4351_v54  ;;  %v1557_v56 = vrot.slane %v1555_v33, 4 }
  0x91   : > { %3466 = vmatmul.msk.bf16.vlgmr.msra.gmra.mxu0 %vm425_vm1, %v1434_v39  ;;  %v3502_v39 = vld [vmem:[%s5072_s2 + $0x2e] sm:$0x3]  ;;  %3461 = vmatmul.msk.bf16.gmra.mxu2 %vm425_vm1, %v1347_v31  ;;  %v1728_v31 = vshll.u32 %v326_v2, 16  ;;  %5144 = vst [vmem:[#allocation27_spill] sm:$0xff] %v4463_v21  ;;  %v1710_v2 = vrot.slane %v1708_v3, 5  ;;  %v1740_v0 = vrot.slane %v1739_v4, 4 }
  0x92   : > { %v1907_v40 = vsel %vm432_vm0, %v3502_v39, 0  ;;  %3464 = vmatmul.msk.bf16.gmra.mxu3 %vm425_vm1, %v1391_v15  ;;  %v1726_v15 = vrot.slane %v1725_v58, 4  ;;  %5145 = vst [vmem:[#allocation28_spill] sm:$0xff] %v4466_v55  ;;  %v3513_v39 = vld [vmem:[%s5072_s2 + $0x30] sm:$0x3] }
  0x93   : > { %3457 = vmatmul.msk.bf16.vlgmr.msra.gmra.mxu1 %vm425_vm1, %v1302_v29  ;;  %v1553_v29 = vsel %vm3963_vm4, %v1548_v57, %v1552_v51  ;;  %1916 = vmatpush.bf16.msrb.mxu3 %v1907_v40  ;;  %v1558_v57 = vshll.u32 %v4380_v1, 16  ;;  %v1616_v51 = vrot.slane %v1615_v17, 4  ;;  %v1730_v13 = vrot.slane %v1728_v31, 5  ;;  %v327_v3 = vld [vmem:[%s3895_s7 + $0xd8] sm:$0xf] }
  0x94   : > { %v4426_v50 = vunpack.c.l.b16 %v1553_v29  ;;  %1828 = vmatpush.bf16.msra.mxu1 %v1819_v59  ;;  %v1742_v29 = vshll.u32 %v354_v26, 16  ;;  %v1570_v59 = vunpack.c.l.b16 %v1525_v38  ;;  %v1951_v9 = vsel %vm432_vm0, %v3513_v39, 0  ;;  %v378_v4 = vld [vmem:[%s3895_s7 + $0x1c4] sm:$0x1]  ;;  %v4494_v38 = vld [vmem:[%s3895_s7 + $0x158] sm:$0xf] }
  0x95   : > { %v1621_v34 = vsel %vm3963_vm4, %v1616_v51, %v1620_v62  ;;  %v1560_v14 = vrot.slane %v1558_v57, 5  ;;  %v5146_v31 = vunpack.c.l.b16 %v4342_v52  ;;  %v1731_v60 = vsel %vm3963_vm4, %v1726_v15, %v1730_v13  ;;  %1960 = vmatpush.bf16.msra.mxu0 %v1951_v9  ;;  %v380_v15 = vld [vmem:[%s3895_s7 + $0x1cc] sm:$0x1] }
  0x96   : > { %5140 = vst [vmem:[#allocation24_spill] sm:$0xff] %v4426_v50  ;;  %v1744_v40 = vrot.slane %v1742_v29, 5  ;;  %v1666_v51 = vunpack.c.l.b16 %v1621_v34  ;;  %v1711_v62 = vor.u32 %v1710_v2, %v1707_v16  ;;  %v1714_v26 = vshll.u32 %v298_v43, 16 }
  0x97   : > { %v1435_v41 = vpack.c.b16 %v5097_v12, %v5146_v31  ;;  %v1653_v57 = vrot.slane %v1651_v7, 4  ;;  %v1656_v52 = vrot.slane %v1654_v63, 5  ;;  %v1574_v29 = vpack.c.b16 %v4423_v49, %v1570_v59  ;;  %v3483_v12 = vld [vmem:[%s3895_s7 + $0x60] sm:$0xf] }
  0x98   : > { %v1745_v33 = vsel %vm3963_vm4, %v1740_v0, %v1744_v40  ;;  %v1475_v39 = vunpack.c.l.b16 %v327_v3  ;;  %v4500_v31 = vunpack.c.l.b16 %v1731_v60  ;;  %v1561_v13 = vor.u32 %v1560_v14, %v1557_v56  ;;  %v299_v56 = vld [vmem:[%s3895_s7 + $0x58] sm:$0xf] }
  0x99   : > { %v1564_v16 = vshll.u32 %v378_v4, 16  ;;  %v1476_v2 = vunpack.c.l.b16 %v4494_v38  ;;  %v4504_v34 = vunpack.c.l.b16 %v1745_v33  ;;  %v1670_v7 = vpack.c.b16 %v4463_v21, %v1666_v51 }
  0x9a   : > { %5147 = vst [vmem:[#allocation29_spill] sm:$0xff] %v4500_v31  ;;  %v1712_v63 = vrot.slane %v1711_v62, 4  ;;  %v1716_v43 = vrot.slane %v1714_v26, 5  ;;  %v1660_v0 = vshll.u32 %v380_v15, 16  ;;  %v1747_v60 = vshrl.u32 %v4446_v6, 16 }
  0x9b   : > { %5148 = vst [vmem:[#allocation30_spill] sm:$0xff] %v4504_v34  ;;  %v4510_v40 = vpack.c.b16 %v1476_v2, %v1475_v39  ;;  %v1566_v3 = vrot.slane %v1564_v16, 5  ;;  %v1750_v51 = vshll.u32 %v4446_v6, 16  ;;  %v1474_v26 = vunpack.c.l.b16 %v299_v56  ;;  %v358_v6 = vld [vmem:[%s3895_s7 + $0x168] sm:$0xf] }
  0x9c   : > { %v1717_v4 = vsel %vm3963_vm4, %v1712_v63, %v1716_v43  ;;  %v382_v63 = vld [vmem:[%s3895_s7 + $0x1d4] sm:$0x1] }
  0x9d   : > { %5149 = vst [vmem:[#allocation31_spill] sm:$0xff] %v4510_v40  ;;  %v1762_v15 = vunpack.c.l.b16 %v1717_v4  ;;  %v1752_v16 = vrot.slane %v1750_v51, 5  ;;  %v1478_v59 = vpack.c.b16 %v1475_v39, %v1474_v26  ;;  %v1756_v26 = vshll.u32 %v382_v63, 16  ;;  %v3615_v40 = vld [vmem:[%s3895_s7 + $0x1e4] sm:$0xf0] }
  0x9e   : > { %v4472_v17 = vpop.f32.mrf.mxu0 }
  0xa0   : > { %v4482_v58 = vpop.f32.mrf.mxu1 }
  0xa1   : > { %3467 = vmatmul.msk.bf16.gmra.mxu0 %vm425_vm1, %v1435_v41  ;;  %3472 = vmatmul.msk.bf16.vlgmr.msra.gmra.mxu2 %vm425_vm1, %v1574_v29  ;;  %v1562_v41 = vrot.slane %v1561_v13, 4  ;;  %v1749_v13 = vrot.slane %v1747_v60, 4 }
  0xa2   : > { %3475 = vmatmul.msk.bf16.vlgmr.msra.gmra.mxu3 %vm425_vm1, %v1670_v7  ;;  %v3527_v7 = vld [vmem:[%s5072_s2 + $0x34] sm:$0x3] }
  0xa3   : > { %3458 = vmatmul.msk.bf16.gmra.mxu1 %vm425_vm1, %v1303_v44  ;;  %v1657_v44 = vor.u32 %v1656_v52, %v1653_v57  ;;  %v1662_v57 = vrot.slane %v1660_v0, 5  ;;  %v1567_v29 = vsel %vm3963_vm4, %v1562_v41, %v1566_v3  ;;  %v2143_v43 = vsel %vm432_vm0, %v3527_v7, 0 }
  0xa4   : > { %v523_v62 = vpop.f32.mrf.mxu2  ;;  %v4530_v22 = vunpack.c.l.b16 %v1567_v29  ;;  %2152 = vmatpush.bf16.msra.mxu2 %v2143_v43  ;;  %v1766_v0 = vpack.c.b16 %v4500_v31, %v1762_v15  ;;  %v1753_v51 = vor.u32 %v1752_v16, %v1749_v13  ;;  %v1758_v29 = vrot.slane %v1756_v26, 5  ;;  %v3524_v15 = vld [vmem:[%s5072_s2 + $0x32] sm:$0x3]  ;;  %v4554_v13 = vld [vmem:[%s3895_s7 + $0x1d8] sm:$0xf] }
  0xa5   : > { %v1658_v33 = vrot.slane %v1657_v44, 4  ;;  %v567_v52 = vpop.f32.mrf.mxu3  ;;  %5152 = vst [vmem:[#allocation34_spill] sm:$0xff] %v4554_v13  ;;  %v2047_v7 = vsel %vm432_vm0, %v3524_v15, 0 }
  0xa6   : > { %v447_v14 = vpop.f32.mrf.mxu0  ;;  %5150 = vst [vmem:[#allocation32_spill] sm:$0xff] %v4530_v22  ;;  %v1575_v4 = vpack.c.b16 %v4530_v22, %v4426_v50 }
  0xa7   : > { %v1663_v53 = vsel %vm3963_vm4, %v1658_v33, %v1662_v57 }
  0xa8   : > { %v4515_v9 = vpop.f32.mrf.mxu1  ;;  %v4536_v41 = vunpack.c.l.b16 %v1663_v53 }
  0xaa   : > { %5151 = vst [vmem:[#allocation33_spill] sm:$0xff] %v4536_v41 }
  0xac   : > { %v525_v60 = vpop.f32.mrf.mxu2 }
  0xad   : > { %v569_v57 = vpop.f32.mrf.mxu3 }
  0xae   : > { %v666_v3 = vpop.f32.mrf.mxu0 }
  0xb0   : > { %v483_v56 = vpop.f32.mrf.mxu1 }
  0xb1   : > { %v484_v44 = vadd.f32 %v483_v56, %v4472_v17  ;;  %3478 = vmatmul.msk.bf16.vlgmr.msrb.gmra.mxu0 %vm425_vm1, %v1766_v0  ;;  %v1671_v17 = vpack.c.b16 %v4536_v41, %v4466_v55  ;;  %3473 = vmatmul.msk.bf16.gmra.mxu2 %vm425_vm1, %v1575_v4  ;;  %v5096_v0 = vunpack.c.l.b16 %v4554_v13  ;;  %v3533_v4 = vld [vmem:[%s5072_s2 + $0x38] sm:$0x3] }
  0xb2   : > { %v3613_v13 = vld [vmem:[%s3895_s7 + $0xf4] sm:$0xf0] }
  0xb3   : > { %v533_v39 = vadd.f32 %v523_v62, %v484_v44  ;;  %3469 = vmatmul.msk.bf16.vlgmr.msrb.gmra.mxu1 %vm425_vm1, %v1478_v59  ;;  %v1754_v62 = vrot.slane %v1753_v51, 4  ;;  %v3530_v59 = vld [vmem:[%s5072_s2 + $0x36] sm:$0x3]  ;;  %3476 = vmatmul.msk.bf16.gmra.mxu3 %vm425_vm1, %v1671_v17 }
  0xb4   : > { %v2239_v16 = vsel %vm432_vm0, %v3530_v59, 0  ;;  %2056 = vmatpush.bf16.msrb.mxu1 %v2047_v7  ;;  %v528_v44 = vpop.f32.mrf.mxu2  ;;  %v302_v7 = vld [vmem:[%s3895_s7 + $0x68] sm:$0xf] }
  0xb5   : > { %v577_v33 = vadd.f32 %v567_v52, %v533_v39  ;;  %2248 = vmatpush.bf16.msra.mxu3 %v2239_v16  ;;  %v1759_v39 = vsel %vm3963_vm4, %v1754_v62, %v1758_v29  ;;  %v572_v51 = vpop.f32.mrf.mxu3  ;;  %v3494_v62 = vld [vmem:[%s3895_s7 + $0x68] sm:$0xf]  ;;  %v3612_v16 = vld [vmem:[%s3895_s7 + $0xec] sm:$0xf0] }
  0xb6   : > { %v668_v43 = vpop.f32.mrf.mxu0  ;;  %v4562_v26 = vunpack.c.l.b16 %v1759_v39  ;;  %v3611_v29 = vld [vmem:[%s3895_s7 + $0xe4] sm:$0xf0] }
  0xb7   : > { %v4544_v53 = vadd.f32 %v666_v3, %v577_v33 }
  0xb8   : > { %v485_v52 = vpop.f32.mrf.mxu1  ;;  %5153 = vst [vmem:[#allocation35_spill] sm:$0xff] %v4562_v26  ;;  %v1767_v38 = vpack.c.b16 %v4562_v26, %v4504_v34  ;;  %v3610_v26 = vld [vmem:[%s3895_s7 + $0xdc] sm:$0xf0] }
  0xb9   : > { %v486_v56 = vadd.f32 %v485_v52, %v447_v14  ;;  %v3505_v52 = vld [vmem:[%s3895_s7 + $0x70] sm:$0xf]  ;;  %v3484_v34 = vor.u32 %v3610_v26, %v3483_v12 }
  0xbb   : > { %v534_v63 = vadd.f32 %v525_v60, %v486_v56  ;;  %v1479_v60 = vpack.c.b16 %v5096_v0, %v1476_v2  ;;  %v3495_v56 = vor.u32 %v3611_v29, %v3494_v62 }
  0xbc   : > { %v530_v2 = vpop.f32.mrf.mxu2 }
  0xbd   : > { %v578_v3 = vadd.f32 %v569_v57, %v534_v63  ;;  %v2277_v57 = vsel %vm432_vm0, %v3533_v4, 0  ;;  %v330_v63 = vld [vmem:[%s3895_s7 + $0xe8] sm:$0xf]  ;;  %v574_v39 = vpop.f32.mrf.mxu3  ;;  %v2073_v4 = vshrl.u32 %v302_v7, 16 }
  0xbe   : > { %2286 = vmatpush.bf16.msrb.mxu0 %v2277_v57  ;;  %v671_v15 = vpop.f32.mrf.mxu0  ;;  %v2087_v57 = vshrl.u32 %v330_v63, 16 }
  0xbf   : > { %v4564_v14 = vadd.f32 %v668_v43, %v578_v3  ;;  %v3506_v3 = vor.u32 %v3612_v16, %v3505_v52  ;;  %v332_v52 = vld [vmem:[%s3895_s7 + $0xf0] sm:$0xf] }
  0xc0   : > { %v488_v33 = vpop.f32.mrf.mxu1 }
  0xc1   : > { %v489_v17 = vadd.f32 %v488_v33, %v4482_v58  ;;  %v304_v58 = vld [vmem:[%s3895_s7 + $0x70] sm:$0xf]  ;;  %3479 = vmatmul.msk.bf16.gmra.mxu0 %vm425_vm1, %v1767_v38  ;;  %v2076_v33 = vshll.u32 %v302_v7, 16  ;;  %3500 = vmatmul.msk.bf16.vlgmr.msrb.gmra.mxu2 %vm425_vm1, %v3495_v56  ;;  %v2075_v38 = vrot.slane %v2073_v4, 4  ;;  %v331_v56 = vld [vmem:[%s3895_s7 + $0xec] sm:$0x1] }
  0xc2   : > { %v2172_v62 = vshll.u32 %v304_v58, 16 }
  0xc3   : > { %v535_v59 = vadd.f32 %v528_v44, %v489_v17  ;;  %3470 = vmatmul.msk.bf16.gmra.mxu1 %vm425_vm1, %v1479_v60  ;;  %v2090_v60 = vshll.u32 %v330_v63, 16  ;;  %3511 = vmatmul.msk.bf16.vlgmr.msrb.gmra.mxu3 %vm425_vm1, %v3506_v3  ;;  %v303_v63 = vld [vmem:[%s3895_s7 + $0x6c] sm:$0x1] }
  0xc4   : > { %v858_v7 = vpop.f32.mrf.mxu2  ;;  %v2082_v31 = vshll.u32 %v303_v63, 16 }
  0xc5   : > { %v579_v43 = vadd.f32 %v572_v51, %v535_v59  ;;  %v2169_v51 = vshrl.u32 %v304_v58, 16  ;;  %v2078_v59 = vrot.slane %v2076_v33, 5  ;;  %v2092_v0 = vrot.slane %v2090_v60, 5  ;;  %v902_v4 = vpop.f32.mrf.mxu3  ;;  %v305_v33 = vld [vmem:[%s3895_s7 + $0x74] sm:$0x1] }
  0xc6   : > { %v673_v16 = vpop.f32.mrf.mxu0 }
  0xc7   : > { %v4586_v44 = vadd.f32 %v671_v15, %v579_v43  ;;  %v2089_v43 = vrot.slane %v2087_v57, 4  ;;  %v2171_v58 = vrot.slane %v2169_v51, 4  ;;  %v2079_v41 = vor.u32 %v2078_v59, %v2075_v38 }
  0xc8   : > { %v490_v17 = vpop.f32.mrf.mxu1  ;;  %v2096_v57 = vshll.u32 %v331_v56, 16  ;;  %v2178_v38 = vshll.u32 %v305_v33, 16  ;;  %v3616_v56 = vld [vmem:[%s3895_s7 + $0x1ec] sm:$0xf0] }
  0xc9   : > { %v491_v29 = vadd.f32 %v490_v17, %v4515_v9  ;;  %v2174_v9 = vrot.slane %v2172_v62, 5  ;;  %v2186_v17 = vshll.u32 %v332_v52, 16  ;;  %v2093_v51 = vor.u32 %v2092_v0, %v2089_v43  ;;  %v333_v62 = vld [vmem:[%s3895_s7 + $0xf4] sm:$0x1]  ;;  %v4613_v43 = vld [vmem:[%s3895_s7 + $0x160] sm:$0xf] }
  0xca   : > { %v2192_v55 = vshll.u32 %v333_v62, 16  ;;  %v2098_v33 = vrot.slane %v2096_v57, 5 }
  0xcb   : > { %v536_v15 = vadd.f32 %v530_v2, %v491_v29  ;;  %v2183_v2 = vshrl.u32 %v332_v52, 16  ;;  %v3516_v29 = vld [vmem:[%s3895_s7 + $0x78] sm:$0xf]  ;;  %v3498_v52 = vld [vmem:[%s3895_s7 + $0x168] sm:$0xf]  ;;  %v2175_v21 = vor.u32 %v2174_v9, %v2171_v58  ;;  %v2188_v0 = vrot.slane %v2186_v17, 5 }
  0xcc   : > { %v3517_v26 = vor.u32 %v3613_v13, %v3516_v29  ;;  %v860_v9 = vpop.f32.mrf.mxu2  ;;  %v3499_v17 = vor.u32 %v3615_v40, %v3498_v52  ;;  %v2180_v29 = vrot.slane %v2178_v38, 5  ;;  %v2194_v57 = vrot.slane %v2192_v55, 5  ;;  %v3542_v55 = vld [vmem:[%s5072_s2 + $0x3e] sm:$0x3]  ;;  %v386_v38 = vld [vmem:[%s3895_s7 + $0x1e8] sm:$0xf] }
  0xcd   : > { %v580_v3 = vadd.f32 %v574_v39, %v536_v15  ;;  %v3539_v39 = vld [vmem:[%s5072_s2 + $0x3c] sm:$0x3]  ;;  %v300_v15 = vld [vmem:[%s3895_s7 + $0x60] sm:$0xf]  ;;  %v2185_v12 = vrot.slane %v2183_v2, 4  ;;  %v2176_v13 = vrot.slane %v2175_v21, 4 }
  0xce   : > { %v2353_v59 = vsel %vm432_vm0, %v3539_v39, 0  ;;  %v1977_v49 = vshrl.u32 %v300_v15, 16  ;;  %v946_v58 = vpop.f32.mrf.mxu0  ;;  %v328_v2 = vld [vmem:[%s3895_s7 + $0xe0] sm:$0xf] }
  0xcf   : > { %v4599_v60 = vadd.f32 %v673_v16, %v580_v3  ;;  %v3509_v16 = vld [vmem:[%s3895_s7 + $0x170] sm:$0xf]  ;;  %2362 = vmatpush.bf16.msrb.mxu2 %v2353_v59  ;;  %v2080_v3 = vrot.slane %v2079_v41, 4  ;;  %v4618_v39 = vld [vmem:[%s3895_s7 + $0x1dc] sm:$0xf0]  ;;  %v1980_v41 = vshll.u32 %v300_v15, 16  ;;  %v904_v59 = vpop.f32.mrf.mxu3 }
  0xd0   : > { %v762_v22 = vpop.f32.mrf.mxu1  ;;  %v1979_v40 = vrot.slane %v1977_v49, 4  ;;  %v1994_v52 = vshll.u32 %v328_v2, 16  ;;  %v3536_v49 = vld [vmem:[%s5072_s2 + $0x3a] sm:$0x3] }
  0xd1   : > { %v772_v63 = vadd.f32 %v762_v22, %v4544_v53  ;;  %v2084_v22 = vrot.slane %v2082_v31, 5  ;;  %v2094_v53 = vrot.slane %v2093_v51, 4  ;;  %3522 = vmatmul.msk.bf16.vlgmr.msra.gmra.mxu0 %vm425_vm1, %v3517_v26  ;;  %v4625_v31 = vld [vmem:[%s3895_s7 + $0x1f4] sm:$0xf0]  ;;  %v1991_v51 = vshrl.u32 %v328_v2, 16  ;;  %3501 = vmatmul.msk.bf16.gmra.mxu2 %vm425_vm1, %v3499_v17 }
  0xd2   : > { %v1982_v26 = vrot.slane %v1980_v41, 5  ;;  %v2104_v2 = vshll.u32 %v358_v6, 16 }
  0xd3   : > { %v868_v50 = vadd.f32 %v858_v7, %v772_v63  ;;  %3489 = vmatmul.msk.bf16.vlgmr.msra.gmra.mxu1 %vm425_vm1, %v3484_v34  ;;  %v3510_v7 = vor.u32 %v3616_v56, %v3509_v16  ;;  %v2189_v63 = vor.u32 %v2188_v0, %v2185_v12  ;;  %v4622_v34 = vld [vmem:[%s3895_s7 + $0x178] sm:$0xf]  ;;  %v2099_v15 = vsel %vm3963_vm4, %v2094_v53, %v2098_v33  ;;  %v301_v0 = vld [vmem:[%s3895_s7 + $0x64] sm:$0x1] }
  0xd4   : > { %v2181_v56 = vsel %vm3963_vm4, %v2176_v13, %v2180_v29  ;;  %v2391_v12 = vsel %vm432_vm0, %v3542_v55, 0  ;;  %v329_v53 = vld [vmem:[%s3895_s7 + $0xe4] sm:$0x1]  ;;  %v2101_v33 = vshrl.u32 %v358_v6, 16  ;;  %v1993_v17 = vrot.slane %v1991_v51, 4 }
  0xd5   : > { %v912_v62 = vadd.f32 %v902_v4, %v868_v50  ;;  %v2085_v4 = vsel %vm3963_vm4, %v2080_v3, %v2084_v22  ;;  %v2315_v3 = vsel %vm432_vm0, %v3536_v49, 0  ;;  %v2190_v22 = vrot.slane %v2189_v63, 4  ;;  %2400 = vmatpush.bf16.msrb.mxu3 %v2391_v12  ;;  %v863_v49 = vpop.f32.mrf.mxu2  ;;  %v360_v6 = vld [vmem:[%s3895_s7 + $0x170] sm:$0xf] }
  0xd6   : > { %2324 = vmatpush.bf16.msra.mxu1 %v2315_v3  ;;  %3512 = vmatmul.msk.bf16.gmra.mxu3 %vm425_vm1, %v3510_v7  ;;  %v1996_v13 = vrot.slane %v1994_v52, 5  ;;  %v2115_v29 = vshrl.u32 %v386_v38, 16  ;;  %v948_v55 = vpop.f32.mrf.mxu0  ;;  %v4654_v63 = vunpack.c.l.b16 %v2085_v4  ;;  %v4659_v12 = vunpack.c.l.b16 %v2181_v56  ;;  %v388_v3 = vld [vmem:[%s3895_s7 + $0x1f0] sm:$0xf]  ;;  %v387_v4 = vld [vmem:[%s3895_s7 + $0x1ec] sm:$0x1] }
  0xd7   : > { %v4628_v21 = vadd.f32 %v946_v58, %v912_v62  ;;  %v2118_v62 = vshll.u32 %v386_v38, 16  ;;  %v1983_v7 = vor.u32 %v1982_v26, %v1979_v40  ;;  %v1986_v51 = vshll.u32 %v301_v0, 16  ;;  %v907_v50 = vpop.f32.mrf.mxu3 }
  0xd8   : > { %v764_v16 = vpop.f32.mrf.mxu1  ;;  %v2000_v52 = vshll.u32 %v329_v53, 16  ;;  %v2103_v36 = vrot.slane %v2101_v33, 4  ;;  %v2117_v42 = vrot.slane %v2115_v29, 4  ;;  %v2197_v1 = vshrl.u32 %v360_v6, 16 }
  0xd9   : > { %v773_v58 = vadd.f32 %v764_v16, %v4564_v14  ;;  %v3521_v14 = vor.u32 %v4625_v31, %v4622_v34  ;;  %v4656_v16 = vunpack.c.l.b16 %v2099_v15  ;;  %v2106_v34 = vrot.slane %v2104_v2, 5 }
  0xda   : > { %v1997_v31 = vor.u32 %v1996_v13, %v1993_v17  ;;  %v2120_v15 = vrot.slane %v2118_v62, 5  ;;  %v2200_v56 = vshll.u32 %v360_v6, 16  ;;  %v2211_v40 = vshrl.u32 %v388_v3, 16 }
  0xdb   : > { %v869_v41 = vadd.f32 %v860_v9, %v773_v58  ;;  %v2195_v9 = vsel %vm3963_vm4, %v2190_v22, %v2194_v57  ;;  %v359_v58 = vld [vmem:[%s3895_s7 + $0x16c] sm:$0x1]  ;;  %v2214_v0 = vshll.u32 %v388_v3, 16  ;;  %v1984_v57 = vrot.slane %v1983_v7, 4 }
  0xdc   : > { %v2227_v53 = vunpack.c.l.b16 %v2195_v9  ;;  %v1988_v22 = vrot.slane %v1986_v51, 5  ;;  %v2002_v17 = vrot.slane %v2000_v52, 5  ;;  %v2107_v13 = vor.u32 %v2106_v34, %v2103_v36 }
  0xdd   : > { %v913_v38 = vadd.f32 %v904_v59, %v869_v41  ;;  %v3545_v59 = vld [vmem:[%s5072_s2 + $0x40] sm:$0x3]  ;;  %v2110_v29 = vshll.u32 %v359_v58, 16  ;;  %v1998_v62 = vrot.slane %v1997_v31, 4  ;;  %v2121_v41 = vor.u32 %v2120_v15, %v2117_v42  ;;  %v865_v7 = vpop.f32.mrf.mxu2 }
  0xde   : > { %v2442_v33 = vsel %vm432_vm0, %v3545_v59, 0  ;;  %v2199_v6 = vrot.slane %v2197_v1, 4  ;;  %v5154_v51 = vor.u32 %v4618_v39, %v4613_v43  ;;  %v2202_v52 = vrot.slane %v2200_v56, 5  ;;  %v389_v1 = vld [vmem:[%s3895_s7 + $0x1f4] sm:$0x1] }
  0xdf   : > { %v4666_v54 = vadd.f32 %v948_v55, %v913_v38  ;;  %2451 = vmatpush.bf16.msra.mxu0 %v2442_v33  ;;  %v2124_v55 = vshll.u32 %v387_v4, 16  ;;  %v951_v38 = vpop.f32.mrf.mxu0  ;;  %v2213_v36 = vrot.slane %v2211_v40, 4  ;;  %v2216_v9 = vrot.slane %v2214_v0, 5  ;;  %v909_v34 = vpop.f32.mrf.mxu3  ;;  %v356_v43 = vld [vmem:[%s3895_s7 + $0x160] sm:$0xf] }
  0xe0   : > { %v767_v26 = vpop.f32.mrf.mxu1  ;;  %v2134_v58 = vpack.c.b16 %v4656_v16, %v4654_v63  ;;  %v2230_v42 = vpack.c.b16 %v2227_v53, %v4659_v12  ;;  %v1989_v31 = vsel %vm3963_vm4, %v1984_v57, %v1988_v22  ;;  %v2108_v4 = vrot.slane %v2107_v13, 4  ;;  %v384_v39 = vld [vmem:[%s3895_s7 + $0x1e0] sm:$0xf] }
  0xe1   : > { %v774_v2 = vadd.f32 %v767_v26, %v4586_v44  ;;  %v361_v44 = vld [vmem:[%s3895_s7 + $0x174] sm:$0x1]  ;;  %v2112_v15 = vrot.slane %v2110_v29, 5  ;;  %3523 = vmatmul.msk.bf16.gmra.mxu0 %vm425_vm1, %v3521_v14  ;;  %v2003_v56 = vsel %vm3963_vm4, %v1998_v62, %v2002_v17  ;;  %v2122_v40 = vrot.slane %v2121_v41, 4 }
  0xe2   : > { %v2126_v0 = vrot.slane %v2124_v55, 5  ;;  %v2206_v63 = vshll.u32 %v361_v44, 16  ;;  %v2203_v12 = vor.u32 %v2202_v52, %v2199_v6  ;;  %v2220_v59 = vshll.u32 %v389_v1, 16  ;;  %3528 = vmatmul.msk.bf16.vlgmr.msra.gmra.mxu2 %vm425_vm1, %v2134_v58  ;;  %v385_v1 = vld [vmem:[%s3895_s7 + $0x1e4] sm:$0x1] }
  0xe3   : > { %v870_v3 = vadd.f32 %v863_v49, %v774_v2  ;;  %3490 = vmatmul.msk.bf16.gmra.mxu1 %vm425_vm1, %v5154_v51  ;;  %v2005_v53 = vshrl.u32 %v356_v43, 16  ;;  %v2008_v57 = vshll.u32 %v356_v43, 16  ;;  %v2019_v22 = vshrl.u32 %v384_v39, 16  ;;  %v357_v51 = vld [vmem:[%s3895_s7 + $0x164] sm:$0x1]  ;;  %s3711_s7 = sshra.s32 %s3313_s29, 4  ;;  %s3712_s7 = int_to_ptr.hbm [resolvable:$true] %s3711_s7 }
  0xe4   : > { %v2022_v14 = vshll.u32 %v384_v39, 16  ;;  %v2034_v2 = vunpack.c.l.b16 %v1989_v31  ;;  %v2035_v17 = vunpack.c.l.b16 %v2003_v56  ;;  %v2113_v13 = vsel %vm3963_vm4, %v2108_v4, %v2112_v15  ;;  %v3551_v39 = vld [vmem:[%s5072_s2 + $0x44] sm:$0x3]  ;;  %s3713_s30 = scalar_lea.hbm %s3712_s7, 16  ;;  %p3718_p2 = scmp.lt.s32.totalorder %s3712_s7, %s5074_s4 }
  0xe5   : > { %v914_v49 = vadd.f32 %v907_v50, %v870_v3  ;;  %v2217_v50 = vor.u32 %v2216_v9, %v2213_v36  ;;  %v2127_v29 = vsel %vm3963_vm4, %v2122_v40, %v2126_v0  ;;  %v2208_v62 = vrot.slane %v2206_v63, 5  ;;  %v1034_v6 = vpop.f32.mrf.mxu2  ;;  %p3714_p13 = scmp.ne.s32.totalorder %s3712_s7, %s3713_s30  ;;  %p3719_p3 = scmp.lt.s32.totalorder %s3717_s8, %s3713_s30 }
  0xe6   : > { %3531 = vmatmul.msk.bf16.vlgmr.msra.gmra.mxu3 %vm425_vm1, %v2230_v42  ;;  %v2204_v3 = vrot.slane %v2203_v12, 4  ;;  %v2007_v44 = vrot.slane %v2005_v53, 4  ;;  %v2010_v52 = vrot.slane %v2008_v57, 5  ;;  %v2021_v36 = vrot.slane %v2019_v22, 4 }
  0xe7   : > { %v4689_v16 = vadd.f32 %v951_v38, %v914_v49  ;;  %v953_v55 = vpop.f32.mrf.mxu0  ;;  %v2218_v38 = vrot.slane %v2217_v50, 4  ;;  %v2024_v9 = vrot.slane %v2022_v14, 5  ;;  %v1130_v42 = vpop.f32.mrf.mxu3  ;;  %v2132_v49 = vunpack.c.l.b16 %v2113_v13  ;;  %p3715_p0 = pnand %p3714_p13, %p3844_p4  ;;  %p3720_p5 = por %p3719_p3, %p3718_p2 }
  0xe8   : > { %v769_v26 = vpop.f32.mrf.mxu1  ;;  %v2133_v31 = vunpack.c.l.b16 %v2127_v29  ;;  %v2209_v15 = vsel %vm3963_vm4, %v2204_v3, %v2208_v62  ;;  %v2014_v43 = vshll.u32 %v357_v51, 16  ;;  %v2011_v40 = vor.u32 %v2010_v52, %v2007_v44 }
  0xe9   : > { %v775_v33 = vadd.f32 %v769_v26, %v4599_v60  ;;  %v2222_v60 = vrot.slane %v2220_v59, 5  ;;  %v2025_v0 = vor.u32 %v2024_v9, %v2021_v36  ;;  %v2028_v63 = vshll.u32 %v385_v1, 16  ;;  %v391_v1 = vld [vmem:[%s4739_s13] sm:$0xf]  ;;  %p3716_p1 = pneg %p3715_p0 }
  0xea   : > { %v2544_v12 = vsel %vm432_vm0, %v3551_v39, 0  ;;  %v2228_v59 = vunpack.c.l.b16 %v2209_v15  ;;  %v2135_v14 = vpack.c.b16 %v2133_v31, %v2132_v49  ;;  %v2267_v31 = vunpack.c.l.b16 %v391_v1 }
  0xeb   : > { %v871_v41 = vadd.f32 %v865_v7, %v775_v33  ;;  %v2038_v7 = vpack.c.b16 %v2035_v17, %v2034_v2  ;;  %2553 = vmatpush.bf16.msra.mxu2 %v2544_v12  ;;  %v2012_v33 = vrot.slane %v2011_v40, 4  ;;  %v2016_v2 = vrot.slane %v2014_v43, 5  ;;  %v3557_v43 = vld [vmem:[%s5072_s2 + $0x48] sm:$0x3]  ;;  %p3721_p6 = pnand %p3720_p5, %p3716_p1 }
  0xec   : > { %v2026_v17 = vrot.slane %v2025_v0, 4  ;;  %v2030_v13 = vrot.slane %v2028_v63, 5  ;;  %v2620_v39 = vsel %vm432_vm0, %v3557_v43, 0  ;;  %v5156_v40 = vunpack.c.l.b16 %v3990_v27 }
  0xed   : > { %v915_v58 = vadd.f32 %v909_v34, %v871_v41  ;;  %v2223_v34 = vsel %vm3963_vm4, %v2218_v38, %v2222_v60  ;;  %v1036_v22 = vpop.f32.mrf.mxu2  ;;  %v2017_v38 = vsel %vm3963_vm4, %v2012_v33, %v2016_v2 }
  0xee   : > { %v2229_v26 = vunpack.c.l.b16 %v2223_v34  ;;  %v2031_v60 = vsel %vm3963_vm4, %v2026_v17, %v2030_v13  ;;  %v2269_v0 = vpack.c.b16 %v2267_v31, %v5156_v40 }
  0xef   : > { %v4707_v4 = vadd.f32 %v953_v55, %v915_v58  ;;  %v1226_v57 = vpop.f32.mrf.mxu0  ;;  %v1132_v62 = vpop.f32.mrf.mxu3  ;;  %v3554_v55 = vld [vmem:[%s5072_s2 + $0x46] sm:$0x3]  ;;  %v2036_v58 = vunpack.c.l.b16 %v2017_v38 }
  0xf0   : > { %v990_v56 = vpop.f32.mrf.mxu1 }
  0xf1   : > { %v1000_v50 = vadd.f32 %v990_v56, %v4628_v21  ;;  %3534 = vmatmul.msk.bf16.vlgmr.msrb.gmra.mxu0 %vm425_vm1, %v4014_v46  ;;  %v2231_v21 = vpack.c.b16 %v2229_v26, %v2228_v59  ;;  %v2582_v46 = vsel %vm432_vm0, %v3554_v55, 0 }
  0xf2   : > { %3529 = vmatmul.msk.bf16.gmra.mxu2 %vm425_vm1, %v2135_v14  ;;  %2591 = vmatpush.bf16.msra.mxu3 %v2582_v46 }
  0xf3   : > { %v1044_v53 = vadd.f32 %v1034_v6, %v1000_v50  ;;  %3525 = vmatmul.msk.bf16.vlgmr.msrb.gmra.mxu1 %vm425_vm1, %v2038_v7  ;;  %v3548_v6 = vld [vmem:[%s5072_s2 + $0x42] sm:$0x3]  ;;  %2629 = vmatpush.bf16.msrb.mxu0 %v2620_v39 }
  0xf4   : > { %v2493_v51 = vsel %vm432_vm0, %v3548_v6, 0 }
  0xf5   : > { %v1140_v29 = vadd.f32 %v1130_v42, %v1044_v53  ;;  %2502 = vmatpush.bf16.msrb.mxu1 %v2493_v51  ;;  %v1039_v9 = vpop.f32.mrf.mxu2  ;;  %v2037_v42 = vunpack.c.l.b16 %v2031_v60 }
  0xf6   : > { %3532 = vmatmul.msk.bf16.gmra.mxu3 %vm425_vm1, %v2231_v21 }
  0xf7   : > { %v1236_v41 = vadd.f32 %v1226_v57, %v1140_v29  ;;  %v1228_v36 = vpop.f32.mrf.mxu0  ;;  %v1135_v49 = vpop.f32.mrf.mxu3  ;;  %v2039_v34 = vpack.c.b16 %v2037_v42, %v2036_v58  ;;  %v2417_v57 = vshrl.u32 %v391_v1, 16  ;;  %v395_v29 = vld [vmem:[%s4739_s13 + $0x10] sm:$0xf]  ;;  %v5157_v58 = vunpack.c.l.b16 %v3957_v61  ;;  %v3560_v61 = vld [vmem:[%s5072_s2 + $0x4a] sm:$0x3] }
  0xf8   : > { %v992_v3 = vpop.f32.mrf.mxu1 }
  0xf9   : > { %v1001_v44 = vadd.f32 %v992_v3, %v4666_v54  ;;  %v392_v3 = vld [vmem:[%s4739_s13 + $0x4] sm:$0x1] }
  0xfb   : > { %v1045_v52 = vadd.f32 %v1036_v22, %v1001_v44  ;;  %v2420_v22 = vshll.u32 %v391_v1, 16 }
  0xfd   : > { %v1141_v7 = vadd.f32 %v1132_v62, %v1045_v52  ;;  %v1041_v50 = vpop.f32.mrf.mxu2  ;;  %v2419_v62 = vrot.slane %v2417_v57, 4  ;;  %v2422_v21 = vrot.slane %v2420_v22, 5 }
  0xff   : > { %v1237_v15 = vadd.f32 %v1228_v36, %v1141_v7  ;;  %v1231_v12 = vpop.f32.mrf.mxu0  ;;  %v1137_v26 = vpop.f32.mrf.mxu3  ;;  %v2423_v36 = vor.u32 %v2422_v21, %v2419_v62 }
 0x100   : > { %v995_v54 = vpop.f32.mrf.mxu1 }
 0x101   : > { %v1002_v56 = vadd.f32 %v995_v54, %v4689_v16  ;;  %3535 = vmatmul.msk.bf16.gmra.mxu0 %vm425_vm1, %v2269_v0  ;;  %v2424_v43 = vrot.slane %v2423_v36, 4 }
 0x102   : > { %3540 = vmatmul.msk.bf16.vlgmr.msrb.gmra.mxu2 %vm425_vm1, %v3979_v20  ;;  %v397_v20 = vld [vmem:[%s4739_s13 + $0x18] sm:$0xf] }
 0x103   : > { %v1046_v63 = vadd.f32 %v1039_v9, %v1002_v56  ;;  %3526 = vmatmul.msk.bf16.gmra.mxu1 %vm425_vm1, %v2039_v34  ;;  %v2381_v46 = vunpack.c.l.b16 %v397_v20  ;;  %v2426_v9 = vshll.u32 %v392_v3, 16  ;;  %v396_v20 = vld [vmem:[%s4739_s13 + $0x14] sm:$0x1] }
 0x105   : > { %v1142_v59 = vadd.f32 %v1135_v49, %v1046_v63  ;;  %v1366_v2 = vpop.f32.mrf.mxu2  ;;  %v5158_v49 = vpack.c.b16 %v4033_v23, %v3992_v30  ;;  %v2428_v54 = vrot.slane %v2426_v9, 5  ;;  %v393_v23 = vld [vmem:[%s4739_s13 + $0x8] sm:$0xf] }
 0x106   : > { %3543 = vmatmul.msk.bf16.vlgmr.msrb.gmra.mxu3 %vm425_vm1, %v4001_v35  ;;  %v2343_v35 = vunpack.c.l.b16 %v395_v29 }
 0x107   : > { %v4755_v53 = vadd.f32 %v1231_v12, %v1142_v59  ;;  %v1233_v33 = vpop.f32.mrf.mxu0  ;;  %v1410_v13 = vpop.f32.mrf.mxu3  ;;  %v2305_v12 = vunpack.c.l.b16 %v393_v23  ;;  %v2519_v59 = vshrl.u32 %v395_v29, 16 }
 0x108   : > { %v997_v16 = vpop.f32.mrf.mxu1  ;;  %v2345_v42 = vpack.c.b16 %v2343_v35, %v5157_v58 }
 0x109   : > { %v1003_v27 = vadd.f32 %v997_v16, %v4707_v4  ;;  %v3563_v4 = vld [vmem:[%s5072_s2 + $0x4c] sm:$0x3] }
 0x10a   : > { %v2696_v38 = vsel %vm432_vm0, %v3563_v4, 0 }
 0x10b   : > { %v1047_v14 = vadd.f32 %v1041_v50, %v1003_v27  ;;  %2705 = vmatpush.bf16.msrb.mxu2 %v2696_v38  ;;  %v2429_v50 = vsel %vm3963_vm4, %v2424_v43, %v2428_v54  ;;  %v398_v54 = vld [vmem:[%s4739_s13 + $0x20] sm:$0xf] }
 0x10c   : > { %v2432_v57 = vunpack.c.l.b16 %v2429_v50 }
 0x10d   : > { %v1143_v17 = vadd.f32 %v1137_v26, %v1047_v14  ;;  %v1368_v52 = vpop.f32.mrf.mxu2  ;;  %v2522_v26 = vshll.u32 %v395_v29, 16 }
 0x10e   : > { %v2434_v29 = vpack.c.b16 %v2432_v57, %v4042_v32  ;;  %v5161_v32 = vpack.c.b16 %v4093_v47, %v4055_v45  ;;  %v394_v47 = vld [vmem:[%s4739_s13 + $0xc] sm:$0x1] }
 0x10f   : > { %v4763_v55 = vadd.f32 %v1233_v33, %v1143_v17  ;;  %v1454_v44 = vpop.f32.mrf.mxu0  ;;  %v1412_v7 = vpop.f32.mrf.mxu3  ;;  %v3569_v33 = vld [vmem:[%s5072_s2 + $0x50] sm:$0x3]  ;;  %v2524_v62 = vrot.slane %v2522_v26, 5 }
 0x110   : > { %v1322_v6 = vpop.f32.mrf.mxu1  ;;  %v2798_v17 = vsel %vm432_vm0, %v3569_v33, 0 }
 0x111   : > { %v1332_v60 = vadd.f32 %v1322_v6, %v1236_v41  ;;  %3546 = vmatmul.msk.bf16.vlgmr.msra.gmra.mxu0 %vm425_vm1, %v5158_v49  ;;  %v5159_v41 = vunpack.c.l.b16 %v3969_v8  ;;  %v2658_v8 = vsel %vm432_vm0, %v3560_v61, 0 }
 0x112   : > { %3541 = vmatmul.msk.bf16.gmra.mxu2 %vm425_vm1, %v2345_v42  ;;  %2807 = vmatpush.bf16.msra.mxu0 %v2798_v17 }
 0x113   : > { %v1376_v51 = vadd.f32 %v1366_v2, %v1332_v60  ;;  %3537 = vmatmul.msk.bf16.vlgmr.msra.gmra.mxu1 %vm425_vm1, %v3925_v28  ;;  %v2383_v31 = vpack.c.b16 %v2381_v46, %v5159_v41  ;;  %v3566_v28 = vld [vmem:[%s5072_s2 + $0x4e] sm:$0x3]  ;;  %v2528_v60 = vshll.u32 %v396_v20, 16 }
 0x114   : > { %v2747_v39 = vsel %vm432_vm0, %v3566_v28, 0  ;;  %2667 = vmatpush.bf16.msra.mxu1 %v2658_v8  ;;  %v2572_v8 = vunpack.c.l.b16 %v398_v54 }
 0x115   : > { %v1420_v1 = vadd.f32 %v1410_v13, %v1376_v51  ;;  %2756 = vmatpush.bf16.msrb.mxu3 %v2747_v39  ;;  %v1371_v63 = vpop.f32.mrf.mxu2  ;;  %v2521_v13 = vrot.slane %v2519_v59, 4  ;;  %v2468_v51 = vshrl.u32 %v393_v23, 16  ;;  %v2530_v9 = vrot.slane %v2528_v60, 5 }
 0x116   : > { %3544 = vmatmul.msk.bf16.gmra.mxu3 %vm425_vm1, %v2383_v31 }
 0x117   : > { %v4781_v34 = vadd.f32 %v1454_v44, %v1420_v1  ;;  %v1456_v0 = vpop.f32.mrf.mxu0  ;;  %v1415_v27 = vpop.f32.mrf.mxu3  ;;  %v2525_v38 = vor.u32 %v2524_v62, %v2521_v13  ;;  %v400_v62 = vld [vmem:[%s4739_s13 + $0x28] sm:$0xf] }
 0x118   : > { %v1324_v30 = vpop.f32.mrf.mxu1  ;;  %v2610_v20 = vunpack.c.l.b16 %v400_v62 }
 0x119   : > { %v1333_v56 = vadd.f32 %v1324_v30, %v1237_v15  ;;  %v5160_v15 = vunpack.c.l.b16 %v3909_v19  ;;  %v2526_v36 = vrot.slane %v2525_v38, 4  ;;  %v2477_v30 = vshll.u32 %v394_v47, 16 }
 0x11a   : > { %v2773_v47 = vshrl.u32 %v400_v62, 16 }
 0x11b   : > { %v1377_v40 = vadd.f32 %v1368_v52, %v1333_v56  ;;  %v2307_v14 = vpack.c.b16 %v2305_v12, %v5160_v15  ;;  %v2531_v45 = vsel %vm3963_vm4, %v2526_v36, %v2530_v9  ;;  %v2479_v59 = vrot.slane %v2477_v30, 5 }
 0x11d   : > { %v1421_v16 = vadd.f32 %v1412_v7, %v1377_v40  ;;  %v1373_v35 = vpop.f32.mrf.mxu2  ;;  %v2470_v7 = vrot.slane %v2468_v51, 4  ;;  %v5164_v51 = vld [vmem:[#allocation5_spill] sm:$0xff] }
 0x11f   : > { %v4796_v22 = vadd.f32 %v1456_v0, %v1421_v16  ;;  %v1459_v6 = vpop.f32.mrf.mxu0  ;;  %v1417_v3 = vpop.f32.mrf.mxu3 }
 0x120   : > { %v1327_v2 = vpop.f32.mrf.mxu1 }
 0x121   : > { %v1334_v21 = vadd.f32 %v1327_v2, %v4755_v53  ;;  %3547 = vmatmul.msk.bf16.gmra.mxu0 %vm425_vm1, %v2434_v29  ;;  %v2471_v53 = vshll.u32 %v393_v23, 16 }
 0x122   : > { %3552 = vmatmul.msk.bf16.vlgmr.msra.gmra.mxu2 %vm425_vm1, %v5161_v32 }
 0x123   : > { %v1378_v4 = vadd.f32 %v1371_v63, %v1334_v21  ;;  %3538 = vmatmul.msk.bf16.gmra.mxu1 %vm425_vm1, %v2307_v14  ;;  %v2473_v49 = vrot.slane %v2471_v53, 5  ;;  %v5162_v63 = vpack.c.b16 %v4128_v25, %v4099_v37  ;;  %v3578_v37 = vld [vmem:[%s5072_s2 + $0x56] sm:$0x3]  ;;  %v5165_v53 = vunpack.c.l.b16 %v5164_v51 }
 0x125   : > { %v1422_v19 = vadd.f32 %v1415_v27, %v1378_v4  ;;  %v1594_v1 = vpop.f32.mrf.mxu2  ;;  %v2474_v61 = vor.u32 %v2473_v49, %v2470_v7  ;;  %v2612_v32 = vpack.c.b16 %v2610_v20, %v5165_v53  ;;  %v5174_v20 = vld [vmem:[#allocation10_spill] sm:$0xff]  ;;  %v402_v53 = vld [vmem:[%s4739_s13 + $0x30] sm:$0xf] }
 0x126   : > { %3555 = vmatmul.msk.bf16.vlgmr.msra.gmra.mxu3 %vm425_vm1, %v4097_v48  ;;  %v2534_v48 = vunpack.c.l.b16 %v2531_v45 }
 0x127   : > { %v4809_v46 = vadd.f32 %v1459_v6, %v1422_v19  ;;  %v1461_v42 = vpop.f32.mrf.mxu0  ;;  %v1690_v31 = vpop.f32.mrf.mxu3  ;;  %v2475_v50 = vrot.slane %v2474_v61, 4  ;;  %v2722_v6 = vshrl.u32 %v398_v54, 16 }
 0x128   : > { %v1329_v44 = vpop.f32.mrf.mxu1  ;;  %v2536_v12 = vpack.c.b16 %v2534_v48, %v4117_v11  ;;  %v3572_v11 = vld [vmem:[%s5072_s2 + $0x52] sm:$0x3]  ;;  %v2776_v48 = vshll.u32 %v400_v62, 16 }
 0x129   : > { %v1335_v52 = vadd.f32 %v1329_v44, %v4763_v55  ;;  %v3575_v55 = vld [vmem:[%s5072_s2 + $0x54] sm:$0x3]  ;;  %v2849_v15 = vsel %vm432_vm0, %v3572_v11, 0  ;;  %v2724_v44 = vrot.slane %v2722_v6, 4 }
 0x12a   : > { %v2887_v23 = vsel %vm432_vm0, %v3575_v55, 0  ;;  %v5168_v55 = vld [vmem:[#allocation7_spill] sm:$0xff] }
 0x12b   : > { %v1379_v58 = vadd.f32 %v1373_v35, %v1335_v52  ;;  %2896 = vmatpush.bf16.msra.mxu2 %v2887_v23  ;;  %v2725_v35 = vshll.u32 %v398_v54, 16  ;;  %v5167_v54 = vld [vmem:[#allocation8_spill] sm:$0xff] }
 0x12d   : > { %v1423_v41 = vadd.f32 %v1417_v3, %v1379_v58  ;;  %v1596_v0 = vpop.f32.mrf.mxu2  ;;  %v2727_v52 = vrot.slane %v2725_v35, 5 }
 0x12f   : > { %v4821_v43 = vadd.f32 %v1461_v42, %v1423_v41  ;;  %v1786_v40 = vpop.f32.mrf.mxu0  ;;  %v1692_v16 = vpop.f32.mrf.mxu3  ;;  %v5166_v41 = vld [vmem:[#allocation6_spill] sm:$0xff] }
 0x130   : > { %v1498_v28 = vpop.f32.mrf.mxu1 }
 0x131   : > { %v1508_v39 = vadd.f32 %v1498_v28, %v4781_v34  ;;  %3558 = vmatmul.msk.bf16.vlgmr.msrb.gmra.mxu0 %vm425_vm1, %v4123_v18  ;;  %v5163_v34 = vunpack.c.l.b16 %v4115_v10  ;;  %v2480_v18 = vsel %vm3963_vm4, %v2475_v50, %v2479_v59  ;;  %v2925_v10 = vsel %vm432_vm0, %v3578_v37, 0  ;;  %v3587_v59 = vld [vmem:[%s5072_s2 + $0x5c] sm:$0x3] }
 0x132   : > { %3553 = vmatmul.msk.bf16.gmra.mxu2 %vm425_vm1, %v2536_v12  ;;  %2934 = vmatpush.bf16.msra.mxu3 %v2925_v10  ;;  %v2483_v13 = vunpack.c.l.b16 %v2480_v18  ;;  %v5169_v28 = vpack.c.b16 %v5167_v54, %v5168_v55  ;;  %v2778_v12 = vrot.slane %v2776_v48, 5  ;;  %v5179_v48 = vld [vmem:[#allocation17_spill] sm:$0xff] }
 0x133   : > { %v1604_v56 = vadd.f32 %v1594_v1, %v1508_v39  ;;  %3549 = vmatmul.msk.bf16.vlgmr.msrb.gmra.mxu1 %vm425_vm1, %v5162_v63  ;;  %v2574_v27 = vpack.c.b16 %v2572_v8, %v5163_v34  ;;  %v2775_v63 = vrot.slane %v2773_v47, 4  ;;  %v401_v34 = vld [vmem:[%s4739_s13 + $0x2c] sm:$0x1] }
 0x134   : > { %2858 = vmatpush.bf16.msrb.mxu1 %v2849_v15  ;;  %v2485_v19 = vpack.c.b16 %v2483_v13, %v4175_v24  ;;  %v399_v24 = vld [vmem:[%s4739_s13 + $0x24] sm:$0x1] }
 0x135   : > { %v1700_v26 = vadd.f32 %v1690_v31, %v1604_v56  ;;  %v1599_v17 = vpop.f32.mrf.mxu2  ;;  %v2731_v49 = vshll.u32 %v399_v24, 16  ;;  %v5170_v15 = vld [vmem:[#allocation9_spill] sm:$0xff]  ;;  %v2648_v24 = vunpack.c.l.b16 %v402_v53 }
 0x136   : > { %3556 = vmatmul.msk.bf16.gmra.mxu3 %vm425_vm1, %v2574_v27  ;;  %v3052_v27 = vsel %vm432_vm0, %v3587_v59, 0  ;;  %v5181_v59 = vld [vmem:[#allocation16_spill] sm:$0xff] }
 0x137   : > { %v4838_v57 = vadd.f32 %v1786_v40, %v1700_v26  ;;  %v1788_v2 = vpop.f32.mrf.mxu0  ;;  %v1695_v29 = vpop.f32.mrf.mxu3  ;;  %v2733_v8 = vrot.slane %v2731_v49, 5 }
 0x138   : > { %v1500_v25 = vpop.f32.mrf.mxu1 }
 0x139   : > { %v1509_v14 = vadd.f32 %v1500_v25, %v4796_v22  ;;  %v3581_v22 = vld [vmem:[%s5072_s2 + $0x58] sm:$0x3] }
 0x13a   : > { %v2963_v38 = vsel %vm432_vm0, %v3581_v22, 0 }
 0x13b   : > { %v1605_v33 = vadd.f32 %v1596_v0, %v1509_v14  ;;  %2972 = vmatpush.bf16.msrb.mxu0 %v2963_v38  ;;  %v404_v0 = vld [vmem:[%s4739_s13 + $0x38] sm:$0xf]  ;;  %v2779_v14 = vor.u32 %v2778_v12, %v2775_v63  ;;  %v3590_v38 = vld [vmem:[%s5072_s2 + $0x5e] sm:$0x3]  ;;  %v2827_v63 = vshll.u32 %v402_v53, 16  ;;  %v5180_v12 = vld [vmem:[#allocation15_spill] sm:$0xff] }
 0x13d   : > { %v1701_v21 = vadd.f32 %v1692_v16, %v1605_v33  ;;  %v1601_v58 = vpop.f32.mrf.mxu2  ;;  %v2686_v16 = vunpack.c.l.b16 %v404_v0  ;;  %v2782_v33 = vshll.u32 %v401_v34, 16  ;;  %v2780_v22 = vrot.slane %v2779_v14, 4  ;;  %v407_v14 = vld [vmem:[%s4739_s13 + $0x48] sm:$0xf] }
 0x13e   : > { %v2824_v0 = vshrl.u32 %v402_v53, 16 }
 0x13f   : > { %v4854_v4 = vadd.f32 %v1788_v2, %v1701_v21  ;;  %v1791_v9 = vpop.f32.mrf.mxu0  ;;  %v1697_v1 = vpop.f32.mrf.mxu3  ;;  %v5171_v2 = vld [vmem:[#allocation12_spill] sm:$0xff] }
 0x140   : > { %v1503_v3 = vpop.f32.mrf.mxu1 }
 0x141   : > { %v1510_v60 = vadd.f32 %v1503_v3, %v4809_v46  ;;  %3559 = vmatmul.msk.bf16.gmra.mxu0 %vm425_vm1, %v2612_v32  ;;  %v2728_v46 = vor.u32 %v2727_v52, %v2724_v44  ;;  %v2784_v3 = vrot.slane %v2782_v33, 5  ;;  %v3103_v32 = vsel %vm432_vm0, %v3590_v38, 0 }
 0x142   : > { %3564 = vmatmul.msk.bf16.vlgmr.msrb.gmra.mxu2 %vm425_vm1, %v5166_v41 }
 0x143   : > { %v1606_v36 = vadd.f32 %v1599_v17, %v1510_v60  ;;  %3550 = vmatmul.msk.bf16.gmra.mxu1 %vm425_vm1, %v2485_v19  ;;  %v2729_v39 = vrot.slane %v2728_v46, 4  ;;  %3061 = vmatpush.bf16.msrb.mxu2 %v3052_v27  ;;  %v5172_v17 = vunpack.c.l.b16 %v5171_v2  ;;  %v3584_v60 = vld [vmem:[%s5072_s2 + $0x5a] sm:$0x3]  ;;  %v2826_v27 = vrot.slane %v2824_v0, 4 }
 0x144   : > { %v3001_v44 = vsel %vm432_vm0, %v3584_v60, 0 }
 0x145   : > { %v1702_v42 = vadd.f32 %v1695_v29, %v1606_v36  ;;  %v1874_v23 = vpop.f32.mrf.mxu2  ;;  %v2688_v13 = vpack.c.b16 %v2686_v16, %v5172_v17  ;;  %v5173_v29 = vld [vmem:[#allocation11_spill] sm:$0xff] }
 0x146   : > { %3567 = vmatmul.msk.bf16.vlgmr.msrb.gmra.mxu3 %vm425_vm1, %v5169_v28  ;;  %v5175_v6 = vpack.c.b16 %v5173_v29, %v5174_v20 }
 0x147   : > { %v4867_v7 = vadd.f32 %v1791_v9, %v1702_v42  ;;  %v1793_v30 = vpop.f32.mrf.mxu0  ;;  %v1918_v40 = vpop.f32.mrf.mxu3  ;;  %3112 = vmatpush.bf16.msrb.mxu3 %v3103_v32  ;;  %v2785_v42 = vsel %vm3963_vm4, %v2780_v22, %v2784_v3  ;;  %v5185_v22 = vld [vmem:[#allocation21_spill] sm:$0xff] }
 0x148   : > { %v1505_v31 = vpop.f32.mrf.mxu1  ;;  %v2788_v49 = vunpack.c.l.b16 %v2785_v42  ;;  %v5186_v3 = vunpack.c.l.b16 %v5185_v22 }
 0x149   : > { %v1511_v45 = vadd.f32 %v1505_v31, %v4821_v43  ;;  %v2734_v43 = vsel %vm3963_vm4, %v2729_v39, %v2733_v8  ;;  %v5177_v31 = vld [vmem:[#allocation14_spill] sm:$0xff] }
 0x14a   : > { %v2737_v11 = vunpack.c.l.b16 %v2734_v43 }
 0x14b   : > { %v1607_v61 = vadd.f32 %v1601_v58, %v1511_v45  ;;  %v5178_v45 = vunpack.c.l.b16 %v5177_v31 }
 0x14d   : > { %v1703_v56 = vadd.f32 %v1697_v1, %v1607_v61  ;;  %v1876_v10 = vpop.f32.mrf.mxu2  ;;  %v2650_v47 = vpack.c.b16 %v2648_v24, %v5178_v45  ;;  %v2790_v61 = vpack.c.b16 %v2788_v49, %v5179_v48  ;;  %v409_v45 = vld [vmem:[%s4739_s13 + $0x50] sm:$0xf] }
 0x14e   : > { %v3132_v22 = vshll.u32 %v409_v45, 16 }
 0x14f   : > { %v4877_v50 = vadd.f32 %v1793_v30, %v1703_v56  ;;  %v1962_v18 = vpop.f32.mrf.mxu0  ;;  %v1920_v21 = vpop.f32.mrf.mxu3 }
 0x150   : > { %v1830_v26 = vpop.f32.mrf.mxu1 }
 0x151   : > { %v1840_v37 = vadd.f32 %v1830_v26, %v4838_v57  ;;  %3570 = vmatmul.msk.bf16.vlgmr.msra.gmra.mxu0 %vm425_vm1, %v5175_v6  ;;  %v5176_v57 = vld [vmem:[#allocation13_spill] sm:$0xff]  ;;  %v5182_v6 = vld [vmem:[#allocation19_spill] sm:$0xff] }
 0x152   : > { %v2739_v35 = vpack.c.b16 %v2737_v11, %v5176_v57  ;;  %3565 = vmatmul.msk.bf16.gmra.mxu2 %vm425_vm1, %v2688_v13  ;;  %v5183_v57 = vld [vmem:[#allocation18_spill] sm:$0xff] }
 0x153   : > { %v1884_v25 = vadd.f32 %v1874_v23, %v1840_v37  ;;  %3561 = vmatmul.msk.bf16.vlgmr.msra.gmra.mxu1 %vm425_vm1, %v5170_v15  ;;  %v2829_v37 = vrot.slane %v2827_v63, 5  ;;  %v5191_v63 = vld [vmem:[#allocation25_spill] sm:$0xff] }
 0x154   : > { %3010 = vmatpush.bf16.msra.mxu1 %v3001_v44  ;;  %v5187_v44 = vld [vmem:[#allocation20_spill] sm:$0xff] }
 0x155   : > { %v1928_v62 = vadd.f32 %v1918_v40, %v1884_v25  ;;  %v1879_v58 = vpop.f32.mrf.mxu2  ;;  %v2830_v17 = vor.u32 %v2829_v37, %v2826_v27  ;;  %v408_v37 = vld [vmem:[%s4739_s13 + $0x4c] sm:$0x1] }
 0x156   : > { %3568 = vmatmul.msk.bf16.gmra.mxu3 %vm425_vm1, %v2739_v35  ;;  %v5184_v35 = vpack.c.b16 %v5182_v6, %v5183_v57  ;;  %v5196_v6 = vld [vmem:[#allocation28_spill] sm:$0xff]  ;;  %v5197_v57 = vld [vmem:[#allocation27_spill] sm:$0xff] }
 0x157   : > { %v1972_v19 = vadd.f32 %v1962_v18, %v1928_v62  ;;  %v1964_v9 = vpop.f32.mrf.mxu0  ;;  %v405_v18 = vld [vmem:[%s4739_s13 + $0x40] sm:$0xf]  ;;  %v2831_v60 = vrot.slane %v2830_v17, 4  ;;  %v5194_v17 = vld [vmem:[#allocation23_spill] sm:$0xff] }
 0x158   : > { %v1832_v51 = vpop.f32.mrf.mxu1  ;;  %v2877_v2 = vunpack.c.l.b16 %v405_v18 }
 0x159   : > { %v1841_v52 = vadd.f32 %v1832_v51, %v4854_v4  ;;  %v1923_v46 = vpop.f32.mrf.mxu3  ;;  %v3593_v4 = vld [vmem:[%s5072_s2 + $0x60] sm:$0x3] }
 0x15a   : > { %v3154_v55 = vsel %vm432_vm0, %v3593_v4, 0  ;;  %v2879_v38 = vpack.c.b16 %v2877_v2, %v5186_v3  ;;  %v3030_v4 = vshll.u32 %v405_v18, 16  ;;  %v5193_v2 = vld [vmem:[#allocation24_spill] sm:$0xff] }
 0x15b   : > { %v1885_v36 = vadd.f32 %v1876_v10, %v1841_v52  ;;  %3163 = vmatpush.bf16.msra.mxu0 %v3154_v55  ;;  %v403_v10 = vld [vmem:[%s4739_s13 + $0x34] sm:$0x1] }
 0x15c   : > { %v2833_v13 = vshll.u32 %v403_v10, 16 }
 0x15d   : > { %v1929_v1 = vadd.f32 %v1920_v21, %v1885_v36  ;;  %v1881_v39 = vpop.f32.mrf.mxu2 }
 0x15e   : > { %v2835_v51 = vrot.slane %v2833_v13, 5  ;;  %v5195_v13 = vpack.c.b16 %v5193_v2, %v5194_v17 }
 0x15f   : > { %v1973_v41 = vadd.f32 %v1964_v9, %v1929_v1  ;;  %v1967_v23 = vpop.f32.mrf.mxu0 }
 0x160   : > { %v1835_v54 = vpop.f32.mrf.mxu1  ;;  %v2836_v24 = vsel %vm3963_vm4, %v2831_v60, %v2835_v51 }
 0x161   : > { %v1842_v28 = vadd.f32 %v1835_v54, %v4867_v7  ;;  %v1925_v56 = vpop.f32.mrf.mxu3  ;;  %3571 = vmatmul.msk.bf16.gmra.mxu0 %vm425_vm1, %v2790_v61  ;;  %v2839_v31 = vunpack.c.l.b16 %v2836_v24  ;;  %v3078_v61 = vshrl.u32 %v407_v14, 16 }
 0x162   : > { %3576 = vmatmul.msk.bf16.vlgmr.msra.gmra.mxu2 %vm425_vm1, %v5180_v12  ;;  %v5192_v12 = vunpack.c.l.b16 %v5191_v63 }
 0x163   : > { %v1886_v30 = vadd.f32 %v1879_v58, %v1842_v28  ;;  %3562 = vmatmul.msk.bf16.gmra.mxu1 %vm425_vm1, %v2650_v47  ;;  %v3027_v47 = vshrl.u32 %v405_v18, 16  ;;  %v2953_v28 = vunpack.c.l.b16 %v409_v45 }
 0x165   : > { %v1930_v8 = vadd.f32 %v1923_v46, %v1886_v30  ;;  %v2154_v34 = vpop.f32.mrf.mxu2  ;;  %v3081_v30 = vshll.u32 %v407_v14, 16 }
 0x166   : > { %3579 = vmatmul.msk.bf16.vlgmr.msra.gmra.mxu3 %vm425_vm1, %v5181_v59  ;;  %v3080_v59 = vrot.slane %v3078_v61, 4 }
 0x167   : > { %v1974_v40 = vadd.f32 %v1967_v23, %v1930_v8  ;;  %v1969_v16 = vpop.f32.mrf.mxu0  ;;  %v5190_v23 = vld [vmem:[#allocation26_spill] sm:$0xff]  ;;  %v3029_v8 = vrot.slane %v3027_v47, 4 }
 0x168   : > { %v1837_v7 = vpop.f32.mrf.mxu1 }
 0x169   : > { %v1843_v43 = vadd.f32 %v1837_v7, %v4877_v50  ;;  %v2250_v25 = vpop.f32.mrf.mxu3  ;;  %v2915_v50 = vunpack.c.l.b16 %v407_v14  ;;  %v2955_v7 = vpack.c.b16 %v2953_v28, %v5192_v12  ;;  %v5200_v28 = vld [vmem:[#allocation32_spill] sm:$0xff] }
 0x16b   : > { %v1887_v26 = vadd.f32 %v1881_v39, %v1843_v43  ;;  %v406_v43 = vld [vmem:[%s4739_s13 + $0x44] sm:$0x1] }
 0x16c   : > { %v3036_v10 = vshll.u32 %v406_v43, 16  ;;  %v411_v43 = vld [vmem:[%s4739_s13 + $0x58] sm:$0xf] }
 0x16d   : > { %v1931_v11 = vadd.f32 %v1925_v56, %v1887_v26  ;;  %v2156_v20 = vpop.f32.mrf.mxu2  ;;  %v3032_v56 = vrot.slane %v3030_v4, 5  ;;  %v3083_v26 = vrot.slane %v3081_v30, 5  ;;  %v5199_v4 = vld [vmem:[#allocation31_spill] sm:$0xff] }
 0x16f   : > { %v1975_v15 = vadd.f32 %v1969_v16, %v1931_v11  ;;  %v2288_v29 = vpop.f32.mrf.mxu0  ;;  %v3033_v18 = vor.u32 %v3032_v56, %v3029_v8 }
 0x170   : > { %v2058_v33 = vpop.f32.mrf.mxu1 }
 0x171   : > { %v2068_v62 = vadd.f32 %v2058_v33, %v1972_v19  ;;  %v2252_v32 = vpop.f32.mrf.mxu3  ;;  %3582 = vmatmul.msk.bf16.vlgmr.msrb.gmra.mxu0 %vm425_vm1, %v5187_v44  ;;  %v5188_v19 = vld [vmem:[#allocation22_spill] sm:$0xff]  ;;  %v3087_v33 = vshll.u32 %v408_v37, 16 }
 0x172   : > { %v5189_v52 = vunpack.c.l.b16 %v5188_v19  ;;  %3577 = vmatmul.msk.bf16.gmra.mxu2 %vm425_vm1, %v2879_v38 }
 0x173   : > { %v2164_v21 = vadd.f32 %v2154_v34, %v2068_v62  ;;  %3573 = vmatmul.msk.bf16.vlgmr.msrb.gmra.mxu1 %vm425_vm1, %v5184_v35  ;;  %v5198_v35 = vpack.c.b16 %v5196_v6, %v5197_v57 }
 0x174   : > { %v2917_v36 = vpack.c.b16 %v2915_v50, %v5189_v52  ;;  %v3134_v52 = vrot.slane %v3132_v22, 5 }
 0x175   : > { %v2260_v53 = vadd.f32 %v2250_v25, %v2164_v21  ;;  %v2159_v49 = vpop.f32.mrf.mxu2  ;;  %v3034_v21 = vrot.slane %v3033_v18, 4 }
 0x176   : > { %3580 = vmatmul.msk.bf16.gmra.mxu3 %vm425_vm1, %v2917_v36 }
 0x177   : > { %v4938_v9 = vadd.f32 %v2288_v29, %v2260_v53  ;;  %v2290_v46 = vpop.f32.mrf.mxu0  ;;  %v3038_v29 = vrot.slane %v3036_v10, 5  ;;  %v3089_v53 = vrot.slane %v3087_v33, 5 }
 0x178   : > { %v2060_v58 = vpop.f32.mrf.mxu1 }
 0x179   : > { %v2069_v42 = vadd.f32 %v2060_v58, %v1973_v41  ;;  %v2255_v55 = vpop.f32.mrf.mxu3  ;;  %v2841_v41 = vpack.c.b16 %v2839_v31, %v5190_v23 }
 0x17b   : > { %v2165_v1 = vadd.f32 %v2156_v20, %v2069_v42  ;;  %v3129_v20 = vshrl.u32 %v409_v45, 16 }
 0x17d   : > { %v2261_v54 = vadd.f32 %v2252_v32, %v2165_v1  ;;  %v2161_v27 = vpop.f32.mrf.mxu2  ;;  %v3131_v19 = vrot.slane %v3129_v20, 4  ;;  %v410_v1 = vld [vmem:[%s4739_s13 + $0x54] sm:$0x1] }
 0x17f   : > { %v4945_v48 = vadd.f32 %v2290_v46, %v2261_v54  ;;  %v2293_v34 = vpop.f32.mrf.mxu0  ;;  %v3135_v54 = vor.u32 %v3134_v52, %v3131_v19 }
 0x180   : > { %v2063_v39 = vpop.f32.mrf.mxu1 }
 0x181   : > { %v2070_v0 = vadd.f32 %v2063_v39, %v1974_v40  ;;  %v2257_v25 = vpop.f32.mrf.mxu3  ;;  %3583 = vmatmul.msk.bf16.gmra.mxu0 %vm425_vm1, %v2955_v7  ;;  %v3084_v40 = vor.u32 %v3083_v26, %v3080_v59  ;;  %v5202_v39 = vld [vmem:[#allocation29_spill] sm:$0xff]  ;;  %v3136_v63 = vrot.slane %v3135_v54, 4 }
 0x182   : > { %3588 = vmatmul.msk.bf16.vlgmr.msrb.gmra.mxu2 %vm425_vm1, %v5195_v13 }
 0x183   : > { %v2166_v16 = vadd.f32 %v2159_v49, %v2070_v0  ;;  %3574 = vmatmul.msk.bf16.gmra.mxu1 %vm425_vm1, %v2841_v41  ;;  %v3085_v51 = vrot.slane %v3084_v40, 4  ;;  %v5201_v41 = vld [vmem:[#allocation30_spill] sm:$0xff] }
 0x184   : > { %v5203_v8 = vpack.c.b16 %v5201_v41, %v5202_v39  ;;  %v5205_v40 = vld [vmem:[#allocation34_spill] sm:$0xff] }
 0x185   : > { %v2262_v11 = vadd.f32 %v2255_v55, %v2166_v16  ;;  %v2364_v60 = vpop.f32.mrf.mxu2  ;;  %v3090_v58 = vsel %vm3963_vm4, %v3085_v51, %v3089_v53  ;;  %v3138_v55 = vshll.u32 %v410_v1, 16  ;;  %v5206_v33 = vunpack.c.l.b16 %v5205_v40 }
 0x186   : > { %3591 = vmatmul.msk.bf16.vlgmr.msrb.gmra.mxu3 %vm425_vm1, %v5198_v35  ;;  %v3093_v49 = vunpack.c.l.b16 %v3090_v58 }
 0x187   : > { %v2300_v14 = vadd.f32 %v2293_v34, %v2262_v11  ;;  %v2295_v38 = vpop.f32.mrf.mxu0  ;;  %v3140_v12 = vrot.slane %v3138_v55, 5 }
 0x188   : > { %v2065_v62 = vpop.f32.mrf.mxu1 }
 0x189   : > { %v2071_v50 = vadd.f32 %v2065_v62, %v1975_v15  ;;  %v2402_v44 = vpop.f32.mrf.mxu3  ;;  %v3039_v15 = vsel %vm3963_vm4, %v3034_v21, %v3038_v29  ;;  %v3141_v37 = vsel %vm3963_vm4, %v3136_v63, %v3140_v12  ;;  %v5207_v62 = vld [vmem:[#allocation35_spill] sm:$0xff] }
 0x18a   : > { %v3042_v42 = vunpack.c.l.b16 %v3039_v15  ;;  %v3144_v18 = vunpack.c.l.b16 %v3141_v37 }
 0x18b   : > { %v2167_v3 = vadd.f32 %v2161_v27, %v2071_v50  ;;  %v2991_v27 = vunpack.c.l.b16 %v411_v43 }
 0x18c   : > { %v3044_v61 = vpack.c.b16 %v3042_v42, %v5200_v28 }
 0x18d   : > { %v2263_v32 = vadd.f32 %v2257_v25, %v2167_v3  ;;  %v2366_v47 = vpop.f32.mrf.mxu2  ;;  %v2993_v2 = vpack.c.b16 %v2991_v27, %v5206_v33 }
 0x18f   : > { %v2301_v36 = vadd.f32 %v2295_v38, %v2263_v32  ;;  %v2453_v45 = vpop.f32.mrf.mxu0 }
 0x190   : > { %v2326_v24 = vpop.f32.mrf.mxu1 }
 0x191   : > { %v2336_v46 = vadd.f32 %v2326_v24, %v4938_v9  ;;  %v2404_v23 = vpop.f32.mrf.mxu3  ;;  %3594 = vmatmul.msk.bf16.vlgmr.msra.gmra.mxu0 %vm425_vm1, %v5203_v8  ;;  %v5204_v9 = vld [vmem:[#allocation33_spill] sm:$0xff] }
 0x192   : > { %v3095_v56 = vpack.c.b16 %v3093_v49, %v5204_v9  ;;  %3589 = vmatmul.msk.bf16.gmra.mxu2 %vm425_vm1, %v3044_v61 }
 0x193   : > { %v2374_v31 = vadd.f32 %v2364_v60, %v2336_v46  ;;  %3585 = vmatmul.msk.bf16.vlgmr.msra.gmra.mxu1 %vm425_vm1, %v5199_v4 }
 0x195   : > { %v2412_v30 = vadd.f32 %v2402_v44, %v2374_v31  ;;  %v2369_v34 = vpop.f32.mrf.mxu2 }
 0x196   : > { %3592 = vmatmul.msk.bf16.gmra.mxu3 %vm425_vm1, %v3095_v56 }
 0x197   : > { %v2463_v0 = vadd.f32 %v2453_v45, %v2412_v30  ;;  %v2455_v16 = vpop.f32.mrf.mxu0 }
 0x198   : > { %v2328_v7 = vpop.f32.mrf.mxu1 }
 0x199   : > { %v2337_v59 = vadd.f32 %v2328_v7, %v4945_v48  ;;  %v2407_v25 = vpop.f32.mrf.mxu3  ;;  %v3146_v48 = vpack.c.b16 %v3144_v18, %v5207_v62 }
 0x19b   : > { %v2375_v26 = vadd.f32 %v2366_v47, %v2337_v59 }
 0x19d   : > { %v2413_v11 = vadd.f32 %v2404_v23, %v2375_v26  ;;  %v2371_v29 = vpop.f32.mrf.mxu2 }
 0x19f   : > { %v2464_v10 = vadd.f32 %v2455_v16, %v2413_v11  ;;  %v2458_v21 = vpop.f32.mrf.mxu0 }
 0x1a0   : > { %v2331_v17 = vpop.f32.mrf.mxu1 }
 0x1a1   : > { %v2338_v13 = vadd.f32 %v2331_v17, %v2300_v14  ;;  %v2409_v6 = vpop.f32.mrf.mxu3  ;;  %3595 = vmatmul.msk.bf16.gmra.mxu0 %vm425_vm1, %v3146_v48 }
 0x1a3   : > { %v2376_v50 = vadd.f32 %v2369_v34, %v2338_v13  ;;  %3586 = vmatmul.msk.bf16.gmra.mxu1 %vm425_vm1, %v2993_v2 }
 0x1a5   : > { %v2414_v20 = vadd.f32 %v2407_v25, %v2376_v50  ;;  %v2555_v38 = vpop.f32.mrf.mxu2 }
 0x1a7   : > { %v2465_v5 = vadd.f32 %v2458_v21, %v2414_v20  ;;  %v2460_v3 = vpop.f32.mrf.mxu0 }
 0x1a8   : > { %v2333_v57 = vpop.f32.mrf.mxu1 }
 0x1a9   : > { %v2339_v35 = vadd.f32 %v2333_v57, %v2301_v36  ;;  %v2593_v51 = vpop.f32.mrf.mxu3 }
 0x1ab   : > { %v2377_v22 = vadd.f32 %v2371_v29, %v2339_v35 }
 0x1ad   : > { %v2415_v60 = vadd.f32 %v2409_v6, %v2377_v22  ;;  %v2557_v19 = vpop.f32.mrf.mxu2 }
 0x1af   : > { %v2466_v14 = vadd.f32 %v2460_v3, %v2415_v60  ;;  %v2631_v15 = vpop.f32.mrf.mxu0 }
 0x1b0   : > { %v2504_v53 = vpop.f32.mrf.mxu1 }
 0x1b1   : > { %v2514_v32 = vadd.f32 %v2504_v53, %v2463_v0  ;;  %v2595_v58 = vpop.f32.mrf.mxu3 }
 0x1b3   : > { %v2565_v44 = vadd.f32 %v2555_v38, %v2514_v32 }
 0x1b5   : > { %v2603_v52 = vadd.f32 %v2593_v51, %v2565_v44  ;;  %v2560_v31 = vpop.f32.mrf.mxu2 }
 0x1b7   : > { %v2641_v24 = vadd.f32 %v2631_v15, %v2603_v52  ;;  %v2633_v49 = vpop.f32.mrf.mxu0 }
 0x1b8   : > { %v2506_v42 = vpop.f32.mrf.mxu1 }
 0x1b9   : > { %v2515_v1 = vadd.f32 %v2506_v42, %v2464_v10  ;;  %v2598_v45 = vpop.f32.mrf.mxu3 }
 0x1bb   : > { %v2566_v46 = vadd.f32 %v2557_v19, %v2515_v1 }
 0x1bd   : > { %v2604_v36 = vadd.f32 %v2595_v58, %v2566_v46  ;;  %v2562_v61 = vpop.f32.mrf.mxu2 }
 0x1bf   : > { %v2642_v47 = vadd.f32 %v2633_v49, %v2604_v36  ;;  %v2636_v28 = vpop.f32.mrf.mxu0 }
 0x1c0   : > { %v2509_v4 = vpop.f32.mrf.mxu1 }
 0x1c1   : > { %v2516_v54 = vadd.f32 %v2509_v4, %v2465_v5  ;;  %v2600_v23 = vpop.f32.mrf.mxu3 }
 0x1c3   : > { %v2567_v55 = vadd.f32 %v2560_v31, %v2516_v54 }
 0x1c5   : > { %v2605_v30 = vadd.f32 %v2598_v45, %v2567_v55  ;;  %v2707_v0 = vpop.f32.mrf.mxu2 }
 0x1c7   : > { %v2643_v41 = vadd.f32 %v2636_v28, %v2605_v30  ;;  %v2638_v56 = vpop.f32.mrf.mxu0 }
 0x1c8   : > { %v2511_v39 = vpop.f32.mrf.mxu1 }
 0x1c9   : > { %v2517_v8 = vadd.f32 %v2511_v39, %v2466_v14  ;;  %v2758_v12 = vpop.f32.mrf.mxu3 }
 0x1cb   : > { %v2568_v9 = vadd.f32 %v2562_v61, %v2517_v8 }
 0x1cd   : > { %v2606_v63 = vadd.f32 %v2600_v23, %v2568_v9  ;;  %v2709_v26 = vpop.f32.mrf.mxu2  ;;  %v4990_v23 = vld [vmem:[%s5073_s3] sm:$0x7] }
 0x1cf   : > { %v2644_v7 = vadd.f32 %v2638_v56, %v2606_v63  ;;  %v2809_v59 = vpop.f32.mrf.mxu0  ;;  %v3180_v63 = vperm.slane %v4990_v23, 0 }
 0x1d0   : > { %v2669_v43 = vpop.f32.mrf.mxu1 }
 0x1d1   : > { %v2760_v16 = vpop.f32.mrf.mxu3  ;;  %v2679_v21 = vadd.f32 %v2669_v43, %v2641_v24 }
 0x1d3   : > { %v2717_v6 = vadd.f32 %v2707_v0, %v2679_v21 }
 0x1d5   : > { %v2712_v37 = vpop.f32.mrf.mxu2  ;;  %v2768_v35 = vadd.f32 %v2758_v12, %v2717_v6 }
 0x1d7   : > { %v2811_v27 = vpop.f32.mrf.mxu0  ;;  %v2819_v60 = vadd.f32 %v2809_v59, %v2768_v35 }
 0x1d8   : > { %v2671_v34 = vpop.f32.mrf.mxu1 }
 0x1d9   : > { %v2763_v11 = vpop.f32.mrf.mxu3  ;;  %v2680_v22 = vadd.f32 %v2671_v34, %v2642_v47 }
 0x1db   : > { %v2718_v51 = vadd.f32 %v2709_v26, %v2680_v22 }
 0x1dd   : > { %v2714_v10 = vpop.f32.mrf.mxu2  ;;  %v2769_v44 = vadd.f32 %v2760_v16, %v2718_v51 }
 0x1df   : > { %v2814_v18 = vpop.f32.mrf.mxu0  ;;  %v2820_v24 = vadd.f32 %v2811_v27, %v2769_v44 }
 0x1e0   : > { %v2674_v25 = vpop.f32.mrf.mxu1 }
 0x1e1   : > { %v2765_v40 = vpop.f32.mrf.mxu3  ;;  %v2681_v15 = vadd.f32 %v2674_v25, %v2643_v41 }
 0x1e3   : > { %v2719_v42 = vadd.f32 %v2712_v37, %v2681_v15 }
 0x1e5   : > { %v2898_v17 = vpop.f32.mrf.mxu2  ;;  %v2770_v36 = vadd.f32 %v2763_v11, %v2719_v42 }
 0x1e7   : > { %v2816_v2 = vpop.f32.mrf.mxu0  ;;  %v2821_v28 = vadd.f32 %v2814_v18, %v2770_v36 }
 0x1e8   : > { %v2676_v33 = vpop.f32.mrf.mxu1 }
 0x1e9   : > { %v2936_v13 = vpop.f32.mrf.mxu3  ;;  %v2682_v45 = vadd.f32 %v2676_v33, %v2644_v7 }
 0x1eb   : > { %v2720_v61 = vadd.f32 %v2714_v10, %v2682_v45 }
 0x1ed   : > { %v2900_v50 = vpop.f32.mrf.mxu2  ;;  %v2771_v56 = vadd.f32 %v2765_v40, %v2720_v61 }
 0x1ef   : > { %v2974_v48 = vpop.f32.mrf.mxu0  ;;  %v2822_v34 = vadd.f32 %v2816_v2, %v2771_v56 }
 0x1f0   : > { %v2860_v62 = vpop.f32.mrf.mxu1 }
 0x1f1   : > { %v2938_v29 = vpop.f32.mrf.mxu3  ;;  %v2870_v14 = vadd.f32 %v2860_v62, %v2819_v60 }
 0x1f3   : > { %v2908_v52 = vadd.f32 %v2898_v17, %v2870_v14 }
 0x1f5   : > { %v2903_v57 = vpop.f32.mrf.mxu2  ;;  %v2946_v1 = vadd.f32 %v2936_v13, %v2908_v52 }
 0x1f7   : > { %v2976_v5 = vpop.f32.mrf.mxu0  ;;  %v2984_v4 = vadd.f32 %v2974_v48, %v2946_v1 }
 0x1f8   : > { %v2862_v20 = vpop.f32.mrf.mxu1 }
 0x1f9   : > { %v2941_v3 = vpop.f32.mrf.mxu3  ;;  %v2871_v46 = vadd.f32 %v2862_v20, %v2820_v24 }
 0x1fb   : > { %v2909_v54 = vadd.f32 %v2900_v50, %v2871_v46 }
 0x1fd   : > { %v2905_v32 = vpop.f32.mrf.mxu2  ;;  %v2947_v41 = vadd.f32 %v2938_v29, %v2909_v54 }
 0x1ff   : > { %v2979_v53 = vpop.f32.mrf.mxu0  ;;  %v2985_v7 = vadd.f32 %v2976_v5, %v2947_v41 }
 0x200   : > { %v2865_v38 = vpop.f32.mrf.mxu1 }
 0x201   : > { %v2943_v19 = vpop.f32.mrf.mxu3  ;;  %v2872_v39 = vadd.f32 %v2865_v38, %v2821_v28 }
 0x203   : > { %v2910_v43 = vadd.f32 %v2903_v57, %v2872_v39 }
 0x205   : > { %v3063_v31 = vpop.f32.mrf.mxu2  ;;  %v2948_v11 = vadd.f32 %v2941_v3, %v2910_v43 }
 0x207   : > { %v2981_v49 = vpop.f32.mrf.mxu0  ;;  %v2986_v17 = vadd.f32 %v2979_v53, %v2948_v11 }
 0x208   : > { %v2867_v58 = vpop.f32.mrf.mxu1 }
 0x209   : > { %v3114_v47 = vpop.f32.mrf.mxu3  ;;  %v2873_v25 = vadd.f32 %v2867_v58, %v2822_v34 }
 0x20b   : > { %v2911_v13 = vadd.f32 %v2905_v32, %v2873_v25 }
 0x20d   : > { %v3065_v12 = vpop.f32.mrf.mxu2  ;;  %v2949_v20 = vadd.f32 %v2943_v19, %v2911_v13 }
 0x20f   : > { %v3165_v9 = vpop.f32.mrf.mxu0  ;;  %v2987_v22 = vadd.f32 %v2981_v49, %v2949_v20 }
 0x210   : > { %v3012_v55 = vpop.f32.mrf.mxu1 }
 0x211   : > { %v3022_v30 = vadd.f32 %v3012_v55, %v2984_v4  ;;  %v3116_v26 = vpop.f32.mrf.mxu3 }
 0x213   : > { %v3073_v8 = vadd.f32 %v3063_v31, %v3022_v30 }
 0x215   : > { %v3124_v0 = vadd.f32 %v3114_v47, %v3073_v8  ;;  %v3068_v48 = vpop.f32.mrf.mxu2 }
 0x217   : > { %v3175_v59 = vadd.f32 %v3165_v9, %v3124_v0  ;;  %v3167_v10 = vpop.f32.mrf.mxu0 }
 0x218   : > { %v3014_v16 = vpop.f32.mrf.mxu1 }
 0x219   : > { %v4993_v27 = vadd.f32 %v3180_v63, %v3175_v59  ;;  %v3023_v37 = vadd.f32 %v3014_v16, %v2985_v7  ;;  %v3119_v29 = vpop.f32.mrf.mxu3 }
 0x21b   : > { %v3074_v18 = vadd.f32 %v3065_v12, %v3023_v37  ;;  %3185 = vadd.xlane.f32.xlu0 %v4993_v27  ;;  %v3193_v40 = vmul.f32 %v4993_v27, %v4993_v27 }
 0x21d   : > { %v3125_v33 = vadd.f32 %v3116_v26, %v3074_v18  ;;  %3197 = vadd.xlane.f32.xlu2 %v3193_v40  ;;  %v3070_v14 = vpop.f32.mrf.mxu2 }
 0x21f   : > { %v3176_v62 = vadd.f32 %v3167_v10, %v3125_v33  ;;  %v3170_v57 = vpop.f32.mrf.mxu0 }
 0x220   : > { %v3017_v50 = vpop.f32.mrf.mxu1 }
 0x221   : > { %v4998_v2 = vadd.f32 %v3180_v63, %v3176_v62  ;;  %v3024_v21 = vadd.f32 %v3017_v50, %v2986_v17  ;;  %v3121_v44 = vpop.f32.mrf.mxu3 }
 0x223   : > { %v3075_v6 = vadd.f32 %v3068_v48, %v3024_v21  ;;  %3187 = vadd.xlane.f32.xlu0 %v4998_v2  ;;  %v3194_v5 = vmul.f32 %v4998_v2, %v4998_v2 }
 0x225   : > { %v3126_v35 = vadd.f32 %v3119_v29, %v3075_v6  ;;  %3199 = vadd.xlane.f32.xlu2 %v3194_v5  ;;  %v3277_v6 = vperm.slane %v4990_v23, 1 }
 0x227   : > { %v3177_v3 = vadd.f32 %v3170_v57, %v3126_v35  ;;  %v3172_v19 = vpop.f32.mrf.mxu0 }
 0x228   : > { %v3019_v38 = vpop.f32.mrf.mxu1 }
 0x229   : > { %v5003_v60 = vadd.f32 %v3180_v63, %v3177_v3  ;;  %v3025_v51 = vadd.f32 %v3019_v38, %v2987_v22 }
 0x22b   : > { %v3076_v53 = vadd.f32 %v3070_v14, %v3025_v51  ;;  %3189 = vadd.xlane.f32.xlu1 %v5003_v60  ;;  %v3195_v32 = vmul.f32 %v5003_v60, %v5003_v60  ;;  %v3282_v14 = vperm.slane %v4990_v23, 2 }
 0x22d   : > { %v3127_v15 = vadd.f32 %v3121_v44, %v3076_v53  ;;  %3201 = vadd.xlane.f32.xlu0 %v3195_v32 }
 0x22f   : > { %v3178_v52 = vadd.f32 %v3172_v19, %v3127_v15 }
 0x231   : > { %v5008_v58 = vadd.f32 %v3180_v63, %v3178_v52 }
 0x233   : > { %3191 = vadd.xlane.f32.xlu1 %v5008_v58  ;;  %v3196_v24 = vmul.f32 %v5008_v58, %v5008_v58 }
 0x23b   : > { %3203 = vadd.xlane.f32.xlu1 %v3196_v24 }
 0x28e   : > { %v3186_v42 = vpop.xlane.xlu0 %3185 }
 0x28f   : > { %v3205_v1 = vmul.f32 0.03125, %v3186_v42 }
 0x290   : > { %v3198_v46 = vpop.xlane.xlu2 %3197 }
 0x291   : > { %v3213_v49 = vmul.f32 %v3205_v1, %v3205_v1  ;;  %v3209_v31 = vmul.f32 0.03125, %v3198_v46  ;;  %v3225_v62 = vsub.f32 %v4993_v27, %v3205_v1 }
 0x293   : > { %v3217_v36 = vsub.f32 %v3209_v31, %v3213_v49 }
 0x295   : > { %v3221_v45 = vmax.f32 %v3217_v36, 0.0 }
 0x296   : > { %v3188_v47 = vpop.xlane.xlu0 %3187 }
 0x297   : > { %v3229_v4 = vadd.f32 1e-05, %v3221_v45  ;;  %v3206_v54 = vmul.f32 0.03125, %v3188_v47 }
 0x298   : > { %v3200_v55 = vpop.xlane.xlu2 %3199 }
 0x299   : > { %3689 = vrsqrt.f32 %v3229_v4  ;;  %v3214_v28 = vmul.f32 %v3206_v54, %v3206_v54  ;;  %v3210_v61 = vmul.f32 0.03125, %v3200_v55  ;;  %vm3239_vm6 = vweird.f32 %v3229_v4 }
 0x29a   : > { %v3226_v3 = vsub.f32 %v4998_v2, %v3206_v54 }
 0x29b   : > { %v3218_v30 = vsub.f32 %v3210_v61, %v3214_v28 }
 0x29d   : > { %v3222_v41 = vmax.f32 %v3218_v30, 0.0 }
 0x29e   : > { %v3190_v39 = vpop.xlane.xlu1 %3189 }
 0x29f   : > { %v3690_v8 = vpop.eup %3689  ;;  %v5013_v9 = vmul.f32 0.03125, %v3190_v39  ;;  %v3230_v0 = vadd.f32 1e-05, %v3222_v41 }
 0x2a0   : > { %v3234_v56 = vmul.f32 %v3690_v8, %v3229_v4  ;;  %v3202_v63 = vpop.xlane.xlu0 %3201  ;;  %vm3240_vm5 = vweird.f32 %v3690_v8 }
 0x2a1   : > { %v3215_v12 = vmul.f32 %v5013_v9, %v5013_v9  ;;  %v3211_v7 = vmul.f32 0.03125, %v3202_v63  ;;  %3691 = vrsqrt.f32 %v3230_v0  ;;  %vm3241_vm7 = vmor %vm3239_vm6, %vm3240_vm5  ;;  %vm3249_vm9 = vweird.f32 %v3230_v0 }
 0x2a2   : > { %v3235_v43 = vmul.f32 %v3690_v8, %v3234_v56  ;;  %v3227_v45 = vsub.f32 %v5003_v60, %v5013_v9 }
 0x2a3   : > { %v3219_v59 = vsub.f32 %v3211_v7, %v3215_v12 }
 0x2a4   : > { %v3236_v26 = vmul.f32 0.5, %v3235_v43 }
 0x2a5   : > { %v3223_v16 = vmax.f32 %v3219_v59, 0.0 }
 0x2a6   : > { %v3237_v34 = vsub.f32 1.5, %v3236_v26  ;;  %v3192_v37 = vpop.xlane.xlu1 %3191 }
 0x2a7   : > { %v3231_v11 = vadd.f32 1e-05, %v3223_v16  ;;  %v3692_v25 = vpop.eup %3691  ;;  %v3208_v33 = vmul.f32 0.03125, %v3192_v37 }
 0x2a8   : > { %v3238_v18 = vmul.f32 %v3690_v8, %v3237_v34  ;;  %v3244_v10 = vmul.f32 %v3692_v25, %v3230_v0  ;;  %vm3250_vm8 = vweird.f32 %v3692_v25 }
 0x2a9   : > { %3693 = vrsqrt.f32 %v3231_v11  ;;  %v3216_v29 = vmul.f32 %v3208_v33, %v3208_v33  ;;  %vm3251_vm10 = vmor %vm3249_vm9, %vm3250_vm8  ;;  %vm3259_vm12 = vweird.f32 %v3231_v11  ;;  %v3228_v55 = vsub.f32 %v5008_v58, %v3208_v33 }
 0x2aa   : > { %v3245_v40 = vmul.f32 %v3692_v25, %v3244_v10  ;;  %v3242_v17 = vsel %vm3241_vm7, %v3690_v8, %v3238_v18 }
 0x2ab   : > { %v3273_v5 = vmul.f32 %v3242_v17, %v3225_v62 }
 0x2ac   : > { %v3246_v13 = vmul.f32 0.5, %v3245_v40 }
 0x2ad   : > { %v3278_v53 = vmul.f32 %v3277_v6, %v3273_v5 }
 0x2ae   : > { %v3204_v48 = vpop.xlane.xlu1 %3203  ;;  %v3247_v21 = vsub.f32 1.5, %v3246_v13 }
 0x2af   : > { %v3694_v50 = vpop.eup %3693  ;;  %v3212_v20 = vmul.f32 0.03125, %v3204_v48  ;;  %v3283_v24 = vadd.f32 %v3282_v14, %v3278_v53 }
 0x2b0   : > { %v3254_v57 = vmul.f32 %v3694_v50, %v3231_v11  ;;  %v3248_v35 = vmul.f32 %v3692_v25, %v3247_v21  ;;  %vm3260_vm11 = vweird.f32 %v3694_v50 }
 0x2b1   : > { %v3220_v22 = vsub.f32 %v3212_v20, %v3216_v29  ;;  %vm3261_vm13 = vmor %vm3259_vm12, %vm3260_vm11 }
 0x2b2   : > { %v3255_v38 = vmul.f32 %v3694_v50, %v3254_v57  ;;  %v3252_v27 = vsel %vm3251_vm10, %v3692_v25, %v3248_v35 }
 0x2b3   : > { %v3224_v51 = vmax.f32 %v3220_v22, 0.0  ;;  %v3274_v32 = vmul.f32 %v3252_v27, %v3226_v3 }
 0x2b4   : > { %v3256_v19 = vmul.f32 0.5, %v3255_v38 }
 0x2b5   : > { %v3232_v44 = vadd.f32 1e-05, %v3224_v51  ;;  %v3279_v15 = vmul.f32 %v3277_v6, %v3274_v32 }
 0x2b6   : > { %v3257_v42 = vsub.f32 1.5, %v3256_v19 }
 0x2b7   : > { %3695 = vrsqrt.f32 %v3232_v44  ;;  %v3284_v52 = vadd.f32 %v3282_v14, %v3279_v15  ;;  %vm3269_vm15 = vweird.f32 %v3232_v44 }
 0x2b8   : > { %v3258_v46 = vmul.f32 %v3694_v50, %v3257_v42 }
 0x2b9   : > { %v3622_v1 = vpack.c.bf16 %v3284_v52, %v3283_v24 }
 0x2ba   : > { %v3262_v31 = vsel %vm3261_vm13, %v3694_v50, %v3258_v46 }
 0x2bb   : > { %3623 = vst [vmem:[%s5024_s12] sm:$0xff] %v3622_v1   ;;  %v3275_v4 = vmul.f32 %v3262_v31, %v3227_v45 }
 0x2bd   : > { %v3696_v2 = vpop.eup %3695  ;;  %v3280_v61 = vmul.f32 %v3277_v6, %v3275_v4 }
 0x2be   : > { %v3264_v23 = vmul.f32 %v3696_v2, %v3232_v44  ;;  %vm3270_vm14 = vweird.f32 %v3696_v2 }
 0x2bf   : > { %vm3271_vm0 = vmor %vm3269_vm15, %vm3270_vm14  ;;  %v3285_v41 = vadd.f32 %v3282_v14, %v3280_v61 }
 0x2c0   : > { %v3265_v49 = vmul.f32 %v3696_v2, %v3264_v23 }
 0x2c2   : > { %v3266_v36 = vmul.f32 0.5, %v3265_v49 }
 0x2c4   : > { %v3267_v47 = vsub.f32 1.5, %v3266_v36 }
 0x2c6   : > { %v3268_v54 = vmul.f32 %v3696_v2, %v3267_v47 }
 0x2c8   : > { %v3272_v28 = vsel %vm3271_vm0, %v3696_v2, %v3268_v54 }
 0x2c9   : > { %v3276_v30 = vmul.f32 %v3272_v28, %v3228_v55 }
 0x2cb   : > { %v3281_v60 = vmul.f32 %v3277_v6, %v3276_v30 }
 0x2cd   : > { %v3286_v39 = vadd.f32 %v3282_v14, %v3281_v60 }
 0x2cf   : > { %v3627_v8 = vpack.c.bf16 %v3286_v39, %v3285_v41 }
 0x2d1   : > { %3630 = vst [vmem:[%s5024_s12 + $0x8] sm:$0xff] %v3627_v8  }
 0x2d2   : > { %3724 = shalt.err (!%p3721_p6)
}
 0x2d3   : > { %s3777_s10 = smov 64   ;;  %s3778_s11 = smov 4  }
 0x2d4   : > { %3632 = dma.vmem_to_hbm [thread:$0]  (%p3844_p4), %s3311_s26, 256, %s3313_s29, %s3296_s18, %s3777_s10, %s3777_s10, %s3778_s11  }
 0x2d5 PF: > { %p3638_p7 = scmp.ge.s32.totalorder %s3775_s20, 2  ;;  %s3327_s12 = sand.u32 1, %s3755_s15  }
 0x2d6   : > { %s3328_s14 = scalar_lea.sflag [#allocation3], %s3327_s12 }
 0x2d7   : > { %p3635_p9 = pnand %p3638_p7, %p3851_p8 }
 0x2d9   : > { %p3636_p10 = pneg %p3635_p9 }
 0x2db   : > { %3750 = dma.done.wait (%p3636_p10), %s3328_s14, 256  }
 0x2dc   : > { %3752 = vsyncadd (%p3636_p10), %s3328_s14, 4294967040  ;;  %s17_s20 = sadd.s32 1, %s3775_s20   ;;  %s5208_s15 = smov %s3759_s16 }
 0x2dd   : > { %p14_p11 = scmp.ge.s32.totalorder %s17_s20, 4   ;;  %s5209_s16 = smov %s3763_s17 }
 0x2de   : > { %s5210_s17 = smov %s3857_s28  ;;  %s5211_s18 = smov %s3771_s19 }
 0x2df   : > { %s5212_s19 = smov %s5214_s23  ;;  %16 = sbr.rel (!%p14_p11) target bundleno = 4 (0x4), region = 122 }
 0x2e4   :  { %3334 = vsyncpa [#allocation3], 1 }
 0x2e5   :  { %3336 = vsyncpa [#allocation3 + $0x1], 1 }

// kernel: tpu_custom_call.1
= control target key start
LH: loop header
LB: loop body
LE: loop exit
PB: predicated region body
PF: predicated region fallthrough
CT: control target
= control target key end

     0   :  { %8 = vsyncpa [#allocation3], 0  ;;  %s712_s0 = inlined_call_operand.hbm [shape: bf16[32,256], index: 0, kind: input, shape index: {}]   ;;  %s713_s1 = inlined_call_operand.hbm [shape: bf16[256,128], index: 1, kind: input, shape index: {}]   ;;  %s714_s2 = inlined_call_operand.hbm [shape: f32[3,128], index: 2, kind: input, shape index: {}]   ;;  %s715_s3 = inlined_call_operand.hbm [shape: bf16[32,128], index: 3, kind: output, shape index: {}]  }
   0x1   :  { %9 = vsyncpa [#allocation6], 0  ;;  %s28_s14 = sshll.u32 %s713_s1, 4  ;;  %s29_s14 = int_to_ptr.hbm [resolvable:$true] %s28_s14 }
   0x2   :  { %10 = vsyncpa [#allocation4], 0  ;;  %s627_s15 = smov [#allocation5]   ;;  %s15_s19 = sshll.u32 %s712_s0, 4  ;;  %s16_s19 = int_to_ptr.hbm [resolvable:$true] %s15_s19 }
   0x3   :  { %s30_s16 = sshll.u32 %s627_s15, 4  ;;  %s628_s20 = smov 64   ;;  %s31_s16 = int_to_ptr.vmem [resolvable:$true] %s30_s16 }
   0x4   :  { %s629_s21 = smov 4   ;;  %s630_s22 = smov [#allocation2]  }
   0x5   :  { %36 = dma.hbm_to_vmem [thread:$0]  %s29_s14, 2048, %s31_s16, [#allocation6], %s628_s20, %s628_s20, %s629_s21  }
   0x6   :  { %s17_s23 = sshll.u32 %s630_s22, 4  ;;  %s631_s1 = smov 128   ;;  %s18_s23 = int_to_ptr.vmem [resolvable:$true] %s17_s23 }
   0x7   :  { %s632_s24 = smov 8   ;;  %s42_s27 = sshll.u32 %s714_s2, 4  ;;  %s43_s27 = int_to_ptr.hbm [resolvable:$true] %s42_s27 }
   0x8   :  { %23 = dma.hbm_to_vmem [thread:$0]  %s16_s19, 512, %s18_s23, [#allocation3], %s631_s1, %s631_s1, %s632_s24  }
   0x9   :  { %s633_s28 = smov [#allocation7]  }
   0xa   :  { %s44_s0 = sshll.u32 %s633_s28, 4  ;;  %s45_s0 = int_to_ptr.vmem [resolvable:$true] %s44_s0 }
   0xb   :  { %47 = dma.hbm_to_vmem [thread:$0]  %s43_s27, 64, %s45_s0, [#allocation6]  }
   0xc   :  { %621 = dma.done.wait [#allocation3], 512  }
   0xd   :  { %622 = vsyncadd [#allocation3], 4294966784 }
   0xe   :  { %623 = dma.done.wait [#allocation6], 2112  }
   0xf   :  { %624 = vsyncadd [#allocation6], 4294965184  ;;  %v473_v0 = vld [vmem:[#allocation5 + $0x38] sm:$0xff]  ;;  %v472_v2 = vld [vmem:[#allocation5 + $0x30] sm:$0xff]  ;;  %s634_s2 = smov [#allocation8]   ;;  %s368_s5 = sshll.u32 %s715_s3, 4  ;;  %s369_s5 = int_to_ptr.hbm [resolvable:$true] %s368_s5 }
  0x10   :  { %v481_v1 = vld [vmem:[#allocation5 + $0x78] sm:$0xff]  ;;  %214 = vmatpush.bf16.msra.mxu0 %v473_v0  ;;  %493 = vmatpush.bf16.msra.mxu2 %v473_v0  ;;  %v480_v3 = vld [vmem:[#allocation5 + $0x70] sm:$0xff]  ;;  %v471_v4 = vld [vmem:[#allocation5 + $0x28] sm:$0xff]  ;;  %s366_s29 = sshll.u32 %s634_s2, 4  ;;  %s367_s29 = int_to_ptr.vmem [resolvable:$true] %s366_s29 }
  0x11   :  { %233 = vmatpush.bf16.msra.mxu1 %v481_v1  ;;  %501 = vmatpush.bf16.msra.mxu3 %v481_v1  ;;  %v479_v5 = vld [vmem:[#allocation5 + $0x68] sm:$0xff]  ;;  %v470_v6 = vld [vmem:[#allocation5 + $0x20] sm:$0xff]  ;;  %v469_v8 = vld [vmem:[#allocation5 + $0x18] sm:$0xff] }
  0x12   :  { %v478_v7 = vld [vmem:[#allocation5 + $0x60] sm:$0xff]  ;;  %v477_v9 = vld [vmem:[#allocation5 + $0x58] sm:$0xff]  ;;  %v468_v10 = vld [vmem:[#allocation5 + $0x10] sm:$0xff] }
  0x13   :  { %v476_v11 = vld [vmem:[#allocation5 + $0x50] sm:$0xff]  ;;  %v467_v12 = vld [vmem:[#allocation5 + $0x8] sm:$0xff]  ;;  %v466_v14 = vld [vmem:[#allocation5] sm:$0xff] }
  0x14   :  { %215 = vmatpush.bf16.msra.mxu0 %v472_v2  ;;  %494 = vmatpush.bf16.msra.mxu2 %v472_v2  ;;  %v475_v13 = vld [vmem:[#allocation5 + $0x48] sm:$0xff]  ;;  %v474_v15 = vld [vmem:[#allocation5 + $0x40] sm:$0xff]  ;;  %v392_v18 = vld [vmem:[#allocation2 + $0x10] sm:$0xf] }
  0x15   :  { %234 = vmatpush.bf16.msra.mxu1 %v480_v3  ;;  %502 = vmatpush.bf16.msra.mxu3 %v480_v3  ;;  %v384_v16 = vld [vmem:[#allocation2] sm:$0xf]  ;;  %v463_v17 = vld [vmem:[#allocation2 + $0x4] sm:$0xf0]  ;;  %v465_v19 = vld [vmem:[#allocation2 + $0x14] sm:$0xf0] }
  0x16   :  { %v462_v20 = vld [vmem:[#allocation2 + $0x4] sm:$0xf]  ;;  %v386_v21 = vld [vmem:[#allocation2 + $0x8] sm:$0xf0]  ;;  %v464_v22 = vld [vmem:[#allocation2 + $0x14] sm:$0xf]  ;;  %v385_v24 = vor.u32 %v463_v17, %v384_v16  ;;  %v393_v25 = vor.u32 %v465_v19, %v392_v18 }
  0x17   :  { %v394_v23 = vld [vmem:[#allocation2 + $0x18] sm:$0xf0]  ;;  %v389_v26 = vor.u32 %v462_v20, %v386_v21  ;;  %v667_v28 = vld [vmem:[#allocation7] sm:$0x7] }
  0x18   :  { %216 = vmatpush.bf16.msra.mxu0 %v471_v4  ;;  %495 = vmatpush.bf16.msra.mxu2 %v471_v4  ;;  %v397_v27 = vor.u32 %v464_v22, %v394_v23  ;;  %v97_v29 = vperm.slane %v667_v28, 0 }
  0x19   :  { %235 = vmatpush.bf16.msra.mxu1 %v479_v5  ;;  %503 = vmatpush.bf16.msra.mxu3 %v479_v5 }
  0x1c   :  { %217 = vmatpush.bf16.msra.mxu0 %v470_v6  ;;  %496 = vmatpush.bf16.msra.mxu2 %v470_v6 }
  0x1d   :  { %236 = vmatpush.bf16.msra.mxu1 %v478_v7  ;;  %504 = vmatpush.bf16.msra.mxu3 %v478_v7 }
  0x20   :  { %218 = vmatpush.bf16.msra.mxu0 %v469_v8  ;;  %497 = vmatpush.bf16.msra.mxu2 %v469_v8 }
  0x21   :  { %237 = vmatpush.bf16.msra.mxu1 %v477_v9  ;;  %505 = vmatpush.bf16.msra.mxu3 %v477_v9 }
  0x24   :  { %219 = vmatpush.bf16.msra.mxu0 %v468_v10  ;;  %498 = vmatpush.bf16.msra.mxu2 %v468_v10 }
  0x25   :  { %238 = vmatpush.bf16.msra.mxu1 %v476_v11  ;;  %506 = vmatpush.bf16.msra.mxu3 %v476_v11 }
  0x28   :  { %220 = vmatpush.bf16.msra.mxu0 %v467_v12  ;;  %499 = vmatpush.bf16.msra.mxu2 %v467_v12 }
  0x29   :  { %239 = vmatpush.bf16.msra.mxu1 %v475_v13  ;;  %507 = vmatpush.bf16.msra.mxu3 %v475_v13 }
  0x2c   :  { %221 = vmatpush.bf16.msra.mxu0 %v466_v14  ;;  %500 = vmatpush.bf16.msra.mxu2 %v466_v14 }
  0x2d   :  { %240 = vmatpush.bf16.msra.mxu1 %v474_v15  ;;  %508 = vmatpush.bf16.msra.mxu3 %v474_v15 }
  0x2f   :  { %222 = vmatmul.bf16.vlgmr.msra.gmra.mxu0 %v385_v24  ;;  %227 = vmatmul.bf16.vlgmr.msra.gmra.mxu2 %v393_v25 }
  0x30   :  { %241 = vmatmul.bf16.vlgmr.msra.gmra.mxu1 %v389_v26  ;;  %246 = vmatmul.bf16.vlgmr.msra.gmra.mxu3 %v397_v27 }
  0xac   :  { %v223_v30 = vpop.f32.mrf.mxu0 }
  0xad   :  { %v224_v31 = vadd.f32 %v223_v30, %v97_v29  ;;  %v242_v32 = vpop.f32.mrf.mxu1 }
  0xaf   :  { %v670_v33 = vadd.f32 %v242_v32, %v224_v31 }
  0xb1   :  { %252 = vadd.xlane.f32.xlu0 %v670_v33  ;;  %v264_v34 = vmul.f32 %v670_v33, %v670_v33 }
  0xb2   :  { %v228_v35 = vpop.f32.mrf.mxu2 }
  0xb3   :  { %v229_v36 = vadd.f32 %v228_v35, %v97_v29  ;;  %v247_v37 = vpop.f32.mrf.mxu3  ;;  %268 = vadd.xlane.f32.xlu2 %v264_v34  ;;  %v344_v34 = vperm.slane %v667_v28, 1 }
  0xb4   :  { %v225_v38 = vpop.f32.mrf.mxu0 }
  0xb5   :  { %v675_v39 = vadd.f32 %v247_v37, %v229_v36  ;;  %v226_v40 = vadd.f32 %v225_v38, %v97_v29  ;;  %v244_v41 = vpop.f32.mrf.mxu1 }
  0xb7   :  { %v677_v42 = vadd.f32 %v244_v41, %v226_v40  ;;  %256 = vadd.xlane.f32.xlu1 %v675_v39  ;;  %v266_v48 = vmul.f32 %v675_v39, %v675_v39 }
  0xb9   :  { %254 = vadd.xlane.f32.xlu0 %v677_v42  ;;  %v265_v43 = vmul.f32 %v677_v42, %v677_v42 }
  0xba   :  { %v230_v44 = vpop.f32.mrf.mxu2 }
  0xbb   :  { %v231_v45 = vadd.f32 %v230_v44, %v97_v29  ;;  %270 = vadd.xlane.f32.xlu2 %v265_v43  ;;  %v249_v46 = vpop.f32.mrf.mxu3  ;;  %v349_v44 = vperm.slane %v667_v28, 2 }
  0xbd   :  { %v683_v47 = vadd.f32 %v249_v46, %v231_v45 }
  0xbf   :  { %258 = vadd.xlane.f32.xlu1 %v683_v47  ;;  %v267_v49 = vmul.f32 %v683_v47, %v683_v47 }
  0xc1   :  { %272 = vadd.xlane.f32.xlu0 %v266_v48 }
  0xc7   :  { %274 = vadd.xlane.f32.xlu1 %v267_v49 }
 0x124   :  { %v253_v50 = vpop.xlane.xlu0 %252 }
 0x125   :  { %v260_v51 = vmul.f32 0.03125, %v253_v50 }
 0x126   :  { %v269_v52 = vpop.xlane.xlu2 %268 }
 0x127   :  { %v280_v53 = vmul.f32 %v260_v51, %v260_v51  ;;  %v276_v54 = vmul.f32 0.03125, %v269_v52  ;;  %v292_v30 = vsub.f32 %v670_v33, %v260_v51 }
 0x129   :  { %v284_v55 = vsub.f32 %v276_v54, %v280_v53 }
 0x12a   :  { %v257_v56 = vpop.xlane.xlu1 %256 }
 0x12b   :  { %v288_v57 = vmax.f32 %v284_v55, 0.0  ;;  %v690_v0 = vmul.f32 0.03125, %v257_v56 }
 0x12c   :  { %v255_v58 = vpop.xlane.xlu0 %254 }
 0x12d   :  { %v296_v59 = vadd.f32 1e-05, %v288_v57  ;;  %v261_v60 = vmul.f32 0.03125, %v255_v58  ;;  %v282_v6 = vmul.f32 %v690_v0, %v690_v0  ;;  %v294_v56 = vsub.f32 %v675_v39, %v690_v0 }
 0x12e   :  { %v271_v61 = vpop.xlane.xlu2 %270 }
 0x12f   :  { %517 = vrsqrt.f32 %v296_v59  ;;  %v281_v62 = vmul.f32 %v261_v60, %v261_v60  ;;  %v277_v63 = vmul.f32 0.03125, %v271_v61  ;;  %vm306_vm0 = vweird.f32 %v296_v59 }
 0x130   :  { %v293_v40 = vsub.f32 %v677_v42, %v261_v60 }
 0x131   :  { %v285_v1 = vsub.f32 %v277_v63, %v281_v62 }
 0x132   :  { %v259_v2 = vpop.xlane.xlu1 %258 }
 0x133   :  { %v289_v3 = vmax.f32 %v285_v1, 0.0  ;;  %v694_v10 = vmul.f32 0.03125, %v259_v2 }
 0x134   :  { %v273_v4 = vpop.xlane.xlu0 %272 }
 0x135   :  { %v518_v5 = vpop.eup %517  ;;  %v278_v7 = vmul.f32 0.03125, %v273_v4  ;;  %v297_v9 = vadd.f32 1e-05, %v289_v3  ;;  %v283_v16 = vmul.f32 %v694_v10, %v694_v10  ;;  %v295_v60 = vsub.f32 %v683_v47, %v694_v10 }
 0x136   :  { %v301_v8 = vmul.f32 %v518_v5, %v296_v59  ;;  %vm307_vm1 = vweird.f32 %v518_v5 }
 0x137   :  { %v286_v11 = vsub.f32 %v278_v7, %v282_v6  ;;  %519 = vrsqrt.f32 %v297_v9  ;;  %vm308_vm2 = vmor %vm306_vm0, %vm307_vm1  ;;  %vm316_vm4 = vweird.f32 %v297_v9 }
 0x138   :  { %v302_v12 = vmul.f32 %v518_v5, %v301_v8 }
 0x139   :  { %v290_v13 = vmax.f32 %v286_v11, 0.0 }
 0x13a   :  { %v303_v14 = vmul.f32 0.5, %v302_v12  ;;  %v275_v15 = vpop.xlane.xlu1 %274 }
 0x13b   :  { %v298_v17 = vadd.f32 1e-05, %v290_v13  ;;  %v279_v18 = vmul.f32 0.03125, %v275_v15 }
 0x13c   :  { %v304_v19 = vsub.f32 1.5, %v303_v14 }
 0x13d   :  { %521 = vrsqrt.f32 %v298_v17  ;;  %v287_v20 = vsub.f32 %v279_v18, %v283_v16  ;;  %v520_v21 = vpop.eup %519  ;;  %vm326_vm7 = vweird.f32 %v298_v17 }
 0x13e   :  { %v305_v22 = vmul.f32 %v518_v5, %v304_v19  ;;  %v311_v23 = vmul.f32 %v520_v21, %v297_v9  ;;  %vm317_vm3 = vweird.f32 %v520_v21 }
 0x13f   :  { %v291_v24 = vmax.f32 %v287_v20, 0.0  ;;  %vm318_vm5 = vmor %vm316_vm4, %vm317_vm3 }
 0x140   :  { %v312_v25 = vmul.f32 %v520_v21, %v311_v23  ;;  %v309_v27 = vsel %vm308_vm2, %v518_v5, %v305_v22 }
 0x141   :  { %v299_v26 = vadd.f32 1e-05, %v291_v24  ;;  %v340_v35 = vmul.f32 %v309_v27, %v292_v30 }
 0x142   :  { %v313_v31 = vmul.f32 0.5, %v312_v25 }
 0x143   :  { %v522_v29 = vpop.eup %521  ;;  %523 = vrsqrt.f32 %v299_v26  ;;  %v345_v33 = vmul.f32 %v344_v34, %v340_v35  ;;  %vm336_vm10 = vweird.f32 %v299_v26 }
 0x144   :  { %v321_v32 = vmul.f32 %v522_v29, %v298_v17  ;;  %v314_v36 = vsub.f32 1.5, %v313_v31  ;;  %vm327_vm6 = vweird.f32 %v522_v29 }
 0x145   :  { %vm328_vm8 = vmor %vm326_vm7, %vm327_vm6  ;;  %v350_v55 = vadd.f32 %v349_v44, %v345_v33 }
 0x146   :  { %v322_v37 = vmul.f32 %v522_v29, %v321_v32  ;;  %v315_v38 = vmul.f32 %v520_v21, %v314_v36 }
 0x148   :  { %v323_v41 = vmul.f32 0.5, %v322_v37  ;;  %v319_v45 = vsel %vm318_vm5, %v520_v21, %v315_v38 }
 0x149   :  { %v524_v43 = vpop.eup %523  ;;  %v341_v46 = vmul.f32 %v319_v45, %v293_v40 }
 0x14a   :  { %v324_v48 = vsub.f32 1.5, %v323_v41  ;;  %v331_v49 = vmul.f32 %v524_v43, %v299_v26  ;;  %vm337_vm9 = vweird.f32 %v524_v43 }
 0x14b   :  { %v346_v52 = vmul.f32 %v344_v34, %v341_v46  ;;  %vm338_vm11 = vmor %vm336_vm10, %vm337_vm9 }
 0x14c   :  { %v325_v50 = vmul.f32 %v522_v29, %v324_v48  ;;  %v332_v51 = vmul.f32 %v524_v43, %v331_v49 }
 0x14d   :  { %v351_v42 = vadd.f32 %v349_v44, %v346_v52 }
 0x14e   :  { %v329_v53 = vsel %vm328_vm8, %v522_v29, %v325_v50  ;;  %v333_v54 = vmul.f32 0.5, %v332_v51 }
 0x14f   :  { %v485_v28 = vpack.c.bf16 %v351_v42, %v350_v55  ;;  %v342_v58 = vmul.f32 %v329_v53, %v294_v56 }
 0x150   :  { %v334_v57 = vsub.f32 1.5, %v333_v54 }
 0x151   :  { %486 = vst [vmem:[#allocation8] sm:$0xff] %v485_v28   ;;  %v347_v63 = vmul.f32 %v344_v34, %v342_v58 }
 0x152   :  { %v335_v59 = vmul.f32 %v524_v43, %v334_v57 }
 0x153   :  { %v352_v39 = vadd.f32 %v349_v44, %v347_v63 }
 0x154   :  { %v339_v61 = vsel %vm338_vm11, %v524_v43, %v335_v59 }
 0x155   :  { %v343_v62 = vmul.f32 %v339_v61, %v295_v60 }
 0x157   :  { %v348_v1 = vmul.f32 %v344_v34, %v343_v62 }
 0x159   :  { %v353_v0 = vadd.f32 %v349_v44, %v348_v1 }
 0x15b   :  { %v490_v2 = vpack.c.bf16 %v353_v0, %v352_v39 }
 0x15d   :  { %492 = vst [vmem:[#allocation8 + $0x8] sm:$0xff] %v490_v2  }
 0x15e   :  { %374 = dma.vmem_to_hbm [thread:$0]  %s367_s29, 256, %s369_s5, [#allocation4], %s628_s20, %s628_s20, %s629_s21  }
 0x15f   :  { %625 = dma.done.wait [#allocation4], 256  }
 0x160   :  { %626 = vsyncadd [#allocation4], 4294967040 }
 0x161   :  { %379 = vsyncpa [#allocation3], 1 }
 0x162   :  { %380 = vsyncpa [#allocation6], 1 }
 0x163   :  { %381 = vsyncpa [#allocation4], 1 }

</bundles_post_ra>
